<compile_context>
chip_gen: v7x
topology: tpu7x:2x2x1
jax: 0.10.0
libtpu: 0.0.40
codegen_flags: <defaults>
</compile_context>

<pallas_src>
import functools

import jax
import jax.numpy as jnp
from jax.experimental import pallas as pl
from jax.experimental.pallas import tpu as pltpu

NEG_SLOPE = 0.2        # leaky_relu negative slope used by HBS/HBNS attention
NEG_BIG = -1e30
SUBLANE = 8

INTER = 128            # intermediate channels, padded 60 -> 128 (zero pad, exact)
FINAL_0 = 128          # final rank-0 channels, padded 60 -> 128 (branch is dead)
FINAL_1 = 256
FINAL_2 = 256


# --------------------------- in-kernel math ----------------------------------

def _leaky_relu(x):
    return jnp.where(x >= 0, x, NEG_SLOPE * x)


def _row_softmax(logits, mask):
    """Row softmax restricted to `mask`; fully-masked rows produce zeros
    (matches torch.sparse.softmax on an empty sparse row)."""
    masked = jnp.where(mask, logits, NEG_BIG)
    m = jnp.max(masked, axis=-1, keepdims=True)
    e = jnp.where(mask, jnp.exp(masked - m), 0.0)
    return e / jnp.maximum(jnp.sum(e, axis=-1, keepdims=True), 1e-30)


def _col_softmax(logits, mask):
    """Column softmax restricted to `mask` (== row softmax of the transposed
    problem, computed without materializing a transpose)."""
    masked = jnp.where(mask, logits, NEG_BIG)
    m = jnp.max(masked, axis=0, keepdims=True)
    e = jnp.where(mask, jnp.exp(masked - m), 0.0)
    return e / jnp.maximum(jnp.sum(e, axis=0, keepdims=True), 1e-30)


def _hbs_block(x, w, a_rows, nbhd):
    """Higher-order attention block, square (within-rank) neighborhood.

    x: (n, d_in)   w: (d_in, d)   a_rows: (2, d)   nbhd: (n, n)  ->  (n, d)
    """
    # NOTE: for bit-level parity with fp32 PyTorch, pass precision=HIGHEST to
    # the dots; default matmul precision is kept here (matches prior version).
    msg = jnp.dot(x, w, preferred_element_type=jnp.float32)            # (n, d)
    # attention scores on the VPU (no N=2 MXU matmul): lane reduce per row.
    p = jnp.sum(msg * a_rows[0:1, :], axis=-1, keepdims=True)           # (n, 1)
    q = jnp.sum(msg * a_rows[1:2, :], axis=-1, keepdims=True)           # (n, 1)
    logits = _leaky_relu(p + jnp.transpose(q))                          # (n, n)
    att = _row_softmax(logits, nbhd != 0)
    out = jnp.dot(att, msg, preferred_element_type=jnp.float32)
    return jnp.maximum(out, 0.0)             # update_func_attention = "relu"


def _hbns_block(xs, xt, ws, wt, a_s, a_t, nbhd, need_tgt=True):
    """Higher-order attention block, non-square (across-rank) neighborhood.

    xs: (n_s, s_in)  xt: (n_t, t_in)  ws: (s_in, t_out)  wt: (t_in, s_out)
    a_s: (1, t_out)  a_t: (1, s_out)  nbhd: (n_t, n_s)
    Returns (out_src (n_s, s_out), out_tgt (n_t, t_out) or None).
    """
    s_msg = jnp.dot(xs, ws, preferred_element_type=jnp.float32)         # (n_s, t_out)
    t_msg = jnp.dot(xt, wt, preferred_element_type=jnp.float32)         # (n_t, s_out)
    s_score = jnp.sum(s_msg * a_s, axis=-1, keepdims=True)              # (n_s, 1)
    t_score = jnp.sum(t_msg * a_t, axis=-1, keepdims=True)              # (n_t, 1)
    # shared logits for both directions: logits[i, j] = leaky(t_i + s_j)
    logits = _leaky_relu(t_score + jnp.transpose(s_score))              # (n_t, n_s)
    mask = nbhd != 0

    # source <- target: column softmax of the shared logits is att_st^T; the
    # dim-0 contraction realizes att_st @ t_msg without any transposed matrix.
    att_st_t = _col_softmax(logits, mask)                               # (n_t, n_s)
    out_src = jnp.maximum(
        jax.lax.dot_general(att_st_t, t_msg, (((0,), (0,)), ((), ())),
                            preferred_element_type=jnp.float32), 0.0)   # (n_s, s_out)

    out_tgt = None
    if need_tgt:
        att_ts = _row_softmax(logits, mask)                             # (n_t, n_s)
        out_tgt = jnp.maximum(
            jnp.dot(att_ts, s_msg, preferred_element_type=jnp.float32), 0.0)
    return out_src, out_tgt


# --------------------------- fused Pallas kernel ------------------------------

def cc_embedder_kernel(
    # cell features
    x0_ref, x1_ref, x2_ref,
    # neighborhoods (dense masks: rows = target cells, cols = source cells)
    n00_ref, n11_ref, n22_ref, n01_ref, n12_ref,
    # level-1 weights
    w00_ref, a00_ref,                                   # HBS rank 0
    ws01_ref, wt01_ref, as01_ref, at01_ref,             # HBNS ranks 0-1
    ws12_ref, wt12_ref, as12_ref, at12_ref,             # HBNS ranks 1-2
    # level-2 weights
    w11_ref, a11_ref,                                   # HBS rank 1
    w22_ref, a22_ref,                                   # HBS rank 2
    ws01b_ref, wt01b_ref, as01b_ref, at01b_ref,         # HBNS ranks 0-1
    ws12b_ref, wt12b_ref, as12b_ref, at12b_ref,         # HBNS ranks 1-2
    # outputs
    x1_out_ref, x2_out_ref,
):
    x0 = x0_ref[...]
    x1 = x1_ref[...]
    x2 = x2_ref[...]
    n00 = n00_ref[...]
    n11 = n11_ref[...]
    n22 = n22_ref[...]
    n01 = n01_ref[...]
    n12 = n12_ref[...]

    # ---------------- HMC layer, attention level 1 ----------------
    x_0_to_0 = _hbs_block(x0, w00_ref[...], a00_ref[...], n00)
    x_0_to_1, x_1_to_0 = _hbns_block(x1, x0, ws01_ref[...], wt01_ref[...],
                                     as01_ref[...], at01_ref[...], n01)
    x_1_to_2, x_2_to_1 = _hbns_block(x2, x1, ws12_ref[...], wt12_ref[...],
                                     as12_ref[...], at12_ref[...], n12)

    # Aggregation(aggr_func="sum", update_func="relu"), kept in VMEM.
    x_0_l1 = jnp.maximum(x_0_to_0 + x_1_to_0, 0.0)
    x_1_l1 = jnp.maximum(x_0_to_1 + x_2_to_1, 0.0)
    x_2_l1 = jnp.maximum(x_1_to_2, 0.0)

    # ---------------- HMC layer, attention level 2 ----------------
    # hbs_0_l2 and the rank-0 (target) branch of hbns_0_1_l2 only feed x_0_out,
    # which CCEmbedder.forward discards -> not computed.
    x_1_to_1 = _hbs_block(x_1_l1, w11_ref[...], a11_ref[...], n11)
    x_2_to_2 = _hbs_block(x_2_l1, w22_ref[...], a22_ref[...], n22)
    x_0_to_1b, _ = _hbns_block(x_1_l1, x_0_l1, ws01b_ref[...], wt01b_ref[...],
                               as01b_ref[...], at01b_ref[...], n01,
                               need_tgt=False)
    x_1_to_2b, x_2_to_1b = _hbns_block(x_2_l1, x_1_l1, ws12b_ref[...],
                                       wt12b_ref[...], as12b_ref[...],
                                       at12b_ref[...], n12)

    x1_out_ref[...] = jnp.maximum(x_0_to_1b + x_1_to_1 + x_2_to_1b, 0.0)
    x2_out_ref[...] = jnp.maximum(x_1_to_2b + x_2_to_2, 0.0)


# --------------------------- parameters --------------------------------------

def _xavier(key, shape, gain=1.414):
    fan_in, fan_out = shape[0], shape[-1]
    limit = gain * (6.0 / (fan_in + fan_out)) ** 0.5
    return jax.random.uniform(key, shape, jnp.float32, -limit, limit)


def init_params(key, f0, f1, f2, embedding_dim=256):
    """Faithful to the PyTorch module's channel config (60 / (60, 256, 256))."""
    inter = (60, 60, 60)
    final = (60, 256, 256)
    keys = iter(jax.random.split(key, 64))

    def hbs_p(d_in, d_out):
        return {"w": _xavier(next(keys), (d_in, d_out)),
                "a": _xavier(next(keys), (d_out, 2))}

    def hbns_p(s_in, s_out, t_in, t_out):
        return {"w_s": _xavier(next(keys), (s_in, t_out)),
                "w_t": _xavier(next(keys), (t_in, s_out)),
                "a_s": _xavier(next(keys), (t_out, 1)),
                "a_t": _xavier(next(keys), (s_out, 1))}

    p = {}
    # level 1
    p["hbs_0_l1"] = hbs_p(f0, inter[0])
    p["hbns_0_1_l1"] = hbns_p(f1, inter[1], f0, inter[0])
    p["hbns_1_2_l1"] = hbns_p(f2, inter[2], f1, inter[1])
    # level 2
    p["hbs_0_l2"] = hbs_p(inter[0], final[0])     # dead: feeds only discarded x_0
    p["hbs_1_l2"] = hbs_p(inter[1], final[1])
    p["hbs_2_l2"] = hbs_p(inter[2], final[2])
    p["hbns_0_1_l2"] = hbns_p(inter[1], final[1], inter[0], final[0])
    p["hbns_1_2_l2"] = hbns_p(inter[2], final[2], inter[1], final[1])
    # fc_0 / fc_1 exist in CCEmbedder.__init__ but are NOT used in forward().
    p["fc_0"] = {"w": _xavier(next(keys), (60, embedding_dim)),
                 "b": jnp.zeros((embedding_dim,), jnp.float32)}
    p["fc_1"] = {"w": _xavier(next(keys), (60, embedding_dim)),
                 "b": jnp.zeros((embedding_dim,), jnp.float32)}
    return p


def _round_up(n, m):
    return (n + m - 1) // m * m


def _pad_to(x, shape):
    pads = [(0, t - s) for s, t in zip(x.shape, shape)]
    if any(p[1] for p in pads):
        return jnp.pad(x, pads)
    return x


def prepare_params(params):
    """One-time transpose + zero-pad of the weights so the fused kernel sees
    lane-aligned channel dims (60 -> 128).  Zero padding is mathematically
    exact for this architecture (padded channels stay identically zero)."""
    f0 = params["hbs_0_l1"]["w"].shape[0]
    f1 = params["hbns_0_1_l1"]["w_s"].shape[0]
    f2 = params["hbns_1_2_l1"]["w_s"].shape[0]

    def pad_hbs(p, d_in, d_out):
        return (_pad_to(p["w"], (d_in, d_out)),
                _pad_to(jnp.transpose(p["a"]), (2, d_out)))       # (2, d_out)

    def pad_hbns(p, s_in, t_out, t_in, s_out):
        return (_pad_to(p["w_s"], (s_in, t_out)),
                _pad_to(p["w_t"], (t_in, s_out)),
                _pad_to(jnp.transpose(p["a_s"]), (1, t_out)),      # row vectors
                _pad_to(jnp.transpose(p["a_t"]), (1, s_out)))

    prepared = {
        "hbs_0_l1": pad_hbs(params["hbs_0_l1"], f0, INTER),
        "hbns_0_1_l1": pad_hbns(params["hbns_0_1_l1"], f1, INTER, f0, INTER),
        "hbns_1_2_l1": pad_hbns(params["hbns_1_2_l1"], f2, INTER, f1, INTER),
        "hbs_1_l2": pad_hbs(params["hbs_1_l2"], INTER, FINAL_1),
        "hbs_2_l2": pad_hbs(params["hbs_2_l2"], INTER, FINAL_2),
        "hbns_0_1_l2": pad_hbns(params["hbns_0_1_l2"], INTER, FINAL_0, INTER, FINAL_1),
        "hbns_1_2_l2": pad_hbns(params["hbns_1_2_l2"], INTER, FINAL_1, INTER, FINAL_2),
    }
    return prepared


# --------------------------- CCEmbedder forward -------------------------------

def cc_embedder_forward(prepared, x_0, x_1, x_2, n00, n11, n22, n01, n12):
    n0, n1, n2 = x_0.shape[0], x_1.shape[0], x_2.shape[0]
    f0, f1, f2 = x_0.shape[1], x_1.shape[1], x_2.shape[1]
    P0, P1, P2 = (_round_up(n, SUBLANE) for n in (n0, n1, n2))

    # pad cell counts to sublane multiples; padded cells have empty
    # neighborhoods so they contribute nothing and are sliced off at the end.
    inputs = (
        _pad_to(x_0, (P0, f0)), _pad_to(x_1, (P1, f1)), _pad_to(x_2, (P2, f2)),
        _pad_to(n00, (P0, P0)), _pad_to(n11, (P1, P1)), _pad_to(n22, (P2, P2)),
        _pad_to(n01, (P0, P1)), _pad_to(n12, (P1, P2)),
        *prepared["hbs_0_l1"],
        *prepared["hbns_0_1_l1"],
        *prepared["hbns_1_2_l1"],
        *prepared["hbs_1_l2"],
        *prepared["hbs_2_l2"],
        *prepared["hbns_0_1_l2"],
        *prepared["hbns_1_2_l2"],
    )

    # advisory cost estimate for XLA's scheduler (all shapes are static ints)
    matmuls = [
        # level 1
        (P0, f0, INTER), (P0, P0, INTER),                                  # HBS 0
        (P1, f1, INTER), (P0, f0, INTER), (P0, P1, INTER), (P1, P0, INTER),  # HBNS 0-1
        (P2, f2, INTER), (P1, f1, INTER), (P1, P2, INTER), (P2, P1, INTER),  # HBNS 1-2
        # level 2
        (P1, INTER, FINAL_1), (P1, P1, FINAL_1),                           # HBS 1
        (P2, INTER, FINAL_2), (P2, P2, FINAL_2),                           # HBS 2
        (P1, INTER, FINAL_0), (P0, INTER, FINAL_1), (P1, P0, FINAL_1),     # HBNS 0-1
        (P2, INTER, FINAL_1), (P1, INTER, FINAL_2),
        (P1, P2, FINAL_1), (P2, P1, FINAL_2),                              # HBNS 1-2
    ]
    flops = 2 * sum(m * k * n for m, k, n in matmuls)
    transcendentals = (P0 * P0 + P1 * P1 + P2 * P2
                       + 3 * P0 * P1 + 4 * P1 * P2)
    in_bytes = sum(int(a.size) * a.dtype.itemsize for a in inputs)
    out_bytes = 4 * (P1 * FINAL_1 + P2 * FINAL_2)

    vmem = pl.BlockSpec(memory_space=pltpu.MemorySpace.VMEM)
    x1_out, x2_out = pl.pallas_call(
        cc_embedder_kernel,
        out_shape=(jax.ShapeDtypeStruct((P1, FINAL_1), jnp.float32),
                   jax.ShapeDtypeStruct((P2, FINAL_2), jnp.float32)),
        in_specs=[vmem] * len(inputs),
        out_specs=(vmem, vmem),
        compiler_params=pltpu.CompilerParams(
            # padded working set is << 1 MiB; 32 MiB is safe on v5e/v6e/v7x.
            vmem_limit_bytes=32 * 1024 * 1024),
        cost_estimate=pl.CostEstimate(flops=flops,
                                      transcendentals=transcendentals,
                                      bytes_accessed=in_bytes + out_bytes),
    )(*inputs)

    # CCEmbedder.forward returns only (x_1, x_2); x_0_out is never computed.
    return x1_out[:n1], x2_out[:n2]


# --------------------------- demo / smoke test --------------------------------

if __name__ == "__main__":
    key = jax.random.PRNGKey(0)
    k = jax.random.split(key, 10)

    # small synthetic combinatorial complex
    f0, f1, f2 = 4, 6, 5            # feature_n_0_cells / _1_cells / _2_cells
    n0, n1, n2 = 16, 24, 8          # number of 0/1/2-cells

    params = init_params(k[0], f0, f1, f2, embedding_dim=256)
    prepared = prepare_params(params)

    x_0 = jax.random.normal(k[1], (n0, f0), jnp.float32)
    x_1 = jax.random.normal(k[2], (n1, f1), jnp.float32)
    x_2 = jax.random.normal(k[3], (n2, f2), jnp.float32)

    def rand_nbhd(kk, shape, p=0.4):
        m = jax.random.bernoulli(kk, p, shape).astype(jnp.float32)
        if shape[0] == shape[1]:
            m = jnp.maximum(m, jnp.eye(shape[0], dtype=jnp.float32))
        return m

    n00 = rand_nbhd(k[4], (n0, n0))
    n11 = rand_nbhd(k[5], (n1, n1))
    n22 = rand_nbhd(k[6], (n2, n2))
    n01 = rand_nbhd(k[7], (n0, n1))   # rows: 0-cells, cols: 1-cells
    n12 = rand_nbhd(k[8], (n1, n2))   # rows: 1-cells, cols: 2-cells

    fwd = jax.jit(functools.partial(cc_embedder_forward, prepared))
    x1_out, x2_out = fwd(x_0, x_1, x_2, n00, n11, n22, n01, n12)
    jax.block_until_ready((x1_out, x2_out))

    assert x1_out.shape == (n1, 256) and x1_out.dtype == jnp.float32
    assert x2_out.shape == (n2, 256) and x2_out.dtype == jnp.float32
    assert bool(jnp.all(jnp.isfinite(x1_out))) and bool(jnp.all(jnp.isfinite(x2_out)))
    print("KERNEL_OK")
</pallas_src>

<mosaic_0001>
module attributes {stable_mosaic.version = 11 : i64} {
  func.func @cc_embedder_kernel(%arg0: memref<16x4xf32, #tpu.memory_space<vmem>>, %arg1: memref<24x6xf32, #tpu.memory_space<vmem>>, %arg2: memref<8x5xf32, #tpu.memory_space<vmem>>, %arg3: memref<16x16xf32, #tpu.memory_space<vmem>>, %arg4: memref<24x24xf32, #tpu.memory_space<vmem>>, %arg5: memref<8x8xf32, #tpu.memory_space<vmem>>, %arg6: memref<16x24xf32, #tpu.memory_space<vmem>>, %arg7: memref<24x8xf32, #tpu.memory_space<vmem>>, %arg8: memref<4x128xf32, #tpu.memory_space<vmem>>, %arg9: memref<2x128xf32, #tpu.memory_space<vmem>>, %arg10: memref<6x128xf32, #tpu.memory_space<vmem>>, %arg11: memref<4x128xf32, #tpu.memory_space<vmem>>, %arg12: memref<1x128xf32, #tpu.memory_space<vmem>>, %arg13: memref<1x128xf32, #tpu.memory_space<vmem>>, %arg14: memref<5x128xf32, #tpu.memory_space<vmem>>, %arg15: memref<6x128xf32, #tpu.memory_space<vmem>>, %arg16: memref<1x128xf32, #tpu.memory_space<vmem>>, %arg17: memref<1x128xf32, #tpu.memory_space<vmem>>, %arg18: memref<128x256xf32, #tpu.memory_space<vmem>>, %arg19: memref<2x256xf32, #tpu.memory_space<vmem>>, %arg20: memref<128x256xf32, #tpu.memory_space<vmem>>, %arg21: memref<2x256xf32, #tpu.memory_space<vmem>>, %arg22: memref<128x128xf32, #tpu.memory_space<vmem>>, %arg23: memref<128x256xf32, #tpu.memory_space<vmem>>, %arg24: memref<1x128xf32, #tpu.memory_space<vmem>>, %arg25: memref<1x256xf32, #tpu.memory_space<vmem>>, %arg26: memref<128x256xf32, #tpu.memory_space<vmem>>, %arg27: memref<128x256xf32, #tpu.memory_space<vmem>>, %arg28: memref<1x256xf32, #tpu.memory_space<vmem>>, %arg29: memref<1x256xf32, #tpu.memory_space<vmem>>, %arg30: memref<24x256xf32, #tpu.memory_space<vmem>>, %arg31: memref<8x256xf32, #tpu.memory_space<vmem>>) attributes {dimension_semantics = [], scalar_prefetch = 0 : i64, scratch_operands = 0 : i64, tpu.core_type = #tpu.core_type<tc>} {
    %c0 = arith.constant 0 : index
    %c0_0 = arith.constant 0 : index
    %0 = vector.load %arg0[%c0, %c0_0] : memref<16x4xf32, #tpu.memory_space<vmem>>, vector<16x4xf32>
    %c0_1 = arith.constant 0 : index
    %c0_2 = arith.constant 0 : index
    %1 = vector.load %arg1[%c0_1, %c0_2] : memref<24x6xf32, #tpu.memory_space<vmem>>, vector<24x6xf32>
    %c0_3 = arith.constant 0 : index
    %c0_4 = arith.constant 0 : index
    %2 = vector.load %arg2[%c0_3, %c0_4] : memref<8x5xf32, #tpu.memory_space<vmem>>, vector<8x5xf32>
    %c0_5 = arith.constant 0 : index
    %c0_6 = arith.constant 0 : index
    %3 = vector.load %arg3[%c0_5, %c0_6] : memref<16x16xf32, #tpu.memory_space<vmem>>, vector<16x16xf32>
    %c0_7 = arith.constant 0 : index
    %c0_8 = arith.constant 0 : index
    %4 = vector.load %arg4[%c0_7, %c0_8] : memref<24x24xf32, #tpu.memory_space<vmem>>, vector<24x24xf32>
    %c0_9 = arith.constant 0 : index
    %c0_10 = arith.constant 0 : index
    %5 = vector.load %arg5[%c0_9, %c0_10] : memref<8x8xf32, #tpu.memory_space<vmem>>, vector<8x8xf32>
    %c0_11 = arith.constant 0 : index
    %c0_12 = arith.constant 0 : index
    %6 = vector.load %arg6[%c0_11, %c0_12] : memref<16x24xf32, #tpu.memory_space<vmem>>, vector<16x24xf32>
    %c0_13 = arith.constant 0 : index
    %c0_14 = arith.constant 0 : index
    %7 = vector.load %arg7[%c0_13, %c0_14] : memref<24x8xf32, #tpu.memory_space<vmem>>, vector<24x8xf32>
    %c0_15 = arith.constant 0 : index
    %c0_16 = arith.constant 0 : index
    %8 = vector.load %arg8[%c0_15, %c0_16] : memref<4x128xf32, #tpu.memory_space<vmem>>, vector<4x128xf32>
    %c0_17 = arith.constant 0 : index
    %c0_18 = arith.constant 0 : index
    %9 = vector.load %arg9[%c0_17, %c0_18] : memref<2x128xf32, #tpu.memory_space<vmem>>, vector<2x128xf32>
    %cst = arith.constant dense<0.000000e+00> : vector<16x128xf32>
    %10 = tpu.matmul %0, %8, %cst {dimension_numbers = #tpu.dot_dimension_numbers<[1], [0], [0], [1], [0, 0, 1, 1], [], []>} : vector<16x4xf32>, vector<4x128xf32>, vector<16x128xf32> -> vector<16x128xf32>
    %11 = vector.extract_strided_slice %9 {offsets = [0, 0], sizes = [1, 128], strides = [1, 1]} : vector<2x128xf32> to vector<1x128xf32>
    %12 = vector.broadcast %11 : vector<1x128xf32> to vector<16x128xf32>
    %13 = arith.mulf %10, %12 : vector<16x128xf32>
    %cst_19 = arith.constant dense<0.000000e+00> : vector<16xf32>
    %14 = vector.multi_reduction <add>, %13, %cst_19 [1] : vector<16x128xf32> to vector<16xf32>
    %15 = vector.shape_cast %14 : vector<16xf32> to vector<16x1xf32>
    %16 = vector.extract_strided_slice %9 {offsets = [1, 0], sizes = [1, 128], strides = [1, 1]} : vector<2x128xf32> to vector<1x128xf32>
    %17 = vector.broadcast %16 : vector<1x128xf32> to vector<16x128xf32>
    %18 = arith.mulf %10, %17 : vector<16x128xf32>
    %cst_20 = arith.constant dense<0.000000e+00> : vector<16xf32>
    %19 = vector.multi_reduction <add>, %18, %cst_20 [1] : vector<16x128xf32> to vector<16xf32>
    %20 = vector.shape_cast %19 : vector<16xf32> to vector<16x1xf32>
    %21 = tpu.transpose %20, [1, 0] : vector<16x1xf32> -> vector<1x16xf32>
    %22 = vector.broadcast %15 : vector<16x1xf32> to vector<16x16xf32>
    %23 = vector.broadcast %21 : vector<1x16xf32> to vector<16x16xf32>
    %24 = arith.addf %22, %23 : vector<16x16xf32>
    %cst_21 = arith.constant 0.000000e+00 : f32
    %25 = vector.broadcast %cst_21 : f32 to vector<16x16xf32>
    %26 = arith.cmpf oge, %24, %25 : vector<16x16xf32>
    %cst_22 = arith.constant 2.000000e-01 : f32
    %27 = vector.broadcast %cst_22 : f32 to vector<16x16xf32>
    %28 = arith.mulf %27, %24 : vector<16x16xf32>
    %29 = arith.select %26, %24, %28 : vector<16x16xi1>, vector<16x16xf32>
    %cst_23 = arith.constant 0.000000e+00 : f32
    %30 = vector.broadcast %cst_23 : f32 to vector<16x16xf32>
    %31 = arith.cmpf one, %3, %30 : vector<16x16xf32>
    %cst_24 = arith.constant -1.000000e+30 : f32
    %32 = vector.broadcast %cst_24 : f32 to vector<16x16xf32>
    %33 = arith.select %31, %29, %32 : vector<16x16xi1>, vector<16x16xf32>
    %cst_25 = arith.constant dense<0xFF800000> : vector<16xf32>
    %34 = vector.multi_reduction <maximumf>, %33, %cst_25 [1] : vector<16x16xf32> to vector<16xf32>
    %35 = vector.shape_cast %34 : vector<16xf32> to vector<16x1xf32>
    %36 = vector.broadcast %35 : vector<16x1xf32> to vector<16x16xf32>
    %37 = arith.subf %33, %36 : vector<16x16xf32>
    %38 = math.exp %37 : vector<16x16xf32>
    %cst_26 = arith.constant 0.000000e+00 : f32
    %39 = vector.broadcast %cst_26 : f32 to vector<16x16xf32>
    %40 = arith.select %31, %38, %39 : vector<16x16xi1>, vector<16x16xf32>
    %cst_27 = arith.constant dense<0.000000e+00> : vector<16xf32>
    %41 = vector.multi_reduction <add>, %40, %cst_27 [1] : vector<16x16xf32> to vector<16xf32>
    %42 = vector.shape_cast %41 : vector<16xf32> to vector<16x1xf32>
    %cst_28 = arith.constant 1.000000e-30 : f32
    %43 = vector.broadcast %cst_28 : f32 to vector<16x1xf32>
    %44 = arith.maximumf %42, %43 : vector<16x1xf32>
    %45 = vector.broadcast %44 : vector<16x1xf32> to vector<16x16xf32>
    %46 = arith.divf %40, %45 : vector<16x16xf32>
    %cst_29 = arith.constant dense<0.000000e+00> : vector<16x128xf32>
    %47 = tpu.matmul %46, %10, %cst_29 {dimension_numbers = #tpu.dot_dimension_numbers<[1], [0], [0], [1], [0, 0, 1, 1], [], []>} : vector<16x16xf32>, vector<16x128xf32>, vector<16x128xf32> -> vector<16x128xf32>
    %cst_30 = arith.constant 0.000000e+00 : f32
    %48 = vector.broadcast %cst_30 : f32 to vector<16x128xf32>
    %49 = arith.maximumf %47, %48 : vector<16x128xf32>
    %c0_31 = arith.constant 0 : index
    %c0_32 = arith.constant 0 : index
    %50 = vector.load %arg10[%c0_31, %c0_32] : memref<6x128xf32, #tpu.memory_space<vmem>>, vector<6x128xf32>
    %c0_33 = arith.constant 0 : index
    %c0_34 = arith.constant 0 : index
    %51 = vector.load %arg11[%c0_33, %c0_34] : memref<4x128xf32, #tpu.memory_space<vmem>>, vector<4x128xf32>
    %c0_35 = arith.constant 0 : index
    %c0_36 = arith.constant 0 : index
    %52 = vector.load %arg12[%c0_35, %c0_36] : memref<1x128xf32, #tpu.memory_space<vmem>>, vector<1x128xf32>
    %c0_37 = arith.constant 0 : index
    %c0_38 = arith.constant 0 : index
    %53 = vector.load %arg13[%c0_37, %c0_38] : memref<1x128xf32, #tpu.memory_space<vmem>>, vector<1x128xf32>
    %cst_39 = arith.constant dense<0.000000e+00> : vector<24x128xf32>
    %54 = tpu.matmul %1, %50, %cst_39 {dimension_numbers = #tpu.dot_dimension_numbers<[1], [0], [0], [1], [0, 0, 1, 1], [], []>} : vector<24x6xf32>, vector<6x128xf32>, vector<24x128xf32> -> vector<24x128xf32>
    %cst_40 = arith.constant dense<0.000000e+00> : vector<16x128xf32>
    %55 = tpu.matmul %0, %51, %cst_40 {dimension_numbers = #tpu.dot_dimension_numbers<[1], [0], [0], [1], [0, 0, 1, 1], [], []>} : vector<16x4xf32>, vector<4x128xf32>, vector<16x128xf32> -> vector<16x128xf32>
    %56 = vector.broadcast %52 : vector<1x128xf32> to vector<24x128xf32>
    %57 = arith.mulf %54, %56 : vector<24x128xf32>
    %cst_41 = arith.constant dense<0.000000e+00> : vector<24xf32>
    %58 = vector.multi_reduction <add>, %57, %cst_41 [1] : vector<24x128xf32> to vector<24xf32>
    %59 = vector.shape_cast %58 : vector<24xf32> to vector<24x1xf32>
    %60 = vector.broadcast %53 : vector<1x128xf32> to vector<16x128xf32>
    %61 = arith.mulf %55, %60 : vector<16x128xf32>
    %cst_42 = arith.constant dense<0.000000e+00> : vector<16xf32>
    %62 = vector.multi_reduction <add>, %61, %cst_42 [1] : vector<16x128xf32> to vector<16xf32>
    %63 = vector.shape_cast %62 : vector<16xf32> to vector<16x1xf32>
    %64 = tpu.transpose %59, [1, 0] : vector<24x1xf32> -> vector<1x24xf32>
    %65 = vector.broadcast %63 : vector<16x1xf32> to vector<16x24xf32>
    %66 = vector.broadcast %64 : vector<1x24xf32> to vector<16x24xf32>
    %67 = arith.addf %65, %66 : vector<16x24xf32>
    %cst_43 = arith.constant 0.000000e+00 : f32
    %68 = vector.broadcast %cst_43 : f32 to vector<16x24xf32>
    %69 = arith.cmpf oge, %67, %68 : vector<16x24xf32>
    %cst_44 = arith.constant 2.000000e-01 : f32
    %70 = vector.broadcast %cst_44 : f32 to vector<16x24xf32>
    %71 = arith.mulf %70, %67 : vector<16x24xf32>
    %72 = arith.select %69, %67, %71 : vector<16x24xi1>, vector<16x24xf32>
    %cst_45 = arith.constant 0.000000e+00 : f32
    %73 = vector.broadcast %cst_45 : f32 to vector<16x24xf32>
    %74 = arith.cmpf one, %6, %73 : vector<16x24xf32>
    %cst_46 = arith.constant -1.000000e+30 : f32
    %75 = vector.broadcast %cst_46 : f32 to vector<16x24xf32>
    %76 = arith.select %74, %72, %75 : vector<16x24xi1>, vector<16x24xf32>
    %cst_47 = arith.constant dense<0xFF800000> : vector<24xf32>
    %77 = vector.multi_reduction <maximumf>, %76, %cst_47 [0] : vector<16x24xf32> to vector<24xf32>
    %78 = vector.shape_cast %77 : vector<24xf32> to vector<1x24xf32>
    %79 = vector.broadcast %78 : vector<1x24xf32> to vector<16x24xf32>
    %80 = arith.subf %76, %79 : vector<16x24xf32>
    %81 = math.exp %80 : vector<16x24xf32>
    %cst_48 = arith.constant 0.000000e+00 : f32
    %82 = vector.broadcast %cst_48 : f32 to vector<16x24xf32>
    %83 = arith.select %74, %81, %82 : vector<16x24xi1>, vector<16x24xf32>
    %cst_49 = arith.constant dense<0.000000e+00> : vector<24xf32>
    %84 = vector.multi_reduction <add>, %83, %cst_49 [0] : vector<16x24xf32> to vector<24xf32>
    %85 = vector.shape_cast %84 : vector<24xf32> to vector<1x24xf32>
    %cst_50 = arith.constant 1.000000e-30 : f32
    %86 = vector.broadcast %cst_50 : f32 to vector<1x24xf32>
    %87 = arith.maximumf %85, %86 : vector<1x24xf32>
    %88 = vector.broadcast %87 : vector<1x24xf32> to vector<16x24xf32>
    %89 = arith.divf %83, %88 : vector<16x24xf32>
    %cst_51 = arith.constant dense<0.000000e+00> : vector<24x128xf32>
    %90 = tpu.matmul %89, %55, %cst_51 {dimension_numbers = #tpu.dot_dimension_numbers<[0], [0], [1], [1], [0, 1, 1, 1], [], []>} : vector<16x24xf32>, vector<16x128xf32>, vector<24x128xf32> -> vector<24x128xf32>
    %cst_52 = arith.constant 0.000000e+00 : f32
    %91 = vector.broadcast %cst_52 : f32 to vector<24x128xf32>
    %92 = arith.maximumf %90, %91 : vector<24x128xf32>
    %cst_53 = arith.constant -1.000000e+30 : f32
    %93 = vector.broadcast %cst_53 : f32 to vector<16x24xf32>
    %94 = arith.select %74, %72, %93 : vector<16x24xi1>, vector<16x24xf32>
    %cst_54 = arith.constant dense<0xFF800000> : vector<16xf32>
    %95 = vector.multi_reduction <maximumf>, %94, %cst_54 [1] : vector<16x24xf32> to vector<16xf32>
    %96 = vector.shape_cast %95 : vector<16xf32> to vector<16x1xf32>
    %97 = vector.broadcast %96 : vector<16x1xf32> to vector<16x24xf32>
    %98 = arith.subf %94, %97 : vector<16x24xf32>
    %99 = math.exp %98 : vector<16x24xf32>
    %cst_55 = arith.constant 0.000000e+00 : f32
    %100 = vector.broadcast %cst_55 : f32 to vector<16x24xf32>
    %101 = arith.select %74, %99, %100 : vector<16x24xi1>, vector<16x24xf32>
    %cst_56 = arith.constant dense<0.000000e+00> : vector<16xf32>
    %102 = vector.multi_reduction <add>, %101, %cst_56 [1] : vector<16x24xf32> to vector<16xf32>
    %103 = vector.shape_cast %102 : vector<16xf32> to vector<16x1xf32>
    %cst_57 = arith.constant 1.000000e-30 : f32
    %104 = vector.broadcast %cst_57 : f32 to vector<16x1xf32>
    %105 = arith.maximumf %103, %104 : vector<16x1xf32>
    %106 = vector.broadcast %105 : vector<16x1xf32> to vector<16x24xf32>
    %107 = arith.divf %101, %106 : vector<16x24xf32>
    %cst_58 = arith.constant dense<0.000000e+00> : vector<16x128xf32>
    %108 = tpu.matmul %107, %54, %cst_58 {dimension_numbers = #tpu.dot_dimension_numbers<[1], [0], [0], [1], [0, 0, 1, 1], [], []>} : vector<16x24xf32>, vector<24x128xf32>, vector<16x128xf32> -> vector<16x128xf32>
    %cst_59 = arith.constant 0.000000e+00 : f32
    %109 = vector.broadcast %cst_59 : f32 to vector<16x128xf32>
    %110 = arith.maximumf %108, %109 : vector<16x128xf32>
    %c0_60 = arith.constant 0 : index
    %c0_61 = arith.constant 0 : index
    %111 = vector.load %arg14[%c0_60, %c0_61] : memref<5x128xf32, #tpu.memory_space<vmem>>, vector<5x128xf32>
    %c0_62 = arith.constant 0 : index
    %c0_63 = arith.constant 0 : index
    %112 = vector.load %arg15[%c0_62, %c0_63] : memref<6x128xf32, #tpu.memory_space<vmem>>, vector<6x128xf32>
    %c0_64 = arith.constant 0 : index
    %c0_65 = arith.constant 0 : index
    %113 = vector.load %arg16[%c0_64, %c0_65] : memref<1x128xf32, #tpu.memory_space<vmem>>, vector<1x128xf32>
    %c0_66 = arith.constant 0 : index
    %c0_67 = arith.constant 0 : index
    %114 = vector.load %arg17[%c0_66, %c0_67] : memref<1x128xf32, #tpu.memory_space<vmem>>, vector<1x128xf32>
    %cst_68 = arith.constant dense<0.000000e+00> : vector<8x128xf32>
    %115 = tpu.matmul %2, %111, %cst_68 {dimension_numbers = #tpu.dot_dimension_numbers<[1], [0], [0], [1], [0, 0, 1, 1], [], []>} : vector<8x5xf32>, vector<5x128xf32>, vector<8x128xf32> -> vector<8x128xf32>
    %cst_69 = arith.constant dense<0.000000e+00> : vector<24x128xf32>
    %116 = tpu.matmul %1, %112, %cst_69 {dimension_numbers = #tpu.dot_dimension_numbers<[1], [0], [0], [1], [0, 0, 1, 1], [], []>} : vector<24x6xf32>, vector<6x128xf32>, vector<24x128xf32> -> vector<24x128xf32>
    %117 = vector.broadcast %113 : vector<1x128xf32> to vector<8x128xf32>
    %118 = arith.mulf %115, %117 : vector<8x128xf32>
    %cst_70 = arith.constant dense<0.000000e+00> : vector<8xf32>
    %119 = vector.multi_reduction <add>, %118, %cst_70 [1] : vector<8x128xf32> to vector<8xf32>
    %120 = vector.shape_cast %119 : vector<8xf32> to vector<8x1xf32>
    %121 = vector.broadcast %114 : vector<1x128xf32> to vector<24x128xf32>
    %122 = arith.mulf %116, %121 : vector<24x128xf32>
    %cst_71 = arith.constant dense<0.000000e+00> : vector<24xf32>
    %123 = vector.multi_reduction <add>, %122, %cst_71 [1] : vector<24x128xf32> to vector<24xf32>
    %124 = vector.shape_cast %123 : vector<24xf32> to vector<24x1xf32>
    %125 = tpu.transpose %120, [1, 0] : vector<8x1xf32> -> vector<1x8xf32>
    %126 = vector.broadcast %124 : vector<24x1xf32> to vector<24x8xf32>
    %127 = vector.broadcast %125 : vector<1x8xf32> to vector<24x8xf32>
    %128 = arith.addf %126, %127 : vector<24x8xf32>
    %cst_72 = arith.constant 0.000000e+00 : f32
    %129 = vector.broadcast %cst_72 : f32 to vector<24x8xf32>
    %130 = arith.cmpf oge, %128, %129 : vector<24x8xf32>
    %cst_73 = arith.constant 2.000000e-01 : f32
    %131 = vector.broadcast %cst_73 : f32 to vector<24x8xf32>
    %132 = arith.mulf %131, %128 : vector<24x8xf32>
    %133 = arith.select %130, %128, %132 : vector<24x8xi1>, vector<24x8xf32>
    %cst_74 = arith.constant 0.000000e+00 : f32
    %134 = vector.broadcast %cst_74 : f32 to vector<24x8xf32>
    %135 = arith.cmpf one, %7, %134 : vector<24x8xf32>
    %cst_75 = arith.constant -1.000000e+30 : f32
    %136 = vector.broadcast %cst_75 : f32 to vector<24x8xf32>
    %137 = arith.select %135, %133, %136 : vector<24x8xi1>, vector<24x8xf32>
    %cst_76 = arith.constant dense<0xFF800000> : vector<8xf32>
    %138 = vector.multi_reduction <maximumf>, %137, %cst_76 [0] : vector<24x8xf32> to vector<8xf32>
    %139 = vector.shape_cast %138 : vector<8xf32> to vector<1x8xf32>
    %140 = vector.broadcast %139 : vector<1x8xf32> to vector<24x8xf32>
    %141 = arith.subf %137, %140 : vector<24x8xf32>
    %142 = math.exp %141 : vector<24x8xf32>
    %cst_77 = arith.constant 0.000000e+00 : f32
    %143 = vector.broadcast %cst_77 : f32 to vector<24x8xf32>
    %144 = arith.select %135, %142, %143 : vector<24x8xi1>, vector<24x8xf32>
    %cst_78 = arith.constant dense<0.000000e+00> : vector<8xf32>
    %145 = vector.multi_reduction <add>, %144, %cst_78 [0] : vector<24x8xf32> to vector<8xf32>
    %146 = vector.shape_cast %145 : vector<8xf32> to vector<1x8xf32>
    %cst_79 = arith.constant 1.000000e-30 : f32
    %147 = vector.broadcast %cst_79 : f32 to vector<1x8xf32>
    %148 = arith.maximumf %146, %147 : vector<1x8xf32>
    %149 = vector.broadcast %148 : vector<1x8xf32> to vector<24x8xf32>
    %150 = arith.divf %144, %149 : vector<24x8xf32>
    %cst_80 = arith.constant dense<0.000000e+00> : vector<8x128xf32>
    %151 = tpu.matmul %150, %116, %cst_80 {dimension_numbers = #tpu.dot_dimension_numbers<[0], [0], [1], [1], [0, 1, 1, 1], [], []>} : vector<24x8xf32>, vector<24x128xf32>, vector<8x128xf32> -> vector<8x128xf32>
    %cst_81 = arith.constant 0.000000e+00 : f32
    %152 = vector.broadcast %cst_81 : f32 to vector<8x128xf32>
    %153 = arith.maximumf %151, %152 : vector<8x128xf32>
    %cst_82 = arith.constant -1.000000e+30 : f32
    %154 = vector.broadcast %cst_82 : f32 to vector<24x8xf32>
    %155 = arith.select %135, %133, %154 : vector<24x8xi1>, vector<24x8xf32>
    %cst_83 = arith.constant dense<0xFF800000> : vector<24xf32>
    %156 = vector.multi_reduction <maximumf>, %155, %cst_83 [1] : vector<24x8xf32> to vector<24xf32>
    %157 = vector.shape_cast %156 : vector<24xf32> to vector<24x1xf32>
    %158 = vector.broadcast %157 : vector<24x1xf32> to vector<24x8xf32>
    %159 = arith.subf %155, %158 : vector<24x8xf32>
    %160 = math.exp %159 : vector<24x8xf32>
    %cst_84 = arith.constant 0.000000e+00 : f32
    %161 = vector.broadcast %cst_84 : f32 to vector<24x8xf32>
    %162 = arith.select %135, %160, %161 : vector<24x8xi1>, vector<24x8xf32>
    %cst_85 = arith.constant dense<0.000000e+00> : vector<24xf32>
    %163 = vector.multi_reduction <add>, %162, %cst_85 [1] : vector<24x8xf32> to vector<24xf32>
    %164 = vector.shape_cast %163 : vector<24xf32> to vector<24x1xf32>
    %cst_86 = arith.constant 1.000000e-30 : f32
    %165 = vector.broadcast %cst_86 : f32 to vector<24x1xf32>
    %166 = arith.maximumf %164, %165 : vector<24x1xf32>
    %167 = vector.broadcast %166 : vector<24x1xf32> to vector<24x8xf32>
    %168 = arith.divf %162, %167 : vector<24x8xf32>
    %cst_87 = arith.constant dense<0.000000e+00> : vector<24x128xf32>
    %169 = tpu.matmul %168, %115, %cst_87 {dimension_numbers = #tpu.dot_dimension_numbers<[1], [0], [0], [1], [0, 0, 1, 1], [], []>} : vector<24x8xf32>, vector<8x128xf32>, vector<24x128xf32> -> vector<24x128xf32>
    %cst_88 = arith.constant 0.000000e+00 : f32
    %170 = vector.broadcast %cst_88 : f32 to vector<24x128xf32>
    %171 = arith.maximumf %169, %170 : vector<24x128xf32>
    %172 = arith.addf %49, %110 : vector<16x128xf32>
    %cst_89 = arith.constant 0.000000e+00 : f32
    %173 = vector.broadcast %cst_89 : f32 to vector<16x128xf32>
    %174 = arith.maximumf %172, %173 : vector<16x128xf32>
    %175 = arith.addf %92, %171 : vector<24x128xf32>
    %cst_90 = arith.constant 0.000000e+00 : f32
    %176 = vector.broadcast %cst_90 : f32 to vector<24x128xf32>
    %177 = arith.maximumf %175, %176 : vector<24x128xf32>
    %cst_91 = arith.constant 0.000000e+00 : f32
    %178 = vector.broadcast %cst_91 : f32 to vector<8x128xf32>
    %179 = arith.maximumf %153, %178 : vector<8x128xf32>
    %c0_92 = arith.constant 0 : index
    %c0_93 = arith.constant 0 : index
    %180 = vector.load %arg18[%c0_92, %c0_93] : memref<128x256xf32, #tpu.memory_space<vmem>>, vector<128x256xf32>
    %c0_94 = arith.constant 0 : index
    %c0_95 = arith.constant 0 : index
    %181 = vector.load %arg19[%c0_94, %c0_95] : memref<2x256xf32, #tpu.memory_space<vmem>>, vector<2x256xf32>
    %cst_96 = arith.constant dense<0.000000e+00> : vector<24x256xf32>
    %182 = tpu.matmul %177, %180, %cst_96 {dimension_numbers = #tpu.dot_dimension_numbers<[1], [0], [0], [1], [0, 0, 1, 1], [], []>} : vector<24x128xf32>, vector<128x256xf32>, vector<24x256xf32> -> vector<24x256xf32>
    %183 = vector.extract_strided_slice %181 {offsets = [0, 0], sizes = [1, 256], strides = [1, 1]} : vector<2x256xf32> to vector<1x256xf32>
    %184 = vector.broadcast %183 : vector<1x256xf32> to vector<24x256xf32>
    %185 = arith.mulf %182, %184 : vector<24x256xf32>
    %cst_97 = arith.constant dense<0.000000e+00> : vector<24xf32>
    %186 = vector.multi_reduction <add>, %185, %cst_97 [1] : vector<24x256xf32> to vector<24xf32>
    %187 = vector.shape_cast %186 : vector<24xf32> to vector<24x1xf32>
    %188 = vector.extract_strided_slice %181 {offsets = [1, 0], sizes = [1, 256], strides = [1, 1]} : vector<2x256xf32> to vector<1x256xf32>
    %189 = vector.broadcast %188 : vector<1x256xf32> to vector<24x256xf32>
    %190 = arith.mulf %182, %189 : vector<24x256xf32>
    %cst_98 = arith.constant dense<0.000000e+00> : vector<24xf32>
    %191 = vector.multi_reduction <add>, %190, %cst_98 [1] : vector<24x256xf32> to vector<24xf32>
    %192 = vector.shape_cast %191 : vector<24xf32> to vector<24x1xf32>
    %193 = tpu.transpose %192, [1, 0] : vector<24x1xf32> -> vector<1x24xf32>
    %194 = vector.broadcast %187 : vector<24x1xf32> to vector<24x24xf32>
    %195 = vector.broadcast %193 : vector<1x24xf32> to vector<24x24xf32>
    %196 = arith.addf %194, %195 : vector<24x24xf32>
    %cst_99 = arith.constant 0.000000e+00 : f32
    %197 = vector.broadcast %cst_99 : f32 to vector<24x24xf32>
    %198 = arith.cmpf oge, %196, %197 : vector<24x24xf32>
    %cst_100 = arith.constant 2.000000e-01 : f32
    %199 = vector.broadcast %cst_100 : f32 to vector<24x24xf32>
    %200 = arith.mulf %199, %196 : vector<24x24xf32>
    %201 = arith.select %198, %196, %200 : vector<24x24xi1>, vector<24x24xf32>
    %cst_101 = arith.constant 0.000000e+00 : f32
    %202 = vector.broadcast %cst_101 : f32 to vector<24x24xf32>
    %203 = arith.cmpf one, %4, %202 : vector<24x24xf32>
    %cst_102 = arith.constant -1.000000e+30 : f32
    %204 = vector.broadcast %cst_102 : f32 to vector<24x24xf32>
    %205 = arith.select %203, %201, %204 : vector<24x24xi1>, vector<24x24xf32>
    %cst_103 = arith.constant dense<0xFF800000> : vector<24xf32>
    %206 = vector.multi_reduction <maximumf>, %205, %cst_103 [1] : vector<24x24xf32> to vector<24xf32>
    %207 = vector.shape_cast %206 : vector<24xf32> to vector<24x1xf32>
    %208 = vector.broadcast %207 : vector<24x1xf32> to vector<24x24xf32>
    %209 = arith.subf %205, %208 : vector<24x24xf32>
    %210 = math.exp %209 : vector<24x24xf32>
    %cst_104 = arith.constant 0.000000e+00 : f32
    %211 = vector.broadcast %cst_104 : f32 to vector<24x24xf32>
    %212 = arith.select %203, %210, %211 : vector<24x24xi1>, vector<24x24xf32>
    %cst_105 = arith.constant dense<0.000000e+00> : vector<24xf32>
    %213 = vector.multi_reduction <add>, %212, %cst_105 [1] : vector<24x24xf32> to vector<24xf32>
    %214 = vector.shape_cast %213 : vector<24xf32> to vector<24x1xf32>
    %cst_106 = arith.constant 1.000000e-30 : f32
    %215 = vector.broadcast %cst_106 : f32 to vector<24x1xf32>
    %216 = arith.maximumf %214, %215 : vector<24x1xf32>
    %217 = vector.broadcast %216 : vector<24x1xf32> to vector<24x24xf32>
    %218 = arith.divf %212, %217 : vector<24x24xf32>
    %cst_107 = arith.constant dense<0.000000e+00> : vector<24x256xf32>
    %219 = tpu.matmul %218, %182, %cst_107 {dimension_numbers = #tpu.dot_dimension_numbers<[1], [0], [0], [1], [0, 0, 1, 1], [], []>} : vector<24x24xf32>, vector<24x256xf32>, vector<24x256xf32> -> vector<24x256xf32>
    %cst_108 = arith.constant 0.000000e+00 : f32
    %220 = vector.broadcast %cst_108 : f32 to vector<24x256xf32>
    %221 = arith.maximumf %219, %220 : vector<24x256xf32>
    %c0_109 = arith.constant 0 : index
    %c0_110 = arith.constant 0 : index
    %222 = vector.load %arg20[%c0_109, %c0_110] : memref<128x256xf32, #tpu.memory_space<vmem>>, vector<128x256xf32>
    %c0_111 = arith.constant 0 : index
    %c0_112 = arith.constant 0 : index
    %223 = vector.load %arg21[%c0_111, %c0_112] : memref<2x256xf32, #tpu.memory_space<vmem>>, vector<2x256xf32>
    %cst_113 = arith.constant dense<0.000000e+00> : vector<8x256xf32>
    %224 = tpu.matmul %179, %222, %cst_113 {dimension_numbers = #tpu.dot_dimension_numbers<[1], [0], [0], [1], [0, 0, 1, 1], [], []>} : vector<8x128xf32>, vector<128x256xf32>, vector<8x256xf32> -> vector<8x256xf32>
    %225 = vector.extract_strided_slice %223 {offsets = [0, 0], sizes = [1, 256], strides = [1, 1]} : vector<2x256xf32> to vector<1x256xf32>
    %226 = vector.broadcast %225 : vector<1x256xf32> to vector<8x256xf32>
    %227 = arith.mulf %224, %226 : vector<8x256xf32>
    %cst_114 = arith.constant dense<0.000000e+00> : vector<8xf32>
    %228 = vector.multi_reduction <add>, %227, %cst_114 [1] : vector<8x256xf32> to vector<8xf32>
    %229 = vector.shape_cast %228 : vector<8xf32> to vector<8x1xf32>
    %230 = vector.extract_strided_slice %223 {offsets = [1, 0], sizes = [1, 256], strides = [1, 1]} : vector<2x256xf32> to vector<1x256xf32>
    %231 = vector.broadcast %230 : vector<1x256xf32> to vector<8x256xf32>
    %232 = arith.mulf %224, %231 : vector<8x256xf32>
    %cst_115 = arith.constant dense<0.000000e+00> : vector<8xf32>
    %233 = vector.multi_reduction <add>, %232, %cst_115 [1] : vector<8x256xf32> to vector<8xf32>
    %234 = vector.shape_cast %233 : vector<8xf32> to vector<8x1xf32>
    %235 = tpu.transpose %234, [1, 0] : vector<8x1xf32> -> vector<1x8xf32>
    %236 = vector.broadcast %229 : vector<8x1xf32> to vector<8x8xf32>
    %237 = vector.broadcast %235 : vector<1x8xf32> to vector<8x8xf32>
    %238 = arith.addf %236, %237 : vector<8x8xf32>
    %cst_116 = arith.constant 0.000000e+00 : f32
    %239 = vector.broadcast %cst_116 : f32 to vector<8x8xf32>
    %240 = arith.cmpf oge, %238, %239 : vector<8x8xf32>
    %cst_117 = arith.constant 2.000000e-01 : f32
    %241 = vector.broadcast %cst_117 : f32 to vector<8x8xf32>
    %242 = arith.mulf %241, %238 : vector<8x8xf32>
    %243 = arith.select %240, %238, %242 : vector<8x8xi1>, vector<8x8xf32>
    %cst_118 = arith.constant 0.000000e+00 : f32
    %244 = vector.broadcast %cst_118 : f32 to vector<8x8xf32>
    %245 = arith.cmpf one, %5, %244 : vector<8x8xf32>
    %cst_119 = arith.constant -1.000000e+30 : f32
    %246 = vector.broadcast %cst_119 : f32 to vector<8x8xf32>
    %247 = arith.select %245, %243, %246 : vector<8x8xi1>, vector<8x8xf32>
    %cst_120 = arith.constant dense<0xFF800000> : vector<8xf32>
    %248 = vector.multi_reduction <maximumf>, %247, %cst_120 [1] : vector<8x8xf32> to vector<8xf32>
    %249 = vector.shape_cast %248 : vector<8xf32> to vector<8x1xf32>
    %250 = vector.broadcast %249 : vector<8x1xf32> to vector<8x8xf32>
    %251 = arith.subf %247, %250 : vector<8x8xf32>
    %252 = math.exp %251 : vector<8x8xf32>
    %cst_121 = arith.constant 0.000000e+00 : f32
    %253 = vector.broadcast %cst_121 : f32 to vector<8x8xf32>
    %254 = arith.select %245, %252, %253 : vector<8x8xi1>, vector<8x8xf32>
    %cst_122 = arith.constant dense<0.000000e+00> : vector<8xf32>
    %255 = vector.multi_reduction <add>, %254, %cst_122 [1] : vector<8x8xf32> to vector<8xf32>
    %256 = vector.shape_cast %255 : vector<8xf32> to vector<8x1xf32>
    %cst_123 = arith.constant 1.000000e-30 : f32
    %257 = vector.broadcast %cst_123 : f32 to vector<8x1xf32>
    %258 = arith.maximumf %256, %257 : vector<8x1xf32>
    %259 = vector.broadcast %258 : vector<8x1xf32> to vector<8x8xf32>
    %260 = arith.divf %254, %259 : vector<8x8xf32>
    %cst_124 = arith.constant dense<0.000000e+00> : vector<8x256xf32>
    %261 = tpu.matmul %260, %224, %cst_124 {dimension_numbers = #tpu.dot_dimension_numbers<[1], [0], [0], [1], [0, 0, 1, 1], [], []>} : vector<8x8xf32>, vector<8x256xf32>, vector<8x256xf32> -> vector<8x256xf32>
    %cst_125 = arith.constant 0.000000e+00 : f32
    %262 = vector.broadcast %cst_125 : f32 to vector<8x256xf32>
    %263 = arith.maximumf %261, %262 : vector<8x256xf32>
    %c0_126 = arith.constant 0 : index
    %c0_127 = arith.constant 0 : index
    %264 = vector.load %arg22[%c0_126, %c0_127] : memref<128x128xf32, #tpu.memory_space<vmem>>, vector<128x128xf32>
    %c0_128 = arith.constant 0 : index
    %c0_129 = arith.constant 0 : index
    %265 = vector.load %arg23[%c0_128, %c0_129] : memref<128x256xf32, #tpu.memory_space<vmem>>, vector<128x256xf32>
    %c0_130 = arith.constant 0 : index
    %c0_131 = arith.constant 0 : index
    %266 = vector.load %arg24[%c0_130, %c0_131] : memref<1x128xf32, #tpu.memory_space<vmem>>, vector<1x128xf32>
    %c0_132 = arith.constant 0 : index
    %c0_133 = arith.constant 0 : index
    %267 = vector.load %arg25[%c0_132, %c0_133] : memref<1x256xf32, #tpu.memory_space<vmem>>, vector<1x256xf32>
    %cst_134 = arith.constant dense<0.000000e+00> : vector<24x128xf32>
    %268 = tpu.matmul %177, %264, %cst_134 {dimension_numbers = #tpu.dot_dimension_numbers<[1], [0], [0], [1], [0, 0, 1, 1], [], []>} : vector<24x128xf32>, vector<128x128xf32>, vector<24x128xf32> -> vector<24x128xf32>
    %cst_135 = arith.constant dense<0.000000e+00> : vector<16x256xf32>
    %269 = tpu.matmul %174, %265, %cst_135 {dimension_numbers = #tpu.dot_dimension_numbers<[1], [0], [0], [1], [0, 0, 1, 1], [], []>} : vector<16x128xf32>, vector<128x256xf32>, vector<16x256xf32> -> vector<16x256xf32>
    %270 = vector.broadcast %266 : vector<1x128xf32> to vector<24x128xf32>
    %271 = arith.mulf %268, %270 : vector<24x128xf32>
    %cst_136 = arith.constant dense<0.000000e+00> : vector<24xf32>
    %272 = vector.multi_reduction <add>, %271, %cst_136 [1] : vector<24x128xf32> to vector<24xf32>
    %273 = vector.shape_cast %272 : vector<24xf32> to vector<24x1xf32>
    %274 = vector.broadcast %267 : vector<1x256xf32> to vector<16x256xf32>
    %275 = arith.mulf %269, %274 : vector<16x256xf32>
    %cst_137 = arith.constant dense<0.000000e+00> : vector<16xf32>
    %276 = vector.multi_reduction <add>, %275, %cst_137 [1] : vector<16x256xf32> to vector<16xf32>
    %277 = vector.shape_cast %276 : vector<16xf32> to vector<16x1xf32>
    %278 = tpu.transpose %273, [1, 0] : vector<24x1xf32> -> vector<1x24xf32>
    %279 = vector.broadcast %277 : vector<16x1xf32> to vector<16x24xf32>
    %280 = vector.broadcast %278 : vector<1x24xf32> to vector<16x24xf32>
    %281 = arith.addf %279, %280 : vector<16x24xf32>
    %cst_138 = arith.constant 0.000000e+00 : f32
    %282 = vector.broadcast %cst_138 : f32 to vector<16x24xf32>
    %283 = arith.cmpf oge, %281, %282 : vector<16x24xf32>
    %cst_139 = arith.constant 2.000000e-01 : f32
    %284 = vector.broadcast %cst_139 : f32 to vector<16x24xf32>
    %285 = arith.mulf %284, %281 : vector<16x24xf32>
    %286 = arith.select %283, %281, %285 : vector<16x24xi1>, vector<16x24xf32>
    %cst_140 = arith.constant 0.000000e+00 : f32
    %287 = vector.broadcast %cst_140 : f32 to vector<16x24xf32>
    %288 = arith.cmpf one, %6, %287 : vector<16x24xf32>
    %cst_141 = arith.constant -1.000000e+30 : f32
    %289 = vector.broadcast %cst_141 : f32 to vector<16x24xf32>
    %290 = arith.select %288, %286, %289 : vector<16x24xi1>, vector<16x24xf32>
    %cst_142 = arith.constant dense<0xFF800000> : vector<24xf32>
    %291 = vector.multi_reduction <maximumf>, %290, %cst_142 [0] : vector<16x24xf32> to vector<24xf32>
    %292 = vector.shape_cast %291 : vector<24xf32> to vector<1x24xf32>
    %293 = vector.broadcast %292 : vector<1x24xf32> to vector<16x24xf32>
    %294 = arith.subf %290, %293 : vector<16x24xf32>
    %295 = math.exp %294 : vector<16x24xf32>
    %cst_143 = arith.constant 0.000000e+00 : f32
    %296 = vector.broadcast %cst_143 : f32 to vector<16x24xf32>
    %297 = arith.select %288, %295, %296 : vector<16x24xi1>, vector<16x24xf32>
    %cst_144 = arith.constant dense<0.000000e+00> : vector<24xf32>
    %298 = vector.multi_reduction <add>, %297, %cst_144 [0] : vector<16x24xf32> to vector<24xf32>
    %299 = vector.shape_cast %298 : vector<24xf32> to vector<1x24xf32>
    %cst_145 = arith.constant 1.000000e-30 : f32
    %300 = vector.broadcast %cst_145 : f32 to vector<1x24xf32>
    %301 = arith.maximumf %299, %300 : vector<1x24xf32>
    %302 = vector.broadcast %301 : vector<1x24xf32> to vector<16x24xf32>
    %303 = arith.divf %297, %302 : vector<16x24xf32>
    %cst_146 = arith.constant dense<0.000000e+00> : vector<24x256xf32>
    %304 = tpu.matmul %303, %269, %cst_146 {dimension_numbers = #tpu.dot_dimension_numbers<[0], [0], [1], [1], [0, 1, 1, 1], [], []>} : vector<16x24xf32>, vector<16x256xf32>, vector<24x256xf32> -> vector<24x256xf32>
    %cst_147 = arith.constant 0.000000e+00 : f32
    %305 = vector.broadcast %cst_147 : f32 to vector<24x256xf32>
    %306 = arith.maximumf %304, %305 : vector<24x256xf32>
    %c0_148 = arith.constant 0 : index
    %c0_149 = arith.constant 0 : index
    %307 = vector.load %arg26[%c0_148, %c0_149] : memref<128x256xf32, #tpu.memory_space<vmem>>, vector<128x256xf32>
    %c0_150 = arith.constant 0 : index
    %c0_151 = arith.constant 0 : index
    %308 = vector.load %arg27[%c0_150, %c0_151] : memref<128x256xf32, #tpu.memory_space<vmem>>, vector<128x256xf32>
    %c0_152 = arith.constant 0 : index
    %c0_153 = arith.constant 0 : index
    %309 = vector.load %arg28[%c0_152, %c0_153] : memref<1x256xf32, #tpu.memory_space<vmem>>, vector<1x256xf32>
    %c0_154 = arith.constant 0 : index
    %c0_155 = arith.constant 0 : index
    %310 = vector.load %arg29[%c0_154, %c0_155] : memref<1x256xf32, #tpu.memory_space<vmem>>, vector<1x256xf32>
    %cst_156 = arith.constant dense<0.000000e+00> : vector<8x256xf32>
    %311 = tpu.matmul %179, %307, %cst_156 {dimension_numbers = #tpu.dot_dimension_numbers<[1], [0], [0], [1], [0, 0, 1, 1], [], []>} : vector<8x128xf32>, vector<128x256xf32>, vector<8x256xf32> -> vector<8x256xf32>
    %cst_157 = arith.constant dense<0.000000e+00> : vector<24x256xf32>
    %312 = tpu.matmul %177, %308, %cst_157 {dimension_numbers = #tpu.dot_dimension_numbers<[1], [0], [0], [1], [0, 0, 1, 1], [], []>} : vector<24x128xf32>, vector<128x256xf32>, vector<24x256xf32> -> vector<24x256xf32>
    %313 = vector.broadcast %309 : vector<1x256xf32> to vector<8x256xf32>
    %314 = arith.mulf %311, %313 : vector<8x256xf32>
    %cst_158 = arith.constant dense<0.000000e+00> : vector<8xf32>
    %315 = vector.multi_reduction <add>, %314, %cst_158 [1] : vector<8x256xf32> to vector<8xf32>
    %316 = vector.shape_cast %315 : vector<8xf32> to vector<8x1xf32>
    %317 = vector.broadcast %310 : vector<1x256xf32> to vector<24x256xf32>
    %318 = arith.mulf %312, %317 : vector<24x256xf32>
    %cst_159 = arith.constant dense<0.000000e+00> : vector<24xf32>
    %319 = vector.multi_reduction <add>, %318, %cst_159 [1] : vector<24x256xf32> to vector<24xf32>
    %320 = vector.shape_cast %319 : vector<24xf32> to vector<24x1xf32>
    %321 = tpu.transpose %316, [1, 0] : vector<8x1xf32> -> vector<1x8xf32>
    %322 = vector.broadcast %320 : vector<24x1xf32> to vector<24x8xf32>
    %323 = vector.broadcast %321 : vector<1x8xf32> to vector<24x8xf32>
    %324 = arith.addf %322, %323 : vector<24x8xf32>
    %cst_160 = arith.constant 0.000000e+00 : f32
    %325 = vector.broadcast %cst_160 : f32 to vector<24x8xf32>
    %326 = arith.cmpf oge, %324, %325 : vector<24x8xf32>
    %cst_161 = arith.constant 2.000000e-01 : f32
    %327 = vector.broadcast %cst_161 : f32 to vector<24x8xf32>
    %328 = arith.mulf %327, %324 : vector<24x8xf32>
    %329 = arith.select %326, %324, %328 : vector<24x8xi1>, vector<24x8xf32>
    %cst_162 = arith.constant 0.000000e+00 : f32
    %330 = vector.broadcast %cst_162 : f32 to vector<24x8xf32>
    %331 = arith.cmpf one, %7, %330 : vector<24x8xf32>
    %cst_163 = arith.constant -1.000000e+30 : f32
    %332 = vector.broadcast %cst_163 : f32 to vector<24x8xf32>
    %333 = arith.select %331, %329, %332 : vector<24x8xi1>, vector<24x8xf32>
    %cst_164 = arith.constant dense<0xFF800000> : vector<8xf32>
    %334 = vector.multi_reduction <maximumf>, %333, %cst_164 [0] : vector<24x8xf32> to vector<8xf32>
    %335 = vector.shape_cast %334 : vector<8xf32> to vector<1x8xf32>
    %336 = vector.broadcast %335 : vector<1x8xf32> to vector<24x8xf32>
    %337 = arith.subf %333, %336 : vector<24x8xf32>
    %338 = math.exp %337 : vector<24x8xf32>
    %cst_165 = arith.constant 0.000000e+00 : f32
    %339 = vector.broadcast %cst_165 : f32 to vector<24x8xf32>
    %340 = arith.select %331, %338, %339 : vector<24x8xi1>, vector<24x8xf32>
    %cst_166 = arith.constant dense<0.000000e+00> : vector<8xf32>
    %341 = vector.multi_reduction <add>, %340, %cst_166 [0] : vector<24x8xf32> to vector<8xf32>
    %342 = vector.shape_cast %341 : vector<8xf32> to vector<1x8xf32>
    %cst_167 = arith.constant 1.000000e-30 : f32
    %343 = vector.broadcast %cst_167 : f32 to vector<1x8xf32>
    %344 = arith.maximumf %342, %343 : vector<1x8xf32>
    %345 = vector.broadcast %344 : vector<1x8xf32> to vector<24x8xf32>
    %346 = arith.divf %340, %345 : vector<24x8xf32>
    %cst_168 = arith.constant dense<0.000000e+00> : vector<8x256xf32>
    %347 = tpu.matmul %346, %312, %cst_168 {dimension_numbers = #tpu.dot_dimension_numbers<[0], [0], [1], [1], [0, 1, 1, 1], [], []>} : vector<24x8xf32>, vector<24x256xf32>, vector<8x256xf32> -> vector<8x256xf32>
    %cst_169 = arith.constant 0.000000e+00 : f32
    %348 = vector.broadcast %cst_169 : f32 to vector<8x256xf32>
    %349 = arith.maximumf %347, %348 : vector<8x256xf32>
    %cst_170 = arith.constant -1.000000e+30 : f32
    %350 = vector.broadcast %cst_170 : f32 to vector<24x8xf32>
    %351 = arith.select %331, %329, %350 : vector<24x8xi1>, vector<24x8xf32>
    %cst_171 = arith.constant dense<0xFF800000> : vector<24xf32>
    %352 = vector.multi_reduction <maximumf>, %351, %cst_171 [1] : vector<24x8xf32> to vector<24xf32>
    %353 = vector.shape_cast %352 : vector<24xf32> to vector<24x1xf32>
    %354 = vector.broadcast %353 : vector<24x1xf32> to vector<24x8xf32>
    %355 = arith.subf %351, %354 : vector<24x8xf32>
    %356 = math.exp %355 : vector<24x8xf32>
    %cst_172 = arith.constant 0.000000e+00 : f32
    %357 = vector.broadcast %cst_172 : f32 to vector<24x8xf32>
    %358 = arith.select %331, %356, %357 : vector<24x8xi1>, vector<24x8xf32>
    %cst_173 = arith.constant dense<0.000000e+00> : vector<24xf32>
    %359 = vector.multi_reduction <add>, %358, %cst_173 [1] : vector<24x8xf32> to vector<24xf32>
    %360 = vector.shape_cast %359 : vector<24xf32> to vector<24x1xf32>
    %cst_174 = arith.constant 1.000000e-30 : f32
    %361 = vector.broadcast %cst_174 : f32 to vector<24x1xf32>
    %362 = arith.maximumf %360, %361 : vector<24x1xf32>
    %363 = vector.broadcast %362 : vector<24x1xf32> to vector<24x8xf32>
    %364 = arith.divf %358, %363 : vector<24x8xf32>
    %cst_175 = arith.constant dense<0.000000e+00> : vector<24x256xf32>
    %365 = tpu.matmul %364, %311, %cst_175 {dimension_numbers = #tpu.dot_dimension_numbers<[1], [0], [0], [1], [0, 0, 1, 1], [], []>} : vector<24x8xf32>, vector<8x256xf32>, vector<24x256xf32> -> vector<24x256xf32>
    %cst_176 = arith.constant 0.000000e+00 : f32
    %366 = vector.broadcast %cst_176 : f32 to vector<24x256xf32>
    %367 = arith.maximumf %365, %366 : vector<24x256xf32>
    %368 = arith.addf %306, %221 : vector<24x256xf32>
    %369 = arith.addf %368, %367 : vector<24x256xf32>
    %cst_177 = arith.constant 0.000000e+00 : f32
    %370 = vector.broadcast %cst_177 : f32 to vector<24x256xf32>
    %371 = arith.maximumf %369, %370 : vector<24x256xf32>
    %c0_178 = arith.constant 0 : index
    %c0_179 = arith.constant 0 : index
    %372 = vector.load %arg30[%c0_178, %c0_179] : memref<24x256xf32, #tpu.memory_space<vmem>>, vector<24x256xf32>
    tpu.vector_store %arg30[%c0_178, %c0_179], %371 {strides = array<i32>} : memref<24x256xf32, #tpu.memory_space<vmem>>, vector<24x256xf32>,
    %373 = arith.addf %349, %263 : vector<8x256xf32>
    %cst_180 = arith.constant 0.000000e+00 : f32
    %374 = vector.broadcast %cst_180 : f32 to vector<8x256xf32>
    %375 = arith.maximumf %373, %374 : vector<8x256xf32>
    %c0_181 = arith.constant 0 : index
    %c0_182 = arith.constant 0 : index
    %376 = vector.load %arg31[%c0_181, %c0_182] : memref<8x256xf32, #tpu.memory_space<vmem>>, vector<8x256xf32>
    tpu.vector_store %arg31[%c0_181, %c0_182], %375 {strides = array<i32>} : memref<8x256xf32, #tpu.memory_space<vmem>>, vector<8x256xf32>,
    return
  }
}

</mosaic_0001>

<bundles_post_ra>
// kernel: cc_embedder_forward.1
= control target key start
LH: loop header
LB: loop body
LE: loop exit
PB: predicated region body
PF: predicated region fallthrough
CT: control target
= control target key end

     0   :  { %s4554_s6 = smov 1   ;;  %s4555_s10 = smov 2   ;;  %s5351_s0 = inlined_call_operand.smem [shape: u32[32], index: -1, kind: input, shape index: {}] }
   0x1   :  { %s4621_s5 = sld [smem:[%s5351_s0]]   ;;  %s4556_s14 = smov 3  }
   0x2   :  { %s4626_s9 = sld [smem:[%s5351_s0 + %s4554_s6]]   ;;  %s4557_s18 = smov 4  }
   0x3   :  { %s4631_s13 = sld [smem:[%s5351_s0 + %s4555_s10]]   ;;  %s4558_s22 = smov 5  }
   0x4   :  { %s4636_s17 = sld [smem:[%s5351_s0 + %s4556_s14]]   ;;  %s4559_s26 = smov 6  }
   0x5   :  { %s4641_s21 = sld [smem:[%s5351_s0 + %s4557_s18]]   ;;  %s4560_s30 = smov 7  }
   0x6   :  { %s4646_s25 = sld [smem:[%s5351_s0 + %s4558_s22]]   ;;  %s4561_s4 = smov 8  }
   0x7   :  { %5362 = sst [smem:[#allocation47_spill]] %s4621_s5  ;;  %s4562_s10 = smov 9  }
   0x8   :  { %5363 = sst [smem:[#allocation48_spill]] %s4626_s9  ;;  %s4563_s15 = smov 10  }
   0x9   :  { %5364 = sst [smem:[#allocation49_spill]] %s4631_s13  ;;  %s4564_s20 = smov 11  }
   0xa   :  { %s4651_s29 = sld [smem:[%s5351_s0 + %s4559_s26]]   ;;  %s4565_s26 = smov 12  }
   0xb   :  { %5365 = sst [smem:[#allocation50_spill]] %s4641_s21  ;;  %s4566_s1 = smov 13  }
   0xc   :  { %s4656_s3 = sld [smem:[%s5351_s0 + %s4560_s30]]   ;;  %s4567_s7 = smov 14  }
   0xd   :  { %s4661_s8 = sld [smem:[%s5351_s0 + %s4561_s4]]   ;;  %s4569_s22 = smov 16  }
   0xe   :  { %s4666_s14 = sld [smem:[%s5351_s0 + %s4562_s10]]   ;;  %s4570_s28 = smov 17  }
   0xf   :  { %s4671_s19 = sld [smem:[%s5351_s0 + %s4563_s15]]   ;;  %s4568_s15 = smov 15  }
  0x10   :  { %s4676_s24 = sld [smem:[%s5351_s0 + %s4564_s20]]  }
  0x11   :  { %s4681_s30 = sld [smem:[%s5351_s0 + %s4565_s26]]  }
  0x12   :  { %5366 = sst [smem:[#allocation51_spill]] %s4656_s3 }
  0x13   :  { %s4686_s6 = sld [smem:[%s5351_s0 + %s4566_s1]]  }
  0x14   :  { %s4691_s12 = sld [smem:[%s5351_s0 + %s4567_s7]]   ;;  %s4571_s7 = smov 18  }
  0x15   :  { %s4696_s20 = sld [smem:[%s5351_s0 + %s4568_s15]]   ;;  %s4572_s15 = smov 19  }
  0x16   :  { %s4701_s27 = sld [smem:[%s5351_s0 + %s4569_s22]]   ;;  %s4573_s22 = smov 20  }
  0x17   :  { %s4706_s4 = sld [smem:[%s5351_s0 + %s4570_s28]]   ;;  %s4574_s28 = smov 21  }
  0x18   :  { %s4711_s21 = sld [smem:[%s5351_s0 + %s4571_s7]]   ;;  %s4575_s7 = smov 22  }
  0x19   :  { %s4716_s3 = sld [smem:[%s5351_s0 + %s4572_s15]]   ;;  %s4576_s15 = smov 23  }
  0x1a   :  { %s4721_s13 = sld [smem:[%s5351_s0 + %s4573_s22]]   ;;  %s4577_s22 = smov 24  }
  0x1b   :  { %5367 = sst [smem:[#allocation52_spill]] %s4696_s20 }
  0x1c   :  { %s4726_s9 = sld [smem:[%s5351_s0 + %s4574_s28]]   ;;  %s4578_s28 = smov 25  }
  0x1d   :  { %5368 = sst [smem:[#allocation53_spill]] %s4706_s4 }
  0x1e   :  { %s4731_s5 = sld [smem:[%s5351_s0 + %s4575_s7]]   ;;  %s4579_s7 = smov 26  }
  0x1f   :  { %5369 = sst [smem:[#allocation54_spill]] %s4716_s3 }
  0x20   :  { %s4736_s3 = sld [smem:[%s5351_s0 + %s4576_s15]]   ;;  %s4580_s15 = smov 27  }
  0x21   :  { %s4741_s4 = sld [smem:[%s5351_s0 + %s4577_s22]]   ;;  %s4581_s22 = smov 28  }
  0x22   :  { %5370 = sst [smem:[#allocation55_spill]] %s4726_s9 }
  0x23   :  { %s4746_s9 = sld [smem:[%s5351_s0 + %s4578_s28]]   ;;  %s4582_s28 = smov 29  }
  0x24   :  { %5371 = sst [smem:[#allocation56_spill]] %s4731_s5 }
  0x25   :  { %s4751_s5 = sld [smem:[%s5351_s0 + %s4579_s7]]   ;;  %s4583_s7 = smov 30  }
  0x26   :  { %5372 = sst [smem:[#allocation57_spill]] %s4736_s3 }
  0x27   :  { %5373 = sst [smem:[#allocation58_spill]] %s4741_s4 }
  0x28   :  { %s4756_s3 = sld [smem:[%s5351_s0 + %s4580_s15]]   ;;  %s4584_s15 = smov 31  }
  0x29   :  { %5374 = sst [smem:[#allocation59_spill]] %s4746_s9 }
  0x2a   :  { %s4761_s4 = sld [smem:[%s5351_s0 + %s4581_s22]]  }
  0x2b   :  { %s4766_s9 = sld [smem:[%s5351_s0 + %s4582_s28]]  }
  0x2c   :  { %s4771_s20 = sld [smem:[%s5351_s0 + %s4583_s7]]  }
  0x2e   :  { %5375 = sst [smem:[#allocation60_spill]] %s4756_s3 }
  0x2f   :  { %s4776_s3 = sld [smem:[%s5351_s0 + %s4584_s15]]  }
  0x30   :  { %69 = vsyncpa [#allocation3], 0 }
  0x31   :  { %70 = vsyncpa [#allocation6], 0 }
  0x32   :  { %71 = vsyncpa [#allocation9], 0 }
  0x33   :  { %72 = vsyncpa [#allocation12], 0 }
  0x34   :  { %73 = vsyncpa [#allocation15], 0 }
  0x35   :  { %74 = vsyncpa [#allocation18], 0 }
  0x36   :  { %75 = vsyncpa [#allocation21], 0 }
  0x37   :  { %76 = vsyncpa [#allocation24], 0 }
  0x38   :  { %77 = vsyncpa [#allocation27], 0 }
  0x39   :  { %78 = vsyncpa [#allocation30], 0 }
  0x3a   :  { %79 = vsyncpa [#allocation4], 0 }
  0x3b   :  { %80 = vsyncpa [#allocation34], 0  ;;  %s4585_s22 = smov [#allocation5]   ;;  %s4586_s26 = smov [#allocation8]  }
  0x3c   :  { %s107_s23 = sshll.u32 %s4585_s22, 4  ;;  %s131_s0 = sshll.u32 %s4586_s26, 4  ;;  %s108_s23 = int_to_ptr.vmem [resolvable:$true] %s107_s23  ;;  %s132_s0 = int_to_ptr.vmem [resolvable:$true] %s131_s0 }
  0x3d   :  { %s4068_s28 = scalar_lea.hbm %s4646_s25, 128 }
  0x3e   :  { %p4069_p0 = scmp.ne.s32.totalorder %s4646_s25, %s4068_s28  ;;  %p4072_p1 = scmp.lt.u32.totalorder %s4068_s28, %s4646_s25 }
  0x40   :  { %p4074_p2 = pnand %p4072_p1, %p4069_p0 }
  0x42   :  { %4077 = shalt.err (!%p4074_p2)
}
  0x43   :  { %s4078_s1 = scalar_lea.vmem %s108_s23, 128  ;;  %p4083_p4 = scmp.lt.s32.totalorder %s108_s23, %s108_s23 }
  0x44   :  { %p4079_p3 = scmp.ne.s32.totalorder %s108_s23, %s4078_s1  ;;  %p4084_p5 = scmp.lt.s32.totalorder %s4078_s1, %s4078_s1 }
  0x46   :  { %p4085_p6 = por %p4084_p5, %p4083_p4 }
  0x48   :  { %p4086_p7 = pnand %p4085_p6, %p4079_p3 }
  0x4a   :  { %4089 = shalt.err (!%p4086_p7)
}
  0x4b   :  { %110 = dma.hbm_to_vmem [thread:$0]  %s4646_s25, 128, %s108_s23, [#allocation6]  }
  0x4c   :  { %s4090_s2 = scalar_lea.hbm %s4661_s8, 64 }
  0x4d   :  { %p4091_p8 = scmp.ne.s32.totalorder %s4661_s8, %s4090_s2  ;;  %p4094_p9 = scmp.lt.u32.totalorder %s4090_s2, %s4661_s8 }
  0x4f   :  { %p4096_p10 = pnand %p4094_p9, %p4091_p8 }
  0x51   :  { %4099 = shalt.err (!%p4096_p10)
}
  0x52   :  { %s4100_s7 = scalar_lea.vmem %s132_s0, 64  ;;  %p4105_p12 = scmp.lt.s32.totalorder %s132_s0, %s132_s0 }
  0x53   :  { %p4101_p11 = scmp.ne.s32.totalorder %s132_s0, %s4100_s7  ;;  %p4106_p13 = scmp.lt.s32.totalorder %s4100_s7, %s4100_s7 }
  0x55   :  { %p4107_p0 = por %p4106_p13, %p4105_p12 }
  0x57   :  { %p4108_p1 = pnand %p4107_p0, %p4101_p11 }
  0x59   :  { %4111 = shalt.err (!%p4108_p1)
}
  0x5a   :  { %134 = dma.hbm_to_vmem [thread:$0]  %s4661_s8, 64, %s132_s0, [#allocation9]  }
  0x5b   :  { %s4587_s10 = smov [#allocation11]   ;;  %s4588_s25 = smov [#allocation14]  }
  0x5c   :  { %s151_s11 = sshll.u32 %s4587_s10, 4  ;;  %s171_s15 = sshll.u32 %s4588_s25, 4  ;;  %s152_s11 = int_to_ptr.vmem [resolvable:$true] %s151_s11  ;;  %s172_s15 = int_to_ptr.vmem [resolvable:$true] %s171_s15 }
  0x5d   :  { %s4112_s16 = scalar_lea.hbm %s4671_s19, 128 }
  0x5e   :  { %p4113_p2 = scmp.ne.s32.totalorder %s4671_s19, %s4112_s16  ;;  %p4116_p3 = scmp.lt.u32.totalorder %s4112_s16, %s4671_s19 }
  0x60   :  { %p4118_p4 = pnand %p4116_p3, %p4113_p2 }
  0x62   :  { %4121 = shalt.err (!%p4118_p4)
}
  0x63   :  { %s4122_s18 = scalar_lea.vmem %s152_s11, 128  ;;  %p4127_p6 = scmp.lt.s32.totalorder %s152_s11, %s152_s11 }
  0x64   :  { %p4123_p5 = scmp.ne.s32.totalorder %s152_s11, %s4122_s18  ;;  %p4128_p7 = scmp.lt.s32.totalorder %s4122_s18, %s4122_s18 }
  0x66   :  { %p4129_p8 = por %p4128_p7, %p4127_p6 }
  0x68   :  { %p4130_p9 = pnand %p4129_p8, %p4123_p5 }
  0x6a   :  { %4133 = shalt.err (!%p4130_p9)
}
  0x6b   :  { %154 = dma.hbm_to_vmem [thread:$0]  %s4671_s19, 128, %s152_s11, [#allocation12]  }
  0x6c   :  { %s4134_s8 = scalar_lea.hbm %s4681_s30, 16 }
  0x6d   :  { %p4135_p10 = scmp.ne.s32.totalorder %s4681_s30, %s4134_s8  ;;  %p4138_p11 = scmp.lt.u32.totalorder %s4134_s8, %s4681_s30 }
  0x6f   :  { %p4140_p12 = pnand %p4138_p11, %p4135_p10 }
  0x71   :  { %4143 = shalt.err (!%p4140_p12)
}
  0x72   :  { %s4144_s22 = scalar_lea.vmem %s172_s15, 16  ;;  %s4148_s23 = scalar_lea.vmem %s172_s15, 32 }
  0x73   :  { %p4145_p13 = scmp.ne.s32.totalorder %s172_s15, %s4144_s22  ;;  %p4149_p0 = scmp.lt.s32.totalorder %s172_s15, %s172_s15 }
  0x74   :  { %p4150_p1 = scmp.lt.s32.totalorder %s4148_s23, %s4144_s22 }
  0x76   :  { %p4151_p2 = por %p4150_p1, %p4149_p0 }
  0x78   :  { %p4152_p3 = pnand %p4151_p2, %p4145_p13 }
  0x7a   :  { %4155 = shalt.err (!%p4152_p3)
}
  0x7b   :  { %174 = dma.hbm_to_vmem [thread:$0]  %s4681_s30, 16, %s172_s15, [#allocation15]  }
  0x7c   :  { %s4589_s26 = smov [#allocation17]   ;;  %s4590_s0 = smov [#allocation20]  }
  0x7d   :  { %s191_s19 = sshll.u32 %s4589_s26, 4  ;;  %s211_s28 = sshll.u32 %s4590_s0, 4  ;;  %s192_s19 = int_to_ptr.vmem [resolvable:$true] %s191_s19  ;;  %s212_s28 = int_to_ptr.vmem [resolvable:$true] %s211_s28 }
  0x7e   :  { %s4156_s1 = scalar_lea.hbm %s4691_s12, 128 }
  0x7f   :  { %p4157_p4 = scmp.ne.s32.totalorder %s4691_s12, %s4156_s1  ;;  %p4160_p5 = scmp.lt.u32.totalorder %s4156_s1, %s4691_s12 }
  0x81   :  { %p4162_p6 = pnand %p4160_p5, %p4157_p4 }
  0x83   :  { %4165 = shalt.err (!%p4162_p6)
}
  0x84   :  { %s4166_s2 = scalar_lea.vmem %s192_s19, 128  ;;  %p4171_p8 = scmp.lt.s32.totalorder %s192_s19, %s192_s19 }
  0x85   :  { %p4167_p7 = scmp.ne.s32.totalorder %s192_s19, %s4166_s2  ;;  %p4172_p9 = scmp.lt.s32.totalorder %s4166_s2, %s4166_s2 }
  0x87   :  { %p4173_p10 = por %p4172_p9, %p4171_p8 }
  0x89   :  { %p4174_p11 = pnand %p4173_p10, %p4167_p7 }
  0x8b   :  { %4177 = shalt.err (!%p4174_p11)
}
  0x8c   :  { %194 = dma.hbm_to_vmem [thread:$0]  %s4691_s12, 128, %s192_s19, [#allocation18]  }
  0x8d   :  { %s4178_s30 = scalar_lea.hbm %s4701_s27, 16 }
  0x8e   :  { %p4179_p12 = scmp.ne.s32.totalorder %s4701_s27, %s4178_s30  ;;  %p4182_p13 = scmp.lt.u32.totalorder %s4178_s30, %s4701_s27 }
  0x90   :  { %p4184_p0 = pnand %p4182_p13, %p4179_p12 }
  0x92   :  { %4187 = shalt.err (!%p4184_p0)
}
  0x93   :  { %s4188_s7 = scalar_lea.vmem %s212_s28, 16  ;;  %s4192_s10 = scalar_lea.vmem %s212_s28, 32 }
  0x94   :  { %p4189_p1 = scmp.ne.s32.totalorder %s212_s28, %s4188_s7  ;;  %p4193_p2 = scmp.lt.s32.totalorder %s212_s28, %s212_s28 }
  0x95   :  { %p4194_p3 = scmp.lt.s32.totalorder %s4192_s10, %s4188_s7 }
  0x97   :  { %p4195_p4 = por %p4194_p3, %p4193_p2 }
  0x99   :  { %p4196_p5 = pnand %p4195_p4, %p4189_p1 }
  0x9b   :  { %4199 = shalt.err (!%p4196_p5)
}
  0x9c   :  { %214 = dma.hbm_to_vmem [thread:$0]  %s4701_s27, 16, %s212_s28, [#allocation21]  }
  0x9d   :  { %s4591_s11 = smov [#allocation23]   ;;  %s4200_s25 = scalar_lea.hbm %s4711_s21, 4096 }
  0x9e   :  { %s230_s12 = sshll.u32 %s4591_s11, 4  ;;  %p4201_p6 = scmp.ne.s32.totalorder %s4711_s21, %s4200_s25  ;;  %s231_s12 = int_to_ptr.vmem [resolvable:$true] %s230_s12 }
  0x9f   :  { %p4204_p7 = scmp.lt.u32.totalorder %s4200_s25, %s4711_s21 }
  0xa1   :  { %p4206_p8 = pnand %p4204_p7, %p4201_p6 }
  0xa3   :  { %4209 = shalt.err (!%p4206_p8)
}
  0xa4   :  { %s4210_s15 = scalar_lea.vmem %s231_s12, 4096  ;;  %p4215_p10 = scmp.lt.s32.totalorder %s231_s12, %s231_s12 }
  0xa5   :  { %p4211_p9 = scmp.ne.s32.totalorder %s231_s12, %s4210_s15  ;;  %p4216_p11 = scmp.lt.s32.totalorder %s4210_s15, %s4210_s15 }
  0xa7   :  { %p4217_p12 = por %p4216_p11, %p4215_p10 }
  0xa9   :  { %p4218_p13 = pnand %p4217_p12, %p4211_p9 }
  0xab   :  { %4221 = shalt.err (!%p4218_p13)
}
  0xac   :  { %s4592_s16 = smov 256   ;;  %s4593_s27 = smov 16  }
  0xad   :  { %236 = dma.hbm_to_vmem [thread:$0]  %s4711_s21, 4096, %s231_s12, [#allocation24], %s4592_s16, %s4592_s16, %s4593_s27  }
  0xae   :  { %s4594_s18 = smov [#allocation26]   ;;  %s4595_s22 = smov [#allocation29]  }
  0xaf   :  { %s252_s8 = sshll.u32 %s4594_s18, 4  ;;  %s284_s23 = sshll.u32 %s4595_s22, 4  ;;  %s253_s8 = int_to_ptr.vmem [resolvable:$true] %s252_s8  ;;  %s285_s23 = int_to_ptr.vmem [resolvable:$true] %s284_s23 }
  0xb0   :  { %s4222_s26 = scalar_lea.hbm %s4721_s13, 4096 }
  0xb1   :  { %p4223_p0 = scmp.ne.s32.totalorder %s4721_s13, %s4222_s26  ;;  %p4226_p1 = scmp.lt.u32.totalorder %s4222_s26, %s4721_s13 }
  0xb3   :  { %p4228_p2 = pnand %p4226_p1, %p4223_p0 }
  0xb5   :  { %4231 = shalt.err (!%p4228_p2)
}
  0xb6   :  { %s4232_s19 = scalar_lea.vmem %s253_s8, 4096  ;;  %p4237_p4 = scmp.lt.s32.totalorder %s253_s8, %s253_s8 }
  0xb7   :  { %p4233_p3 = scmp.ne.s32.totalorder %s253_s8, %s4232_s19  ;;  %p4238_p5 = scmp.lt.s32.totalorder %s4232_s19, %s4232_s19 }
  0xb9   :  { %p4239_p6 = por %p4238_p5, %p4237_p4 }
  0xbb   :  { %p4240_p7 = pnand %p4239_p6, %p4233_p3 }
  0xbd   :  { %4243 = shalt.err (!%p4240_p7)
}
  0xbe   :  { %258 = dma.hbm_to_vmem [thread:$0]  %s4721_s13, 4096, %s253_s8, [#allocation27], %s4592_s16, %s4592_s16, %s4593_s27  }
  0xbf   :  { %s4244_s21 = scalar_lea.hbm %s4751_s5, 4096 }
  0xc0   :  { %p4245_p8 = scmp.ne.s32.totalorder %s4751_s5, %s4244_s21  ;;  %p4248_p9 = scmp.lt.u32.totalorder %s4244_s21, %s4751_s5 }
  0xc2   :  { %p4250_p10 = pnand %p4248_p9, %p4245_p8 }
  0xc4   :  { %4253 = shalt.err (!%p4250_p10)
}
  0xc5   :  { %s4254_s0 = scalar_lea.vmem %s285_s23, 4096  ;;  %p4259_p12 = scmp.lt.s32.totalorder %s285_s23, %s285_s23 }
  0xc6   :  { %p4255_p11 = scmp.ne.s32.totalorder %s285_s23, %s4254_s0  ;;  %p4260_p13 = scmp.lt.s32.totalorder %s4254_s0, %s4254_s0 }
  0xc8   :  { %p4261_p0 = por %p4260_p13, %p4259_p12 }
  0xca   :  { %p4262_p1 = pnand %p4261_p0, %p4255_p11 }
  0xcc   :  { %4265 = shalt.err (!%p4262_p1)
}
  0xcd   :  { %290 = dma.hbm_to_vmem [thread:$0]  %s4751_s5, 4096, %s285_s23, [#allocation30], %s4592_s16, %s4592_s16, %s4593_s27  }
  0xce   :  { %s4596_s13 = smov [#allocation2]   ;;  %s4266_s1 = scalar_lea.hbm %s4636_s17, 256 }
  0xcf   :  { %s92_s28 = sshll.u32 %s4596_s13, 4  ;;  %p4267_p2 = scmp.ne.s32.totalorder %s4636_s17, %s4266_s1  ;;  %s93_s28 = int_to_ptr.vmem [resolvable:$true] %s92_s28 }
  0xd0   :  { %p4270_p3 = scmp.lt.u32.totalorder %s4266_s1, %s4636_s17 }
  0xd2   :  { %p4272_p4 = pnand %p4270_p3, %p4267_p2 }
  0xd4   :  { %4275 = shalt.err (!%p4272_p4)
}
  0xd5   :  { %s4276_s2 = scalar_lea.vmem %s93_s28, 256  ;;  %p4281_p6 = scmp.lt.s32.totalorder %s93_s28, %s93_s28 }
  0xd6   :  { %p4277_p5 = scmp.ne.s32.totalorder %s93_s28, %s4276_s2  ;;  %p4282_p7 = scmp.lt.s32.totalorder %s4276_s2, %s4276_s2 }
  0xd8   :  { %p4283_p8 = por %p4282_p7, %p4281_p6 }
  0xda   :  { %p4284_p9 = pnand %p4283_p8, %p4277_p5 }
  0xdc   :  { %4287 = shalt.err (!%p4284_p9)
}
  0xdd   :  { %s4597_s30 = smov 128   ;;  %s4598_s5 = smov 8  }
  0xde   :  { %98 = dma.hbm_to_vmem [thread:$0]  %s4636_s17, 256, %s93_s28, [#allocation3], %s4597_s30, %s4597_s30, %s4598_s5  }
  0xdf   :  { %s4599_s7 = smov [#allocation7]   ;;  %s4600_s11 = smov [#allocation10]  }
  0xe0   :  { %s116_s10 = sshll.u32 %s4599_s7, 4  ;;  %s141_s12 = sshll.u32 %s4600_s11, 4  ;;  %s117_s10 = int_to_ptr.vmem [resolvable:$true] %s116_s10  ;;  %s142_s12 = int_to_ptr.vmem [resolvable:$true] %s141_s12 }
  0xe1   :  { %s4288_s25 = scalar_lea.hbm %s4651_s29, 256 }
  0xe2   :  { %p4289_p10 = scmp.ne.s32.totalorder %s4651_s29, %s4288_s25  ;;  %p4292_p11 = scmp.lt.u32.totalorder %s4288_s25, %s4651_s29 }
  0xe4   :  { %p4294_p12 = pnand %p4292_p11, %p4289_p10 }
  0xe6   :  { %4297 = shalt.err (!%p4294_p12)
}
  0xe7   :  { %s4298_s15 = scalar_lea.vmem %s117_s10, 256  ;;  %p4303_p0 = scmp.lt.s32.totalorder %s117_s10, %s117_s10 }
  0xe8   :  { %p4299_p13 = scmp.ne.s32.totalorder %s117_s10, %s4298_s15  ;;  %p4304_p1 = scmp.lt.s32.totalorder %s4298_s15, %s4298_s15 }
  0xea   :  { %p4305_p2 = por %p4304_p1, %p4303_p0 }
  0xec   :  { %p4306_p3 = pnand %p4305_p2, %p4299_p13 }
  0xee   :  { %4309 = shalt.err (!%p4306_p3)
}
  0xef   :  { %122 = dma.hbm_to_vmem [thread:$0]  %s4651_s29, 256, %s117_s10, [#allocation6], %s4597_s30, %s4597_s30, %s4598_s5  }
  0xf0   :  { %s4310_s17 = scalar_lea.hbm %s4666_s14, 32 }
  0xf1   :  { %p4311_p4 = scmp.ne.s32.totalorder %s4666_s14, %s4310_s17  ;;  %p4314_p5 = scmp.lt.u32.totalorder %s4310_s17, %s4666_s14 }
  0xf3   :  { %p4316_p6 = pnand %p4314_p5, %p4311_p4 }
  0xf5   :  { %4319 = shalt.err (!%p4316_p6)
}
  0xf6   :  { %s4320_s18 = scalar_lea.vmem %s142_s12, 32  ;;  %p4325_p8 = scmp.lt.s32.totalorder %s142_s12, %s142_s12 }
  0xf7   :  { %p4321_p7 = scmp.ne.s32.totalorder %s142_s12, %s4320_s18  ;;  %p4326_p9 = scmp.lt.s32.totalorder %s4320_s18, %s4320_s18 }
  0xf9   :  { %p4327_p10 = por %p4326_p9, %p4325_p8 }
  0xfb   :  { %p4328_p11 = pnand %p4327_p10, %p4321_p7 }
  0xfd   :  { %4331 = shalt.err (!%p4328_p11)
}
  0xfe   :  { %144 = dma.hbm_to_vmem [thread:$0]  %s4666_s14, 32, %s142_s12, [#allocation9]  }
  0xff   :  { %s4601_s8 = smov [#allocation13]   ;;  %s4602_s29 = smov [#allocation16]  }
 0x100   :  { %s161_s22 = sshll.u32 %s4601_s8, 4  ;;  %s181_s23 = sshll.u32 %s4602_s29, 4  ;;  %s162_s22 = int_to_ptr.vmem [resolvable:$true] %s161_s22  ;;  %s182_s23 = int_to_ptr.vmem [resolvable:$true] %s181_s23 }
 0x101   :  { %s4332_s26 = scalar_lea.hbm %s4676_s24, 64 }
 0x102   :  { %p4333_p12 = scmp.ne.s32.totalorder %s4676_s24, %s4332_s26  ;;  %p4336_p13 = scmp.lt.u32.totalorder %s4332_s26, %s4676_s24 }
 0x104   :  { %p4338_p0 = pnand %p4336_p13, %p4333_p12 }
 0x106   :  { %4341 = shalt.err (!%p4338_p0)
}
 0x107   :  { %s4342_s19 = scalar_lea.vmem %s162_s22, 64  ;;  %p4347_p2 = scmp.lt.s32.totalorder %s162_s22, %s162_s22 }
 0x108   :  { %p4343_p1 = scmp.ne.s32.totalorder %s162_s22, %s4342_s19  ;;  %p4348_p3 = scmp.lt.s32.totalorder %s4342_s19, %s4342_s19 }
 0x10a   :  { %p4349_p4 = por %p4348_p3, %p4347_p2 }
 0x10c   :  { %p4350_p5 = pnand %p4349_p4, %p4343_p1 }
 0x10e   :  { %4353 = shalt.err (!%p4350_p5)
}
 0x10f   :  { %164 = dma.hbm_to_vmem [thread:$0]  %s4676_s24, 64, %s162_s22, [#allocation12]  }
 0x110   :  { %s4354_s14 = scalar_lea.hbm %s4686_s6, 16 }
 0x111   :  { %p4355_p6 = scmp.ne.s32.totalorder %s4686_s6, %s4354_s14  ;;  %p4358_p7 = scmp.lt.u32.totalorder %s4354_s14, %s4686_s6 }
 0x113   :  { %p4360_p8 = pnand %p4358_p7, %p4355_p6 }
 0x115   :  { %4363 = shalt.err (!%p4360_p8)
}
 0x116   :  { %s4364_s21 = scalar_lea.vmem %s182_s23, 16  ;;  %s4368_s0 = scalar_lea.vmem %s182_s23, 32 }
 0x117   :  { %p4365_p9 = scmp.ne.s32.totalorder %s182_s23, %s4364_s21  ;;  %p4369_p10 = scmp.lt.s32.totalorder %s182_s23, %s182_s23 }
 0x118   :  { %p4370_p11 = scmp.lt.s32.totalorder %s4368_s0, %s4364_s21 }
 0x11a   :  { %p4371_p12 = por %p4370_p11, %p4369_p10 }
 0x11c   :  { %p4372_p13 = pnand %p4371_p12, %p4365_p9 }
 0x11e   :  { %4375 = shalt.err (!%p4372_p13)
}
 0x11f   :  { %s5376_s13 = sld [smem:[#allocation52_spill]]  ;;  %s4603_s28 = smov [#allocation19]  }
 0x120   :  { %184 = dma.hbm_to_vmem [thread:$0]  %s4686_s6, 16, %s182_s23, [#allocation15]  }
 0x121   :  { %s201_s24 = sshll.u32 %s4603_s28, 4  ;;  %s4604_s1 = smov [#allocation22]   ;;  %s202_s24 = int_to_ptr.vmem [resolvable:$true] %s201_s24 }
 0x122   :  { %s221_s2 = sshll.u32 %s4604_s1, 4  ;;  %s222_s2 = int_to_ptr.vmem [resolvable:$true] %s221_s2 }
 0x125   :  { %s4376_s30 = scalar_lea.hbm %s5376_s13, 128 }
 0x126   :  { %p4377_p0 = scmp.ne.s32.totalorder %s5376_s13, %s4376_s30  ;;  %p4380_p1 = scmp.lt.u32.totalorder %s4376_s30, %s5376_s13 }
 0x128   :  { %p4382_p2 = pnand %p4380_p1, %p4377_p0 }
 0x12a   :  { %4385 = shalt.err (!%p4382_p2)
}
 0x12b   :  { %s4386_s5 = scalar_lea.vmem %s202_s24, 128  ;;  %p4391_p4 = scmp.lt.s32.totalorder %s202_s24, %s202_s24 }
 0x12c   :  { %p4387_p3 = scmp.ne.s32.totalorder %s202_s24, %s4386_s5  ;;  %p4392_p5 = scmp.lt.s32.totalorder %s4386_s5, %s4386_s5 }
 0x12e   :  { %p4393_p6 = por %p4392_p5, %p4391_p4 }
 0x130   :  { %p4394_p7 = pnand %p4393_p6, %p4387_p3 }
 0x132   :  { %4397 = shalt.err (!%p4394_p7)
}
 0x133   :  { %s5377_s6 = sld [smem:[#allocation53_spill]] }
 0x134   :  { %204 = dma.hbm_to_vmem [thread:$0]  %s5376_s13, 128, %s202_s24, [#allocation18]  }
 0x139   :  { %s4398_s7 = scalar_lea.hbm %s5377_s6, 16 }
 0x13a   :  { %p4399_p8 = scmp.ne.s32.totalorder %s5377_s6, %s4398_s7  ;;  %p4402_p9 = scmp.lt.u32.totalorder %s4398_s7, %s5377_s6 }
 0x13c   :  { %p4404_p10 = pnand %p4402_p9, %p4399_p8 }
 0x13e   :  { %4407 = shalt.err (!%p4404_p10)
}
 0x13f   :  { %s4408_s10 = scalar_lea.vmem %s222_s2, 16  ;;  %s4412_s11 = scalar_lea.vmem %s222_s2, 32 }
 0x140   :  { %p4409_p11 = scmp.ne.s32.totalorder %s222_s2, %s4408_s10  ;;  %p4413_p12 = scmp.lt.s32.totalorder %s222_s2, %s222_s2 }
 0x141   :  { %p4414_p13 = scmp.lt.s32.totalorder %s4412_s11, %s4408_s10 }
 0x143   :  { %p4415_p0 = por %p4414_p13, %p4413_p12 }
 0x145   :  { %p4416_p1 = pnand %p4415_p0, %p4409_p11 }
 0x147   :  { %4419 = shalt.err (!%p4416_p1)
}
 0x148   :  { %s5378_s12 = sld [smem:[#allocation54_spill]]  ;;  %s4605_s25 = smov [#allocation25]  }
 0x149   :  { %224 = dma.hbm_to_vmem [thread:$0]  %s5377_s6, 16, %s222_s2, [#allocation21]  }
 0x14a   :  { %s243_s15 = sshll.u32 %s4605_s25, 4  ;;  %s4606_s17 = smov [#allocation28]   ;;  %s244_s15 = int_to_ptr.vmem [resolvable:$true] %s243_s15 }
 0x14b   :  { %s268_s18 = sshll.u32 %s4606_s17, 4  ;;  %s4851_s18 = int_to_ptr.vmem [resolvable:$true] %s268_s18 }
 0x14e   :  { %s4420_s8 = scalar_lea.hbm %s5378_s12, 64 }
 0x14f   :  { %p4421_p2 = scmp.ne.s32.totalorder %s5378_s12, %s4420_s8  ;;  %p4424_p3 = scmp.lt.u32.totalorder %s4420_s8, %s5378_s12 }
 0x151   :  { %p4426_p4 = pnand %p4424_p3, %p4421_p2 }
 0x153   :  { %4429 = shalt.err (!%p4426_p4)
}
 0x154   :  { %s4430_s22 = scalar_lea.vmem %s244_s15, 64  ;;  %p4435_p6 = scmp.lt.s32.totalorder %s244_s15, %s244_s15 }
 0x155   :  { %p4431_p5 = scmp.ne.s32.totalorder %s244_s15, %s4430_s22  ;;  %p4436_p7 = scmp.lt.s32.totalorder %s4430_s22, %s4430_s22 }
 0x157   :  { %p4437_p8 = por %p4436_p7, %p4435_p6 }
 0x159   :  { %p4438_p9 = pnand %p4437_p8, %p4431_p5 }
 0x15b   :  { %4441 = shalt.err (!%p4438_p9)
}
 0x15c   :  { %s5379_s29 = sld [smem:[#allocation57_spill]] }
 0x15d   :  { %246 = dma.hbm_to_vmem [thread:$0]  %s5378_s12, 64, %s244_s15, [#allocation24]  }
 0x162   :  { %s4442_s23 = scalar_lea.hbm %s5379_s29, 4096 }
 0x163   :  { %p4443_p10 = scmp.ne.s32.totalorder %s5379_s29, %s4442_s23  ;;  %p4446_p11 = scmp.lt.u32.totalorder %s4442_s23, %s5379_s29 }
 0x165   :  { %p4448_p12 = pnand %p4446_p11, %p4443_p10 }
 0x167   :  { %4451 = shalt.err (!%p4448_p12)
}
 0x168   :  { %s4452_s26 = scalar_lea.vmem %s4851_s18, 4096  ;;  %p4457_p0 = scmp.lt.s32.totalorder %s4851_s18, %s4851_s18 }
 0x169   :  { %p4453_p13 = scmp.ne.s32.totalorder %s4851_s18, %s4452_s26  ;;  %p4458_p1 = scmp.lt.s32.totalorder %s4452_s26, %s4452_s26 }
 0x16b   :  { %p4459_p2 = por %p4458_p1, %p4457_p0 }
 0x16d   :  { %p4460_p3 = pnand %p4459_p2, %p4453_p13 }
 0x16f   :  { %4463 = shalt.err (!%p4460_p3)
}
 0x170   :  { %s5380_s19 = sld [smem:[#allocation60_spill]]  ;;  %s4607_s14 = smov [#allocation31]  }
 0x171   :  { %274 = dma.hbm_to_vmem [thread:$0]  %s5379_s29, 4096, %s4851_s18, [#allocation27], %s4592_s16, %s4592_s16, %s4593_s27  }
 0x172   :  { %s296_s21 = sshll.u32 %s4607_s14, 4  ;;  %s297_s21 = int_to_ptr.vmem [resolvable:$true] %s296_s21 }
 0x176   :  { %s4464_s0 = scalar_lea.hbm %s5380_s19, 4096 }
 0x177   :  { %p4465_p4 = scmp.ne.s32.totalorder %s5380_s19, %s4464_s0  ;;  %p4468_p5 = scmp.lt.u32.totalorder %s4464_s0, %s5380_s19 }
 0x179   :  { %p4470_p6 = pnand %p4468_p5, %p4465_p4 }
 0x17b   :  { %4473 = shalt.err (!%p4470_p6)
}
 0x17c   :  { %s4474_s13 = scalar_lea.vmem %s297_s21, 4096  ;;  %p4479_p8 = scmp.lt.s32.totalorder %s297_s21, %s297_s21 }
 0x17d   :  { %p4475_p7 = scmp.ne.s32.totalorder %s297_s21, %s4474_s13  ;;  %p4480_p9 = scmp.lt.s32.totalorder %s4474_s13, %s4474_s13 }
 0x17f   :  { %p4481_p10 = por %p4480_p9, %p4479_p8 }
 0x181   :  { %p4482_p11 = pnand %p4481_p10, %p4475_p7 }
 0x183   :  { %4485 = shalt.err (!%p4482_p11)
}
 0x184   :  { %302 = dma.hbm_to_vmem [thread:$0]  %s5380_s19, 4096, %s297_s21, [#allocation30], %s4592_s16, %s4592_s16, %s4593_s27  }
 0x185   :  { %4530 = dma.done.wait [#allocation3], 256  }
 0x186   :  { %4531 = vsyncadd [#allocation3], 4294967040 }
 0x187   :  { %4532 = dma.done.wait [#allocation6], 384  }
 0x188   :  { %4533 = vsyncadd [#allocation6], 4294966912 }
 0x189   :  { %4534 = dma.done.wait [#allocation9], 96  }
 0x18a   :  { %4535 = vsyncadd [#allocation9], 4294967200 }
 0x18b   :  { %4536 = dma.done.wait [#allocation12], 192  }
 0x18c   :  { %4537 = vsyncadd [#allocation12], 4294967104 }
 0x18d   :  { %4538 = dma.done.wait [#allocation15], 32  }
 0x18e   :  { %4539 = vsyncadd [#allocation15], 4294967264 }
 0x18f   :  { %4540 = dma.done.wait [#allocation18], 256  }
 0x190   :  { %4541 = vsyncadd [#allocation18], 4294967040 }
 0x191   :  { %4542 = dma.done.wait [#allocation21], 32  }
 0x192   :  { %4543 = vsyncadd [#allocation21], 4294967264 }
 0x193   :  { %4544 = dma.done.wait [#allocation24], 4160  }
 0x194   :  { %4545 = vsyncadd [#allocation24], 4294963136 }
 0x195   :  { %4546 = dma.done.wait [#allocation27], 8192  }
 0x196   :  { %4547 = vsyncadd [#allocation27], 4294959104 }
 0x197   :  { %4548 = dma.done.wait [#allocation30], 8192  }
 0x198   :  { %4549 = vsyncadd [#allocation30], 4294959104  ;;  %s5381_s28 = sld [smem:[#allocation47_spill]]  ;;  %vm390_vm0 = vcmask 1043456   ;;  %vm383_vm1 = vcmask 31744   ;;  %v469_v3 = vlaneseq  ;;  %v370_v22 = vld [vmem:[#allocation2] sm:$0xff] }
 0x199   :  { %v381_v0 = vld [vmem:[#allocation8] sm:$0xf]  ;;  %v382_v7 = vld [vmem:[#allocation10] sm:$0x3]  ;;  %vm533_vm2 = vcmp.ne.f32.partialorder %v370_v22, 0.0  ;;  %s5382_s24 = sld [smem:[#allocation48_spill]] }
 0x19a   :  { %3588 = vmatprep.subr.msk.mxu1 %vm390_vm0, %v381_v0  ;;  %v4888_v4 = vshrl.u32 %v469_v3, 7  ;;  %v371_v26 = vld [vmem:[#allocation2 + $0x8] sm:$0xff]  ;;  %vm537_vm5 = vcmask 130048   ;;  %vm661_vm7 = vcmask 1045504   ;;  %v4608_v37 = vmov 0.0   ;;  %s5383_s1 = sld [smem:[#allocation49_spill]] }
 0x19b   :  { %3589 = vmatpush3.msk.msra.mxu1 %vm390_vm0, %v381_v0  ;;  %vm534_vm6 = vcmp.ne.f32.partialorder %v371_v26, 0.0  ;;  %v647_v35 = vld [vmem:[#allocation11] sm:$0x3f]  ;;  %3600 = vmatprep.subr.mxu0 %v4608_v37  ;;  %vm4609_vm8 = vmmov 0   ;;  %vm651_vm9 = vcmask 48128   ;;  %vm898_vm14 = vcmask 195584  }
 0x19c   :  { %v4891_v5 = vsub.s32 0, %v4888_v4  ;;  %v4894_v6 = vsub.s32 1, %v4888_v4  ;;  %3602 = vmatprep.mubr.msk.f32.mxu0 %vm4609_vm8, %v4608_v37  ;;  %3601 = vmatpush3.msk.msra.mxu0 %vm661_vm7, %v647_v35  ;;  %v648_v52 = vld [vmem:[#allocation13] sm:$0xf]  ;;  %v3500_v53 = vld [vmem:[#allocation14] ss:$0 sm:$0xff] }
 0x19d   :  { %vm1168_vm15 = vcmask 1044480   ;;  %s5384_s2 = sld [smem:[#allocation51_spill]]  ;;  %s5385_s30 = sld [smem:[#allocation50_spill]] }
 0x19e   :  { %v4877_v1 = vld [vmem:[%s5381_s28] sm:$0xff]  ;;  %v4880_v2 = vld [vmem:[%s5381_s28 + $0x8] sm:$0xff]  ;;  %v482_v8 = vrot.slane %v382_v7, %v4894_v6  ;;  %v472_v9 = vrot.slane %v382_v7, %v4891_v5  ;;  %s5386_s5 = sld [smem:[#allocation55_spill]]  ;;  %s5387_s6 = sld [smem:[#allocation59_spill]] }
 0x19f   :  { %3590 = vmatprep.mubr.msk.f32.mxu1 %vm383_vm1, %v4877_v1  ;;  %v4904_v36 = vld [vmem:[%s5382_s24] sm:$0xff]  ;;  %v4915_v38 = vld [vmem:[%s5382_s24 + $0x8] sm:$0xff]  ;;  %v4922_v39 = vld [vmem:[%s5382_s24 + $0x10] sm:$0xff]  ;;  %s5389_s7 = sld [smem:[#allocation58_spill]] }
 0x1a0   :  { %3591 = vmatmul.mubr.msk.f32.vlgmr.msra.gmra.mrb[0].mxu1 %vm383_vm1, %v4880_v2  ;;  %3603 = vmatmul.mubr.msk.f32.vlgmr.msra.gmra.mrb[0].mxu0 %vm651_vm9, %v4904_v36 }
 0x1a1   :  { %3605 = vmatprep.mubr.msk.f32.mxu0 %vm4609_vm8, %v4608_v37 }
 0x1a4   :  { %3606 = vmatmul.mubr.msk.f32.gmra.mrb[2].mxu0 %vm651_vm9, %v4915_v38 }
 0x1a5   :  { %3608 = vmatprep.mubr.msk.f32.mxu0 %vm4609_vm8, %v4608_v37 }
 0x1a8   :  { %3609 = vmatmul.mubr.msk.f32.gmra.mrb[4].mxu0 %vm651_vm9, %v4922_v39 }
 0x273   :  { %v3592_v10 = vpop.f32.mrb[0].mxu1  ;;  %v731_v54 = vpop.f32.mrb[0].mxu0 }
 0x274   :  { %v460_v11 = vpop.f32.mrb[1].mxu1  ;;  %v484_v15 = vmul.f32 %v3592_v10, %v482_v8  ;;  %v474_v16 = vmul.f32 %v3592_v10, %v472_v9  ;;  %v3604_v55 = vpop.f32.mrb[1].mxu0  ;;  %v829_v56 = vmul.f32 %v3500_v53, %v731_v54 }
 0x275   :  { %v3715_v12 = vpack.c.bf16 %v3592_v10, %v460_v11  ;;  %v483_v13 = vmul.f32 %v482_v8, %v460_v11  ;;  %v473_v14 = vmul.f32 %v472_v9, %v460_v11 }
 0x277   :  { %3716 = vmatprep.subr.bf16.mxu1 %v3715_v12  ;;  %485 = vadd.xlane.f32.xlu0 %v483_v13  ;;  %v736_v57 = vpop.f32.mrb[2].mxu0  ;;  %v4610_v13 = vmov 0.0|0.0  }
 0x278   :  { %475 = vadd.xlane.f32.xlu1 %v473_v14  ;;  %3718 = vmatpush3.bf16.msra.mxu1 %v3715_v12  ;;  %v3722_v58 = vpack.c.bf16 %v736_v57, %v731_v54  ;;  %v3607_v59 = vpop.f32.mrb[3].mxu0  ;;  %v830_v60 = vmul.f32 %v3500_v53, %v736_v57 }
 0x279   :  { %3611 = vmatprep.subr.msk.mxu1 %vm390_vm0, %v648_v52 }
 0x27a   :  { %3723 = vmatprep.subr.bf16.mxu0 %v3722_v58 }
 0x27b   :  { %487 = vadd.xlane.f32.xlu0 %v484_v15  ;;  %3725 = vmatpush3.bf16.msra.mxu0 %v3722_v58  ;;  %v741_v61 = vpop.f32.mrb[4].mxu0 }
 0x27c   :  { %477 = vadd.xlane.f32.xlu1 %v474_v16  ;;  %v3610_v62 = vpop.f32.mrb[5].mxu0  ;;  %3633 = vmatprep.subr.mxu0 %v741_v61  ;;  %v831_v63 = vmul.f32 %v3500_v53, %v741_v61  ;;  %v3501_v16 = vld [vmem:[#allocation16] ss:$0 sm:$0xff] }
 0x27f   :  { %3634 = vmatpush3.msra.mxu0 %v741_v61 }
 0x280   :  { %3638 = vmatprep.subr.mxu0 %v4608_v37 }
 0x304   :  { %v486_v17 = vpop.xlane.xlu0 %485 }
 0x305   :  { %489 = vxpose.xlu0.b32.start [1/2] (short) (narrow) %v486_v17, 8  ;;  %v476_v19 = vpop.xlane.xlu1 %475 }
 0x308   :  { %v488_v18 = vpop.xlane.xlu0 %487 }
 0x309   :  { %490 = vxpose.xlu0.b32.end [2/2] (short) (narrow) %v488_v18, 8  ;;  %v478_v23 = vpop.xlane.xlu1 %477 }
 0x385   :  { %v505_v20 = vpop.trf.xlu0 }
 0x386   :  { %v524_v21 = vrot.slane %v505_v20, %v4891_v5 }
 0x388   :  { %v525_v24 = vadd.f32 %v524_v21, %v476_v19  ;;  %v526_v25 = vadd.f32 %v524_v21, %v478_v23 }
 0x38a   :  { %vm527_vm3 = vcmp.ge.f32.partialorder %v525_v24, 0.0  ;;  %v529_v27 = vmul.f32 0.2, %v525_v24  ;;  %vm528_vm4 = vcmp.ge.f32.partialorder %v526_v25, 0.0  ;;  %v530_v28 = vmul.f32 0.2, %v526_v25 }
 0x38c   :  { %v531_v29 = vsel %vm527_vm3, %v525_v24, %v529_v27  ;;  %v532_v30 = vsel %vm528_vm4, %v526_v25, %v530_v28  ;;  %v4948_v27 = vld [vmem:[#allocation7] sm:$0xff]  ;;  %v4950_v28 = vld [vmem:[#allocation7 + $0x8] sm:$0xff] }
 0x38d   :  { %v535_v31 = vsel %vm533_vm2, %v531_v29, -1e+30  ;;  %v536_v33 = vsel %vm534_vm6, %v532_v30, -1e+30  ;;  %vm894_vm10 = vcmp.ne.f32.partialorder %v4948_v27, 0.0  ;;  %vm895_vm11 = vcmp.ne.f32.partialorder %v4950_v28, 0.0 }
 0x38e   :  { %v538_v32 = vsel %vm537_vm5, %v535_v31, -inf  ;;  %v541_v34 = vsel %vm537_vm5, %v536_v33, -inf  ;;  %v2825_v28 = vld [vmem:[#allocation31] sm:$0xff] }
 0x38f   :  { %539 = vmax.xlane.f32.xlu1 %v538_v32 }
 0x393   :  { %542 = vmax.xlane.f32.xlu1 %v541_v34 }
 0x41c   :  { %v540_v40 = vpop.xlane.xlu1 %539 }
 0x41d   :  { %v544_v41 = vsub.f32 %v535_v31, %v540_v40 }
 0x41f   :  { %v546_v42 = vmul.f32 1.442695, %v544_v41 }
 0x420   :  { %v543_v43 = vpop.xlane.xlu1 %542 }
 0x421   :  { %3984 = vpow2.f32 %v546_v42  ;;  %v545_v44 = vsub.f32 %v536_v33, %v543_v43 }
 0x423   :  { %v548_v45 = vmul.f32 1.442695, %v545_v44 }
 0x425   :  { %3986 = vpow2.f32 %v548_v45 }
 0x42b   :  { %v3985_v46 = vpop.eup %3984 }
 0x42c   :  { %v550_v47 = vsel %vm533_vm2, %v3985_v46, 0.0 }
 0x42d   :  { %v552_v48 = vsel %vm537_vm5, %v550_v47, 0.0 }
 0x42e   :  { %553 = vadd.xlane.f32.xlu1 %v552_v48 }
 0x42f   :  { %v3987_v49 = vpop.eup %3986 }
 0x430   :  { %v551_v50 = vsel %vm534_vm6, %v3987_v49, 0.0  ;;  %vm1403_vm6 = vcmask 64512  }
 0x431   :  { %v555_v51 = vsel %vm537_vm5, %v551_v50, 0.0 }
 0x432   :  { %556 = vadd.xlane.f32.xlu1 %v555_v51 }
 0x436   :  { %832 = vadd.xlane.f32.xlu1 %v829_v56 }
 0x43a   :  { %834 = vadd.xlane.f32.xlu1 %v830_v60 }
 0x43e   :  { %836 = vadd.xlane.f32.xlu1 %v831_v63 }
 0x4bb   :  { %v554_v0 = vpop.xlane.xlu1 %553 }
 0x4bc   :  { %v558_v3 = vmax.f32 %v554_v0, 1e-30 }
 0x4be   :  { %3988 = vrcp.f32 %v558_v3 }
 0x4bf   :  { %v557_v7 = vpop.xlane.xlu1 %556 }
 0x4c0   :  { %v559_v8 = vmax.f32 %v557_v7, 1e-30 }
 0x4c2   :  { %3990 = vrcp.f32 %v559_v8 }
 0x4c8   :  { %v3989_v9 = vpop.eup %3988 }
 0x4c9   :  { %v561_v10 = vmul.f32 %v3989_v9, %v550_v47 }
 0x4cb   :  { %3597 = vmatprep.mubr.msk.f32.mxu1 %vm537_vm5, %v561_v10 }
 0x4cc   :  { %v3991_v11 = vpop.eup %3990 }
 0x4cd   :  { %v563_v12 = vmul.f32 %v3991_v11, %v551_v50 }
 0x4cf   :  { %3598 = vmatmul.mubr.msk.f32.vlgmr.msra.gmra.mrb[2].mxu1 %vm537_vm5, %v563_v12 }
 0x4d0   :  { %3612 = vmatpush3.msk.msra.mxu1 %vm390_vm0, %v648_v52  ;;  %3613 = vmatprep.mubr.msk.f32.mxu1 %vm383_vm1, %v4877_v1  ;;  %vm1164_vm0 = vcmask 39936  }
 0x4d1   :  { %3719 = vmatprep.subr.bf16.mxu1 %v4610_v13 }
 0x4d3   :  { %3614 = vmatmul.mubr.msk.f32.vlgmr.msra.gmra.mrb[4].mxu1 %vm383_vm1, %v4880_v2  ;;  %v833_v2 = vpop.xlane.xlu1 %832 }
 0x4d4   :  { %3620 = vmatprep.mubr.msk.f32.mxu1 %vm4609_vm8, %v4608_v37 }
 0x4d7   :  { %v835_v21 = vpop.xlane.xlu1 %834 }
 0x4db   :  { %v837_v22 = vpop.xlane.xlu1 %836 }
 0x5a2   :  { %v4942_v14 = vpop.f32.mrb[2].mxu1 }
 0x5a3   :  { %v4944_v15 = vpop.f32.mrb[3].mxu1 }
 0x5a6   :  { %v3615_v17 = vpop.f32.mrb[4].mxu1 }
 0x5a7   :  { %v814_v18 = vpop.f32.mrb[5].mxu1  ;;  %v845_v19 = vmul.f32 %v3615_v17, %v3501_v16 }
 0x5a8   :  { %v3720_v20 = vpack.c.bf16 %v3615_v17, %v814_v18  ;;  %v844_v1 = vmul.f32 %v3501_v16, %v814_v18 }
 0x5a9   :  { %848 = vadd.xlane.f32.xlu1 %v845_v19 }
 0x5aa   :  { %3721 = vmatpush3.bf16.msra.mxu1 %v3720_v20 }
 0x5ab   :  { %3643 = vmatprep.subr.mxu1 %v4608_v37 }
 0x5ad   :  { %846 = vadd.xlane.f32.xlu1 %v844_v1 }
 0x5e0   :  { %850 = vxpose.xlu1.b32.start [1/3] (short) (narrow) %v833_v2, 8 }
 0x5e4   :  { %851 = vxpose.xlu1.b32.cont [2/3] (short) (narrow) %v835_v21, 8 }
 0x5e8   :  { %852 = vxpose.xlu1.b32.end [3/3] (short) (narrow) %v837_v22, 8 }
 0x636   :  { %v849_v23 = vpop.xlane.xlu1 %848 }
 0x63a   :  { %v847_v24 = vpop.xlane.xlu1 %846 }
 0x660   :  { %v866_v25 = vpop.trf.xlu1 }
 0x661   :  { %v885_v26 = vrot.slane %v866_v25, %v4891_v5 }
 0x663   :  { %v886_v29 = vadd.f32 %v885_v26, %v847_v24  ;;  %v887_v30 = vadd.f32 %v885_v26, %v849_v23 }
 0x665   :  { %v890_v31 = vmul.f32 0.2, %v886_v29  ;;  %v891_v32 = vmul.f32 0.2, %v887_v30  ;;  %vm888_vm12 = vcmp.ge.f32.partialorder %v886_v29, 0.0  ;;  %vm889_vm13 = vcmp.ge.f32.partialorder %v887_v30, 0.0 }
 0x667   :  { %v892_v33 = vsel %vm888_vm12, %v886_v29, %v890_v31  ;;  %v893_v34 = vsel %vm889_vm13, %v887_v30, %v891_v32 }
 0x668   :  { %v896_v35 = vsel %vm894_vm10, %v892_v33, -1e+30  ;;  %v897_v40 = vsel %vm895_vm11, %v893_v34, -1e+30 }
 0x669   :  { %v899_v41 = vsel %vm898_vm14, %v896_v35, -inf  ;;  %v900_v42 = vsel %vm898_vm14, %v897_v40, -inf }
 0x66a   :  { %1053 = vmax.xlane.f32.xlu0 %v899_v41  ;;  %v901_v43 = vmax.f32 %v899_v41, %v900_v42  ;;  %v1161_v41 = vld [vmem:[#allocation19] sm:$0x3f] }
 0x66c   :  { %v902_v44 = vrot.slane %v901_v43, 4 }
 0x66e   :  { %1055 = vmax.xlane.f32.xlu0 %v900_v42  ;;  %v903_v45 = vmax.f32 %v901_v43, %v902_v44 }
 0x670   :  { %v904_v46 = vrot.slane %v903_v45, 2 }
 0x672   :  { %v905_v47 = vmax.f32 %v903_v45, %v904_v46  ;;  %v646_v46 = vmax.f32 %v4942_v14, 0.0 }
 0x674   :  { %v906_v48 = vrot.slane %v905_v47, 1 }
 0x676   :  { %v907_v49 = vmax.f32 %v905_v47, %v906_v48 }
 0x678   :  { %v908_v50 = vsub.f32 %v896_v35, %v907_v49  ;;  %v909_v51 = vsub.f32 %v897_v40, %v907_v49 }
 0x67a   :  { %v910_v52 = vmul.f32 1.442695, %v908_v50  ;;  %v912_v53 = vmul.f32 1.442695, %v909_v51  ;;  %v3513_v50 = vld [vmem:[#allocation20] ss:$0 sm:$0xff] }
 0x67c   :  { %3992 = vpow2.f32 %v910_v52 }
 0x67d   :  { %3994 = vpow2.f32 %v912_v53 }
 0x686   :  { %v3993_v60 = vpop.eup %3992 }
 0x687   :  { %v3995_v61 = vpop.eup %3994  ;;  %v914_v62 = vsel %vm894_vm10, %v3993_v60, 0.0 }
 0x688   :  { %v915_v63 = vsel %vm895_vm11, %v3995_v61, 0.0  ;;  %v916_v8 = vsel %vm898_vm14, %v914_v62, 0.0 }
 0x689   :  { %v917_v9 = vsel %vm898_vm14, %v915_v63, 0.0 }
 0x68a   :  { %v918_v12 = vadd.f32 %v917_v9, %v916_v8 }
 0x68c   :  { %v919_v17 = vrot.slane %v918_v12, 4 }
 0x68e   :  { %v920_v18 = vadd.f32 %v919_v17, %v918_v12 }
 0x690   :  { %v921_v19 = vrot.slane %v920_v18, 2 }
 0x692   :  { %v922_v20 = vadd.f32 %v921_v19, %v920_v18  ;;  %v5020_v19 = vld [vmem:[%s5384_s2 + $0x10] sm:$0xff] }
 0x693   :  { %vm1399_vm1 = vcmp.ne.f32.partialorder %v5020_v19, 0.0 }
 0x694   :  { %v923_v1 = vrot.slane %v922_v20, 1 }
 0x696   :  { %v924_v2 = vadd.f32 %v923_v1, %v922_v20  ;;  %v5023_v20 = vld [vmem:[%s5384_s2] sm:$0xff] }
 0x697   :  { %vm1397_vm2 = vcmp.ne.f32.partialorder %v5023_v20, 0.0 }
 0x698   :  { %v925_v21 = vmax.f32 %v924_v2, 1e-30 }
 0x6f7   :  { %v1054_v54 = vpop.xlane.xlu0 %1053 }
 0x6f8   :  { %v1057_v55 = vsub.f32 %v896_v35, %v1054_v54  ;;  %v1160_v35 = vld [vmem:[#allocation17] sm:$0x1f] }
 0x6fa   :  { %v1059_v56 = vmul.f32 1.442695, %v1057_v55 }
 0x6fb   :  { %v1056_v57 = vpop.xlane.xlu0 %1055 }
 0x6fc   :  { %3996 = vpow2.f32 %v1059_v56  ;;  %v1058_v58 = vsub.f32 %v897_v40, %v1056_v57  ;;  %v369_v40 = vld [vmem:[%s5383_s1] sm:$0xff] }
 0x6fe   :  { %v1061_v59 = vmul.f32 1.442695, %v1058_v58  ;;  %v3514_v58 = vld [vmem:[#allocation22] ss:$0 sm:$0xff] }
 0x700   :  { %3998 = vpow2.f32 %v1061_v59 }
 0x701   :  { %4000 = vrcp.f32 %v925_v21 }
 0x706   :  { %v3997_v0 = vpop.eup %3996 }
 0x707   :  { %v1063_v3 = vsel %vm894_vm10, %v3997_v0, 0.0 }
 0x708   :  { %v1065_v7 = vsel %vm898_vm14, %v1063_v3, 0.0 }
 0x709   :  { %1066 = vadd.xlane.f32.xlu1 %v1065_v7 }
 0x70a   :  { %v3999_v10 = vpop.eup %3998 }
 0x70b   :  { %v1064_v11 = vsel %vm895_vm11, %v3999_v10, 0.0  ;;  %v4001_v22 = vpop.eup %4000 }
 0x70c   :  { %v1068_v16 = vsel %vm898_vm14, %v1064_v11, 0.0  ;;  %v927_v23 = vmul.f32 %v4001_v22, %v914_v62  ;;  %v928_v24 = vmul.f32 %v4001_v22, %v915_v63  ;;  %v5026_v22 = vld [vmem:[%s5384_s2 + $0x8] sm:$0xff] }
 0x70d   :  { %1069 = vadd.xlane.f32.xlu0 %v1068_v16 }
 0x73a   :  { %929 = vxpose.xlu0.b32.start [1/2] (short) (narrow) %v927_v23, 24 }
 0x73e   :  { %930 = vxpose.xlu0.b32.end [2/2] (short) (narrow) %v928_v24, 24 }
 0x796   :  { %v1067_v25 = vpop.xlane.xlu1 %1066 }
 0x797   :  { %v1071_v26 = vmax.f32 %v1067_v25, 1e-30 }
 0x799   :  { %4002 = vrcp.f32 %v1071_v26 }
 0x79a   :  { %v1070_v29 = vpop.xlane.xlu0 %1069 }
 0x79b   :  { %v1072_v30 = vmax.f32 %v1070_v29, 1e-30 }
 0x79d   :  { %4004 = vrcp.f32 %v1072_v30 }
 0x7a3   :  { %v4003_v31 = vpop.eup %4002 }
 0x7a4   :  { %v1074_v32 = vmul.f32 %v4003_v31, %v1063_v3 }
 0x7a6   :  { %3635 = vmatprep.mubr.msk.f32.mxu0 %vm898_vm14, %v1074_v32 }
 0x7a7   :  { %v4005_v33 = vpop.eup %4004 }
 0x7a8   :  { %v1076_v34 = vmul.f32 %v4005_v33, %v1064_v11 }
 0x7aa   :  { %3636 = vmatmul.mubr.msk.f32.vlgmr.msra.gmra.mrb[6].mxu0 %vm898_vm14, %v1076_v34 }
 0x7ab   :  { %3639 = vmatpush3.msk.msra.mxu0 %vm1168_vm15, %v1160_v35  ;;  %3640 = vmatprep.mubr.msk.f32.mxu0 %vm4609_vm8, %v4608_v37 }
 0x7ac   :  { %3726 = vmatprep.subr.bf16.mxu0 %v4610_v13 }
 0x7ae   :  { %3641 = vmatmul.mubr.msk.f32.vlgmr.msra.gmra.mrb[8].mxu0 %vm1164_vm0, %v369_v40 }
 0x7af   :  { %3660 = vmatprep.mubr.msk.f32.mxu0 %vm4609_vm8, %v4608_v37 }
 0x7ba   :  { %v945_v42 = vpop.trf.xlu0 }
 0x7bb   :  { %3621 = vmatmul.mubr.msk.f32.vlgmr.msra.gmra.mrb[6].mxu1 %vm537_vm5, %v945_v42 }
 0x7bc   :  { %3623 = vmatprep.mubr.msk.f32.mxu1 %vm4609_vm8, %v4608_v37  ;;  %3644 = vmatpush3.msk.msra.mxu1 %vm661_vm7, %v1161_v41 }
 0x7be   :  { %v946_v43 = vpop.trf.xlu0 }
 0x7bf   :  { %3624 = vmatmul.mubr.msk.f32.gmra.mrb[8].mxu1 %vm537_vm5, %v946_v43 }
 0x7c0   :  { %3626 = vmatprep.mubr.msk.f32.mxu1 %vm4609_vm8, %v4608_v37 }
 0x7c2   :  { %v947_v44 = vpop.trf.xlu0 }
 0x7c3   :  { %3627 = vmatmul.mubr.msk.f32.gmra.mrb[10].mxu1 %vm537_vm5, %v947_v44 }
 0x7c4   :  { %3645 = vmatprep.mubr.msk.f32.mxu1 %vm4609_vm8, %v4608_v37 }
 0x7c7   :  { %3646 = vmatmul.mubr.msk.f32.vlgmr.msra.gmra.mrb[12].mxu1 %vm651_vm9, %v4904_v36  ;;  %v645_v36 = vmax.f32 %v4944_v15, 0.0 }
 0x7c8   :  { %3648 = vmatprep.mubr.msk.f32.mxu1 %vm4609_vm8, %v4608_v37 }
 0x7cb   :  { %3649 = vmatmul.mubr.msk.f32.gmra.mrb[14].mxu1 %vm651_vm9, %v4915_v38 }
 0x7cc   :  { %3651 = vmatprep.mubr.msk.f32.mxu1 %vm4609_vm8, %v4608_v37 }
 0x7cf   :  { %3652 = vmatmul.mubr.msk.f32.gmra.mrb[16].mxu1 %vm651_vm9, %v4922_v39  ;;  %vm1398_vm9 = vcmp.ne.f32.partialorder %v5026_v22, 0.0 }
 0x7d0   :  { %1785 = vmatprep.mubr.f32.mxu1 %v4608_v37 }
 0x87d   :  { %v3637_v45 = vpop.f32.mrb[6].mxu0 }
 0x87e   :  { %v1159_v47 = vmax.f32 %v3637_v45, 0.0  ;;  %v1149_v48 = vpop.f32.mrb[7].mxu0 }
 0x87f   :  { %v1158_v49 = vmax.f32 %v1149_v48, 0.0 }
 0x880   :  { %v5003_v51 = vadd.f32 %v1159_v47, %v646_v46 }
 0x881   :  { %v5005_v38 = vadd.f32 %v1158_v49, %v645_v36  ;;  %v5007_v52 = vpop.f32.mrb[8].mxu0 }
 0x882   :  { %v3642_v53 = vpop.f32.mrb[9].mxu0  ;;  %v1331_v39 = vmul.f32 %v3513_v50, %v5007_v52 }
 0x884   :  { %1332 = vadd.xlane.f32.xlu1 %v1331_v39 }
 0x88e   :  { %v5010_v54 = vpop.f32.mrb[6].mxu1 }
 0x88f   :  { %v3622_v55 = vpop.f32.mrb[7].mxu1 }
 0x892   :  { %v5012_v14 = vpop.f32.mrb[8].mxu1 }
 0x893   :  { %v3625_v56 = vpop.f32.mrb[9].mxu1 }
 0x896   :  { %v5014_v57 = vpop.f32.mrb[10].mxu1 }
 0x897   :  { %v3628_v15 = vpop.f32.mrb[11].mxu1 }
 0x89a   :  { %v1311_v59 = vpop.f32.mrb[12].mxu1 }
 0x89b   :  { %v3647_v60 = vpop.f32.mrb[13].mxu1  ;;  %v1340_v61 = vmul.f32 %v3514_v58, %v1311_v59 }
 0x89d   :  { %1343 = vadd.xlane.f32.xlu1 %v1340_v61 }
 0x89e   :  { %v1316_v62 = vpop.f32.mrb[14].mxu1 }
 0x89f   :  { %v3727_v63 = vpack.c.bf16 %v1316_v62, %v1311_v59  ;;  %v3650_v0 = vpop.f32.mrb[15].mxu1  ;;  %v1341_v3 = vmul.f32 %v3514_v58, %v1316_v62 }
 0x8a1   :  { %3728 = vmatpush3.bf16.msra.mxu0 %v3727_v63  ;;  %1345 = vadd.xlane.f32.xlu1 %v1341_v3 }
 0x8a2   :  { %v1321_v7 = vpop.f32.mrb[16].mxu1  ;;  %3658 = vmatprep.subr.mxu0 %v4608_v37 }
 0x8a3   :  { %v3653_v8 = vpop.f32.mrb[17].mxu1  ;;  %v1342_v9 = vmul.f32 %v3514_v58, %v1321_v7 }
 0x8a5   :  { %3659 = vmatpush3.msra.mxu0 %v1321_v7  ;;  %1347 = vadd.xlane.f32.xlu1 %v1342_v9 }
 0x8a6   :  { %3663 = vmatprep.subr.mxu0 %v4608_v37 }
 0x911   :  { %v1333_v10 = vpop.xlane.xlu1 %1332 }
 0x912   :  { %1349 = vxpose.xlu1.b32.start.end [1/1] (short) (narrow) %v1333_v10, 8 }
 0x92a   :  { %v1344_v11 = vpop.xlane.xlu1 %1343 }
 0x92e   :  { %v1346_v12 = vpop.xlane.xlu1 %1345 }
 0x932   :  { %v1348_v16 = vpop.xlane.xlu1 %1347 }
 0x992   :  { %v1365_v17 = vpop.trf.xlu1 }
 0x993   :  { %v1384_v18 = vrot.slane %v1365_v17, %v4891_v5 }
 0x995   :  { %v1385_v1 = vadd.f32 %v1384_v18, %v1344_v11  ;;  %v1386_v2 = vadd.f32 %v1384_v18, %v1346_v12  ;;  %v1387_v21 = vadd.f32 %v1384_v18, %v1348_v16 }
 0x997   :  { %vm1390_vm3 = vcmp.ge.f32.partialorder %v1387_v21, 0.0  ;;  %v1393_v23 = vmul.f32 0.2, %v1387_v21  ;;  %vm1388_vm4 = vcmp.ge.f32.partialorder %v1385_v1, 0.0  ;;  %v1391_v24 = vmul.f32 0.2, %v1385_v1 }
 0x998   :  { %vm1389_vm7 = vcmp.ge.f32.partialorder %v1386_v2, 0.0  ;;  %v1392_v25 = vmul.f32 0.2, %v1386_v2 }
 0x999   :  { %v1396_v26 = vsel %vm1390_vm3, %v1387_v21, %v1393_v23  ;;  %v1394_v29 = vsel %vm1388_vm4, %v1385_v1, %v1391_v24 }
 0x99a   :  { %v1402_v30 = vsel %vm1399_vm1, %v1396_v26, -1e+30  ;;  %v1400_v31 = vsel %vm1397_vm2, %v1394_v29, -1e+30  ;;  %v1395_v32 = vsel %vm1389_vm7, %v1386_v2, %v1392_v25 }
 0x99b   :  { %v1406_v33 = vsel %vm1403_vm6, %v1402_v30, -inf  ;;  %v1404_v34 = vsel %vm1403_vm6, %v1400_v31, -inf  ;;  %v1401_v35 = vsel %vm1398_vm9, %v1395_v32, -1e+30 }
 0x99c   :  { %1553 = vmax.xlane.f32.xlu1 %v1406_v33  ;;  %1549 = vmax.xlane.f32.xlu0 %v1404_v34  ;;  %v1405_v40 = vsel %vm1403_vm6, %v1401_v35, -inf }
 0x99d   :  { %v1407_v41 = vmax.f32 %v1404_v34, %v1405_v40 }
 0x99f   :  { %v1408_v42 = vmax.f32 %v1407_v41, %v1406_v33 }
 0x9a0   :  { %1551 = vmax.xlane.f32.xlu0 %v1405_v40 }
 0x9a1   :  { %v1409_v43 = vrot.slane %v1408_v42, 4 }
 0x9a3   :  { %v1410_v44 = vmax.f32 %v1408_v42, %v1409_v43 }
 0x9a5   :  { %v1411_v45 = vrot.slane %v1410_v44, 2 }
 0x9a7   :  { %v1412_v46 = vmax.f32 %v1410_v44, %v1411_v45 }
 0x9a9   :  { %v1413_v47 = vrot.slane %v1412_v46, 1 }
 0x9ab   :  { %v1414_v48 = vmax.f32 %v1412_v46, %v1413_v47  ;;  %v1689_v47 = vld [vmem:[#allocation23 + $0x8] sm:$0xff] }
 0x9ad   :  { %v1415_v36 = vsub.f32 %v1400_v31, %v1414_v48  ;;  %v1416_v49 = vsub.f32 %v1401_v35, %v1414_v48  ;;  %v1417_v39 = vsub.f32 %v1402_v30, %v1414_v48  ;;  %v1691_v48 = vld [vmem:[#allocation23 + $0x18] sm:$0xff] }
 0x9af   :  { %v1418_v50 = vmul.f32 1.442695, %v1415_v36  ;;  %v1420_v53 = vmul.f32 1.442695, %v1416_v49  ;;  %v1422_v60 = vmul.f32 1.442695, %v1417_v39  ;;  %v3729_v49 = vpack.c.bf16 %v1691_v48, %v1689_v47 }
 0x9b0   :  { %v1688_v36 = vld [vmem:[#allocation23] sm:$0xff]  ;;  %v1695_v39 = vld [vmem:[#allocation23 + $0x38] sm:$0xff]  ;;  %v1710_v47 = vld [vmem:[#allocation23 + $0xb0] sm:$0xff] }
 0x9b1   :  { %4006 = vpow2.f32 %v1418_v50  ;;  %v1690_v50 = vld [vmem:[#allocation23 + $0x10] sm:$0xff]  ;;  %3730 = vmatprep.subr.bf16.mxu1 %v3729_v49  ;;  %v1715_v49 = vld [vmem:[#allocation23 + $0xd8] sm:$0xff] }
 0x9b2   :  { %4008 = vpow2.f32 %v1420_v53  ;;  %v1693_v53 = vld [vmem:[#allocation23 + $0x28] sm:$0xff] }
 0x9bb   :  { %v4007_v3 = vpop.eup %4006 }
 0x9bc   :  { %v4009_v7 = vpop.eup %4008  ;;  %v1424_v8 = vsel %vm1397_vm2, %v4007_v3, 0.0  ;;  %v1701_v3 = vld [vmem:[#allocation23 + $0x68] sm:$0xff] }
 0x9bd   :  { %v1425_v9 = vsel %vm1398_vm9, %v4009_v7, 0.0  ;;  %v1427_v17 = vsel %vm1403_vm6, %v1424_v8, 0.0  ;;  %v1703_v7 = vld [vmem:[#allocation23 + $0x78] sm:$0xff] }
 0x9be   :  { %v1428_v18 = vsel %vm1403_vm6, %v1425_v9, 0.0 }
 0x9bf   :  { %v1429_v25 = vadd.f32 %v1428_v18, %v1427_v17  ;;  %v1707_v17 = vld [vmem:[#allocation23 + $0x98] sm:$0xff] }
 0xa29   :  { %v1554_v55 = vpop.xlane.xlu1 %1553  ;;  %v1550_v56 = vpop.xlane.xlu0 %1549 }
 0xa2a   :  { %v1555_v15 = vsub.f32 %v1400_v31, %v1550_v56  ;;  %v1557_v58 = vsub.f32 %v1402_v30, %v1554_v55  ;;  %v3731_v55 = vpack.c.bf16 %v1690_v50, %v1688_v36  ;;  %v3733_v56 = vpack.c.bf16 %v1695_v39, %v1693_v53  ;;  %v1713_v36 = vld [vmem:[#allocation23 + $0xc8] sm:$0xff]  ;;  %v1714_v53 = vld [vmem:[#allocation23 + $0xd0] sm:$0xff] }
 0xa2b   :  { %v3753_v50 = vpack.c.bf16 %v1715_v49, %v1713_v36 }
 0xa2c   :  { %v1558_v59 = vmul.f32 1.442695, %v1555_v15  ;;  %v1562_v63 = vmul.f32 1.442695, %v1557_v58  ;;  %v1692_v15 = vld [vmem:[#allocation23 + $0x20] sm:$0xff]  ;;  %v1694_v58 = vld [vmem:[#allocation23 + $0x30] sm:$0xff]  ;;  %3732 = vmatpush1.bf16.msra.mxu1 %v3731_v55 }
 0xa2d   :  { %v1552_v61 = vpop.xlane.xlu0 %1551  ;;  %3734 = vmatprep.subr.bf16.mxu1 %v3733_v56  ;;  %v1717_v55 = vld [vmem:[#allocation23 + $0xe8] sm:$0xff]  ;;  %v1719_v56 = vld [vmem:[#allocation23 + $0xf8] sm:$0xff] }
 0xa2e   :  { %v1556_v62 = vsub.f32 %v1401_v35, %v1552_v61  ;;  %4010 = vpow2.f32 %v1558_v59  ;;  %v1697_v59 = vld [vmem:[#allocation23 + $0x48] sm:$0xff]  ;;  %v3735_v61 = vpack.c.bf16 %v1694_v58, %v1692_v15  ;;  %v3757_v15 = vpack.c.bf16 %v1719_v56, %v1717_v55  ;;  %v1718_v58 = vld [vmem:[#allocation23 + $0xf0] sm:$0xff] }
 0xa2f   :  { %4012 = vpow2.f32 %v1422_v60  ;;  %v1699_v60 = vld [vmem:[#allocation23 + $0x58] sm:$0xff] }
 0xa30   :  { %v1560_v0 = vmul.f32 1.442695, %v1556_v62  ;;  %v3737_v62 = vpack.c.bf16 %v1699_v60, %v1697_v59  ;;  %3736 = vmatpush1.bf16.msra.mxu1 %v3735_v61 }
 0xa32   :  { %4014 = vpow2.f32 %v1560_v0  ;;  %v1698_v0 = vld [vmem:[#allocation23 + $0x50] sm:$0xff]  ;;  %3738 = vmatprep.subr.bf16.mxu1 %v3737_v62 }
 0xa33   :  { %4016 = vpow2.f32 %v1562_v63  ;;  %v1696_v63 = vld [vmem:[#allocation23 + $0x40] sm:$0xff] }
 0xa38   :  { %v4011_v10 = vpop.eup %4010 }
 0xa39   :  { %v5046_v11 = vsel %vm1397_vm2, %v4011_v10, 0.0  ;;  %v4013_v12 = vpop.eup %4012  ;;  %v1700_v10 = vld [vmem:[#allocation23 + $0x60] sm:$0xff] }
 0xa3a   :  { %v1567_v16 = vsel %vm1403_vm6, %v5046_v11, 0.0  ;;  %v1426_v24 = vsel %vm1399_vm1, %v4013_v12, 0.0  ;;  %v1702_v12 = vld [vmem:[#allocation23 + $0x70] sm:$0xff] }
 0xa3b   :  { %1568 = vadd.xlane.f32.xlu0 %v1567_v16  ;;  %v1430_v29 = vsel %vm1403_vm6, %v1426_v24, 0.0  ;;  %v1705_v16 = vld [vmem:[#allocation23 + $0x88] sm:$0xff]  ;;  %v3743_v18 = vpack.c.bf16 %v1702_v12, %v1700_v10 }
 0xa3c   :  { %v4015_v1 = vpop.eup %4014  ;;  %v1431_v30 = vadd.f32 %v1430_v29, %v1429_v25  ;;  %v1711_v25 = vld [vmem:[#allocation23 + $0xb8] sm:$0xff] }
 0xa3d   :  { %v4017_v2 = vpop.eup %4016  ;;  %v5054_v21 = vsel %vm1398_vm9, %v4015_v1, 0.0  ;;  %v3745_v1 = vpack.c.bf16 %v1707_v17, %v1705_v16 }
 0xa3e   :  { %v1570_v23 = vsel %vm1403_vm6, %v5054_v21, 0.0  ;;  %v5062_v26 = vsel %vm1399_vm1, %v4017_v2, 0.0  ;;  %v1432_v32 = vrot.slane %v1431_v30, 4  ;;  %v1704_v2 = vld [vmem:[#allocation23 + $0x80] sm:$0xff] }
 0xa3f   :  { %1571 = vadd.xlane.f32.xlu0 %v1570_v23  ;;  %v1573_v31 = vsel %vm1403_vm6, %v5062_v26, 0.0  ;;  %v1706_v23 = vld [vmem:[#allocation23 + $0x90] sm:$0xff] }
 0xa40   :  { %v1433_v33 = vadd.f32 %v1432_v32, %v1431_v30  ;;  %v3747_v29 = vpack.c.bf16 %v1706_v23, %v1704_v2 }
 0xa42   :  { %v1434_v34 = vrot.slane %v1433_v33, 2 }
 0xa43   :  { %1574 = vadd.xlane.f32.xlu0 %v1573_v31 }
 0xa44   :  { %v1435_v35 = vadd.f32 %v1434_v34, %v1433_v33 }
 0xa46   :  { %v1436_v40 = vrot.slane %v1435_v35, 1 }
 0xa48   :  { %v1437_v41 = vadd.f32 %v1436_v40, %v1435_v35 }
 0xa4a   :  { %v1438_v42 = vmax.f32 %v1437_v41, 1e-30 }
 0xa4c   :  { %4018 = vrcp.f32 %v1438_v42 }
 0xa56   :  { %v4019_v43 = vpop.eup %4018 }
 0xa57   :  { %v1440_v44 = vmul.f32 %v4019_v43, %v1424_v8  ;;  %v1441_v45 = vmul.f32 %v4019_v43, %v1425_v9  ;;  %v1442_v46 = vmul.f32 %v4019_v43, %v1426_v24  ;;  %v3739_v8 = vpack.c.bf16 %v1698_v0, %v1696_v63  ;;  %v1709_v24 = vld [vmem:[#allocation23 + $0xa8] sm:$0xff] }
 0xa58   :  { %v3741_v9 = vpack.c.bf16 %v1703_v7, %v1701_v3  ;;  %v3749_v30 = vpack.c.bf16 %v1711_v25, %v1709_v24  ;;  %v1050_v63 = vmax.f32 %v5010_v54, 0.0  ;;  %v1720_v25 = vld [vmem:[#allocation25] sm:$0xf] }
 0xa59   :  { %3740 = vmatpush1.bf16.msra.mxu1 %v3739_v8 }
 0xa5a   :  { %3742 = vmatprep.subr.bf16.mxu1 %v3741_v9  ;;  %v1051_v9 = vmax.f32 %v5012_v14, 0.0 }
 0xa5d   :  { %3744 = vmatpush1.bf16.msra.mxu1 %v3743_v18 }
 0xa5e   :  { %3746 = vmatprep.subr.bf16.mxu1 %v3745_v1  ;;  %v1052_v1 = vmax.f32 %v5014_v57, 0.0  ;;  %v1811_v57 = vsub.s32 2, %v4888_v4 }
 0xa61   :  { %3748 = vmatpush1.bf16.msra.mxu1 %v3747_v29  ;;  %v1844_v29 = vsub.s32 3, %v4888_v4 }
 0xa62   :  { %3750 = vmatprep.subr.bf16.mxu1 %v3749_v30  ;;  %v1841_v30 = vrot.slane %v1720_v25, %v4894_v6 }
 0xa70   :  { %1443 = vxpose.xlu0.b32.start [1/3] (short) (narrow) %v1440_v44, 8 }
 0xa74   :  { %1444 = vxpose.xlu0.b32.cont [2/3] (short) (narrow) %v1441_v45, 8 }
 0xa78   :  { %1445 = vxpose.xlu0.b32.end [3/3] (short) (narrow) %v1442_v46, 8 }
 0xac8   :  { %v1569_v31 = vpop.xlane.xlu0 %1568 }
 0xac9   :  { %v1576_v33 = vmax.f32 %v1569_v31, 1e-30  ;;  %v1808_v31 = vrot.slane %v1720_v25, %v4891_v5 }
 0xacb   :  { %4020 = vrcp.f32 %v1576_v33  ;;  %v1812_v33 = vrot.slane %v1720_v25, %v1811_v57 }
 0xacc   :  { %v1572_v32 = vpop.xlane.xlu0 %1571 }
 0xacd   :  { %v1577_v34 = vmax.f32 %v1572_v32, 1e-30  ;;  %v1845_v32 = vrot.slane %v1720_v25, %v1844_v29 }
 0xacf   :  { %4022 = vrcp.f32 %v1577_v34  ;;  %v1851_v34 = vrot.slane %v1841_v30, %v4894_v6  ;;  %v373_v30 = vld [vmem:[%s5385_s30 + $0x8] sm:$0xff] }
 0xad0   :  { %v1575_v35 = vpop.xlane.xlu0 %1574  ;;  %vm1920_vm0 = vcmp.ne.f32.partialorder %v373_v30, 0.0 }
 0xad1   :  { %v1578_v40 = vmax.f32 %v1575_v35, 1e-30  ;;  %v1818_v35 = vrot.slane %v1808_v31, %v4891_v5 }
 0xad3   :  { %4024 = vrcp.f32 %v1578_v40  ;;  %v1855_v40 = vrot.slane %v1845_v32, %v4894_v6 }
 0xad5   :  { %v4021_v41 = vpop.eup %4020 }
 0xad6   :  { %v1580_v43 = vmul.f32 %v4021_v41, %v5046_v11  ;;  %v1708_v11 = vld [vmem:[#allocation23 + $0xa0] sm:$0xff]  ;;  %v1822_v41 = vrot.slane %v1812_v33, %v4891_v5 }
 0xad7   :  { %v3751_v48 = vpack.c.bf16 %v1710_v47, %v1708_v11 }
 0xad9   :  { %v4023_v44 = vpop.eup %4022  ;;  %3752 = vmatpush1.bf16.msra.mxu1 %v3751_v48 }
 0xada   :  { %v1582_v45 = vmul.f32 %v4023_v44, %v5054_v21  ;;  %v1712_v21 = vld [vmem:[#allocation23 + $0xc0] sm:$0xff]  ;;  %3754 = vmatprep.subr.bf16.mxu1 %v3753_v50 }
 0xadb   :  { %v3755_v39 = vpack.c.bf16 %v1714_v53, %v1712_v21 }
 0xadd   :  { %v4025_v46 = vpop.eup %4024  ;;  %3756 = vmatpush1.bf16.msra.mxu1 %v3755_v39 }
 0xade   :  { %3758 = vmatprep.subr.bf16.mxu1 %v3757_v15 }
 0xaf0   :  { %v1459_v42 = vpop.trf.xlu0 }
 0xaf1   :  { %3661 = vmatmul.mubr.msk.f32.vlgmr.msra.gmra.mrb[10].mxu0 %vm898_vm14, %v1459_v42 }
 0xaf2   :  { %3664 = vmatpush3.msra.mxu0 %v5007_v52  ;;  %3665 = vmatprep.mubr.msk.f32.mxu0 %vm4609_vm8, %v4608_v37  ;;  %v1584_v52 = vmul.f32 %v4025_v46, %v5062_v26  ;;  %v1716_v26 = vld [vmem:[#allocation23 + $0xe0] sm:$0xff] }
 0xaf3   :  { %v3759_v59 = vpack.c.bf16 %v1718_v58, %v1716_v26 }
 0xaf5   :  { %3666 = vmatmul.mubr.msk.f32.vlgmr.msra.gmra.mrb[12].mxu0 %vm1403_vm6, %v1580_v43  ;;  %3760 = vmatpush1.bf16.msra.mxu1 %v3759_v59 }
 0xaf6   :  { %3668 = vmatprep.mubr.msk.f32.mxu0 %vm4609_vm8, %v4608_v37 }
 0xaf9   :  { %3669 = vmatmul.mubr.msk.f32.gmra.mrb[14].mxu0 %vm1403_vm6, %v1582_v45 }
 0xafa   :  { %3671 = vmatprep.mubr.msk.f32.mxu0 %vm4609_vm8, %v4608_v37 }
 0xafd   :  { %3672 = vmatmul.mubr.msk.f32.gmra.mrb[16].mxu0 %vm1403_vm6, %v1584_v52 }
 0xafe   :  { %2037 = vmatprep.mubr.f32.mxu0 %v4608_v37 }
 0xbc4   :  { %v5082_v60 = vpop.f32.mrb[10].mxu0 }
 0xbc5   :  { %v3662_v61 = vpop.f32.mrb[11].mxu0 }
 0xbc8   :  { %v1660_v62 = vpop.f32.mrb[12].mxu0 }
 0xbc9   :  { %v1674_v0 = vmax.f32 %v1660_v62, 0.0  ;;  %v3667_v3 = vpop.f32.mrb[13].mxu0 }
 0xbcb   :  { %v1681_v7 = vadd.f32 %v1674_v0, %v1050_v63 }
 0xbcc   :  { %v1665_v8 = vpop.f32.mrb[14].mxu0 }
 0xbcd   :  { %v5086_v10 = vmax.f32 %v1681_v7, 0.0  ;;  %v1675_v12 = vmax.f32 %v1665_v8, 0.0  ;;  %v3670_v16 = vpop.f32.mrb[15].mxu0 }
 0xbcf   :  { %v1682_v17 = vadd.f32 %v1675_v12, %v1051_v9  ;;  %1786 = vmatmul.mubr.f32.vlgmr.msra.gmra.mrb[18].mxu1 %v5086_v10 }
 0xbd0   :  { %v1670_v18 = vpop.f32.mrb[16].mxu0  ;;  %1791 = vmatprep.mubr.f32.mxu1 %v4608_v37 }
 0xbd1   :  { %v5091_v2 = vmax.f32 %v1682_v17, 0.0  ;;  %v1676_v54 = vmax.f32 %v1670_v18, 0.0  ;;  %v3673_v23 = vpop.f32.mrb[17].mxu0 }
 0xbd3   :  { %v1683_v24 = vadd.f32 %v1676_v54, %v1052_v1  ;;  %1792 = vmatmul.mubr.f32.gmra.mrb[20].mxu1 %v5091_v2  ;;  %v372_v54 = vld [vmem:[%s5385_s30] sm:$0xff] }
 0xbd4   :  { %1797 = vmatprep.mubr.f32.mxu1 %v4608_v37  ;;  %vm1919_vm12 = vcmp.ne.f32.partialorder %v372_v54, 0.0  ;;  %v2064_v54 = vld [vmem:[#allocation26 + $0x10] sm:$0xff] }
 0xbd5   :  { %v5095_v14 = vmax.f32 %v1683_v24, 0.0 }
 0xbd7   :  { %1798 = vmatmul.mubr.f32.gmra.mrb[22].mxu1 %v5095_v14 }
 0xbd8   :  { %2335 = vmatprep.mubr.f32.mxu1 %v4608_v37 }
 0xca2   :  { %v1787_v42 = vpop.f32.mrb[18].mxu1 }
 0xca3   :  { %v1789_v43 = vpop.f32.mrb[19].mxu1  ;;  %v1856_v44 = vmul.f32 %v1851_v34, %v1787_v42  ;;  %v1823_v45 = vmul.f32 %v1818_v35, %v1787_v42 }
 0xca4   :  { %v1857_v46 = vmul.f32 %v1855_v40, %v1789_v43  ;;  %v1824_v52 = vmul.f32 %v1822_v41, %v1789_v43 }
 0xca6   :  { %v1793_v11 = vpop.f32.mrb[20].mxu1  ;;  %v1862_v47 = vadd.f32 %v1857_v46, %v1856_v44  ;;  %v1829_v48 = vadd.f32 %v1824_v52, %v1823_v45 }
 0xca7   :  { %v3763_v36 = vpack.c.bf16 %v1793_v11, %v1787_v42  ;;  %v1795_v49 = vpop.f32.mrb[21].mxu1  ;;  %v1858_v50 = vmul.f32 %v1851_v34, %v1793_v11  ;;  %v1825_v21 = vmul.f32 %v1818_v35, %v1793_v11 }
 0xca8   :  { %v3761_v53 = vpack.c.bf16 %v1795_v49, %v1789_v43  ;;  %1863 = vadd.xlane.f32.xlu1 %v1862_v47  ;;  %v1859_v39 = vmul.f32 %v1855_v40, %v1795_v49  ;;  %v1826_v55 = vmul.f32 %v1822_v41, %v1795_v49 }
 0xcaa   :  { %v1799_v56 = vpop.f32.mrb[22].mxu1  ;;  %3762 = vmatprep.subr.bf16.mxu0 %v3761_v53  ;;  %v1865_v15 = vadd.f32 %v1859_v39, %v1858_v50  ;;  %v1832_v26 = vadd.f32 %v1826_v55, %v1825_v21 }
 0xcab   :  { %v1801_v58 = vpop.f32.mrb[23].mxu1  ;;  %3764 = vmatpush1.bf16.msra.mxu0 %v3763_v36  ;;  %v1860_v59 = vmul.f32 %v1851_v34, %v1799_v56  ;;  %v1827_v61 = vmul.f32 %v1818_v35, %v1799_v56 }
 0xcac   :  { %1866 = vadd.xlane.f32.xlu1 %v1865_v15  ;;  %1977 = vmatprep.subr.mxu0 %v1801_v58  ;;  %v1861_v62 = vmul.f32 %v1855_v40, %v1801_v58  ;;  %v1828_v63 = vmul.f32 %v1822_v41, %v1801_v58  ;;  %v374_v41 = vld [vmem:[%s5385_s30 + $0x10] sm:$0xff] }
 0xcad   :  { %vm1921_vm4 = vcmp.ne.f32.partialorder %v374_v41, 0.0 }
 0xcae   :  { %v1868_v0 = vadd.f32 %v1861_v62, %v1860_v59  ;;  %v1835_v3 = vadd.f32 %v1828_v63, %v1827_v61 }
 0xcaf   :  { %1978 = vmatpush1.msra.mxu0 %v1799_v56 }
 0xcb0   :  { %1869 = vadd.xlane.f32.xlu1 %v1868_v0  ;;  %v2063_v0 = vld [vmem:[#allocation26 + $0x8] sm:$0xff] }
 0xcb4   :  { %1830 = vadd.xlane.f32.xlu1 %v1829_v48 }
 0xcb8   :  { %1833 = vadd.xlane.f32.xlu1 %v1832_v26 }
 0xcbc   :  { %1836 = vadd.xlane.f32.xlu1 %v1835_v3  ;;  %v2065_v3 = vld [vmem:[#allocation26 + $0x18] sm:$0xff] }
 0xd35   :  { %v1864_v7 = vpop.xlane.xlu1 %1863 }
 0xd36   :  { %1871 = vxpose.xlu1.b32.start [1/3] (short) (narrow) %v1864_v7, 8  ;;  %v3765_v7 = vpack.c.bf16 %v2065_v3, %v2063_v0  ;;  %v2084_v0 = vld [vmem:[#allocation26 + $0xb0] sm:$0xff]  ;;  %v2087_v3 = vld [vmem:[#allocation26 + $0xc8] sm:$0xff] }
 0xd38   :  { %3766 = vmatprep.subr.bf16.mxu0 %v3765_v7  ;;  %v2089_v7 = vld [vmem:[#allocation26 + $0xd8] sm:$0xff] }
 0xd39   :  { %v1867_v8 = vpop.xlane.xlu1 %1866 }
 0xd3a   :  { %1872 = vxpose.xlu1.b32.cont [2/3] (short) (narrow) %v1867_v8, 8 }
 0xd3d   :  { %v1870_v9 = vpop.xlane.xlu1 %1869 }
 0xd3e   :  { %1873 = vxpose.xlu1.b32.end [3/3] (short) (narrow) %v1870_v9, 8 }
 0xd41   :  { %v1831_v12 = vpop.xlane.xlu1 %1830 }
 0xd45   :  { %v1834_v16 = vpop.xlane.xlu1 %1833 }
 0xd49   :  { %v1837_v17 = vpop.xlane.xlu1 %1836 }
 0xdb6   :  { %v1887_v18 = vpop.trf.xlu1 }
 0xdb7   :  { %v1906_v1 = vrot.slane %v1887_v18, %v4891_v5 }
 0xdb9   :  { %v1907_v23 = vadd.f32 %v1906_v1, %v1831_v12  ;;  %v1908_v24 = vadd.f32 %v1906_v1, %v1834_v16  ;;  %v1909_v25 = vadd.f32 %v1906_v1, %v1837_v17  ;;  %v2062_v1 = vld [vmem:[#allocation26] sm:$0xff] }
 0xdba   :  { %v3767_v30 = vpack.c.bf16 %v2064_v54, %v2062_v1 }
 0xdbb   :  { %vm1910_vm13 = vcmp.ge.f32.partialorder %v1907_v23, 0.0  ;;  %v1913_v31 = vmul.f32 0.2, %v1907_v23  ;;  %vm1911_vm15 = vcmp.ge.f32.partialorder %v1908_v24, 0.0  ;;  %v1914_v32 = vmul.f32 0.2, %v1908_v24 }
 0xdbc   :  { %v1915_v35 = vmul.f32 0.2, %v1909_v25  ;;  %vm1912_vm3 = vcmp.ge.f32.partialorder %v1909_v25, 0.0 }
 0xdbd   :  { %v1916_v33 = vsel %vm1910_vm13, %v1907_v23, %v1913_v31  ;;  %v1917_v34 = vsel %vm1911_vm15, %v1908_v24, %v1914_v32  ;;  %v2067_v23 = vld [vmem:[#allocation26 + $0x28] sm:$0xff]  ;;  %v2069_v24 = vld [vmem:[#allocation26 + $0x38] sm:$0xff] }
 0xdbe   :  { %v1922_v40 = vsel %vm1919_vm12, %v1916_v33, -1e+30  ;;  %v1923_v43 = vsel %vm1920_vm0, %v1917_v34, -1e+30  ;;  %v1918_v44 = vsel %vm1912_vm3, %v1909_v25, %v1915_v35  ;;  %v3769_v32 = vpack.c.bf16 %v2069_v24, %v2067_v23  ;;  %v2066_v33 = vld [vmem:[#allocation26 + $0x20] sm:$0xff]  ;;  %v2068_v34 = vld [vmem:[#allocation26 + $0x30] sm:$0xff] }
 0xdbf   :  { %v1925_v42 = vsel %vm898_vm14, %v1922_v40, -inf  ;;  %v1928_v45 = vsel %vm898_vm14, %v1923_v43, -inf  ;;  %v1924_v46 = vsel %vm1921_vm4, %v1918_v44, -1e+30  ;;  %v2071_v35 = vld [vmem:[#allocation26 + $0x48] sm:$0xff]  ;;  %v2090_v23 = vld [vmem:[#allocation26 + $0xe0] sm:$0xff] }
 0xdc0   :  { %1926 = vmax.xlane.f32.xlu0 %v1925_v42  ;;  %v1931_v52 = vsel %vm898_vm14, %v1924_v46, -inf  ;;  %v3771_v42 = vpack.c.bf16 %v2068_v34, %v2066_v33  ;;  %v2092_v24 = vld [vmem:[#allocation26 + $0xf0] sm:$0xff]  ;;  %v2360_v34 = vld [vmem:[#allocation28] sm:$0xff] }
 0xdc4   :  { %1929 = vmax.xlane.f32.xlu0 %v1928_v45  ;;  %v2070_v45 = vld [vmem:[#allocation26 + $0x40] sm:$0xff] }
 0xdc8   :  { %1932 = vmax.xlane.f32.xlu0 %v1931_v52  ;;  %v2075_v52 = vld [vmem:[#allocation26 + $0x68] sm:$0xff] }
 0xe4d   :  { %v1927_v11 = vpop.xlane.xlu0 %1926 }
 0xe4e   :  { %v1934_v47 = vsub.f32 %v1922_v40, %v1927_v11  ;;  %v2073_v40 = vld [vmem:[#allocation26 + $0x58] sm:$0xff] }
 0xe4f   :  { %v3773_v44 = vpack.c.bf16 %v2073_v40, %v2071_v35  ;;  %v2077_v11 = vld [vmem:[#allocation26 + $0x78] sm:$0xff]  ;;  %v2362_v35 = vld [vmem:[#allocation28 + $0x10] sm:$0xff]  ;;  %v2365_v40 = vld [vmem:[#allocation28 + $0x28] sm:$0xff] }
 0xe50   :  { %v1937_v48 = vmul.f32 1.442695, %v1934_v47 }
 0xe51   :  { %v1930_v36 = vpop.xlane.xlu0 %1929 }
 0xe52   :  { %4026 = vpow2.f32 %v1937_v48  ;;  %v1935_v49 = vsub.f32 %v1923_v43, %v1930_v36 }
 0xe54   :  { %v1939_v50 = vmul.f32 1.442695, %v1935_v49  ;;  %v3777_v49 = vpack.c.bf16 %v2077_v11, %v2075_v52  ;;  %v2369_v52 = vld [vmem:[#allocation28 + $0x48] sm:$0xff]  ;;  %v2371_v11 = vld [vmem:[#allocation28 + $0x58] sm:$0xff] }
 0xe55   :  { %v1933_v21 = vpop.xlane.xlu0 %1932 }
 0xe56   :  { %4028 = vpow2.f32 %v1939_v50  ;;  %v1936_v53 = vsub.f32 %v1924_v46, %v1933_v21  ;;  %v2072_v46 = vld [vmem:[#allocation26 + $0x50] sm:$0xff]  ;;  %v2074_v50 = vld [vmem:[#allocation26 + $0x60] sm:$0xff] }
 0xe57   :  { %v3775_v48 = vpack.c.bf16 %v2072_v46, %v2070_v45  ;;  %v2076_v21 = vld [vmem:[#allocation26 + $0x70] sm:$0xff]  ;;  %v2364_v45 = vld [vmem:[#allocation28 + $0x20] sm:$0xff] }
 0xe58   :  { %v1941_v39 = vmul.f32 1.442695, %v1936_v53  ;;  %v2079_v53 = vld [vmem:[#allocation26 + $0x88] sm:$0xff]  ;;  %v2366_v46 = vld [vmem:[#allocation28 + $0x30] sm:$0xff] }
 0xe5a   :  { %4030 = vpow2.f32 %v1941_v39  ;;  %v2081_v39 = vld [vmem:[#allocation26 + $0x98] sm:$0xff] }
 0xe5c   :  { %v4027_v55 = vpop.eup %4026 }
 0xe5d   :  { %v1943_v56 = vsel %vm1919_vm12, %v4027_v55, 0.0  ;;  %v3779_v55 = vpack.c.bf16 %v2076_v21, %v2074_v50  ;;  %v2375_v50 = vld [vmem:[#allocation28 + $0x78] sm:$0xff] }
 0xe5e   :  { %v1946_v15 = vsel %vm898_vm14, %v1943_v56, 0.0 }
 0xe5f   :  { %1947 = vadd.xlane.f32.xlu0 %v1946_v15  ;;  %v2078_v15 = vld [vmem:[#allocation26 + $0x80] sm:$0xff] }
 0xe60   :  { %v4029_v26 = vpop.eup %4028 }
 0xe61   :  { %v1944_v58 = vsel %vm1920_vm0, %v4029_v26, 0.0  ;;  %v2080_v26 = vld [vmem:[#allocation26 + $0x90] sm:$0xff] }
 0xe62   :  { %v1949_v59 = vsel %vm898_vm14, %v1944_v58, 0.0 }
 0xe63   :  { %1950 = vadd.xlane.f32.xlu1 %v1949_v59  ;;  %v2085_v59 = vld [vmem:[#allocation26 + $0xb8] sm:$0xff] }
 0xe64   :  { %v4031_v61 = vpop.eup %4030 }
 0xe65   :  { %v1945_v62 = vsel %vm1921_vm4, %v4031_v61, 0.0  ;;  %v3783_v61 = vpack.c.bf16 %v2080_v26, %v2078_v15  ;;  %v2379_v15 = vld [vmem:[#allocation28 + $0x98] sm:$0xff] }
 0xe66   :  { %v1952_v63 = vsel %vm898_vm14, %v1945_v62, 0.0 }
 0xe67   :  { %1953 = vadd.xlane.f32.xlu0 %v1952_v63  ;;  %v2082_v63 = vld [vmem:[#allocation26 + $0xa0] sm:$0xff] }
 0xeec   :  { %v1948_v8 = vpop.xlane.xlu0 %1947 }
 0xeed   :  { %v1955_v9 = vmax.f32 %v1948_v8, 1e-30  ;;  %v3787_v8 = vpack.c.bf16 %v2084_v0, %v2082_v63  ;;  %v2383_v63 = vld [vmem:[#allocation28 + $0xb8] sm:$0xff] }
 0xeef   :  { %4032 = vrcp.f32 %v1955_v9  ;;  %v3789_v9 = vpack.c.bf16 %v2089_v7, %v2087_v3  ;;  %v2380_v7 = vld [vmem:[#allocation28 + $0xa0] sm:$0xff] }
 0xef0   :  { %v1951_v12 = vpop.xlane.xlu1 %1950 }
 0xef1   :  { %v1956_v16 = vmax.f32 %v1951_v12, 1e-30  ;;  %v2086_v12 = vld [vmem:[#allocation26 + $0xc0] sm:$0xff] }
 0xef3   :  { %4034 = vrcp.f32 %v1956_v16  ;;  %v2088_v16 = vld [vmem:[#allocation26 + $0xd0] sm:$0xff] }
 0xef4   :  { %v1954_v17 = vpop.xlane.xlu0 %1953  ;;  %v3791_v1 = vpack.c.bf16 %v2088_v16, %v2086_v12  ;;  %v2387_v12 = vld [vmem:[#allocation28 + $0xd8] sm:$0xff] }
 0xef5   :  { %v1957_v18 = vmax.f32 %v1954_v17, 1e-30  ;;  %v2091_v17 = vld [vmem:[#allocation26 + $0xe8] sm:$0xff] }
 0xef7   :  { %4036 = vrcp.f32 %v1957_v18  ;;  %v2093_v18 = vld [vmem:[#allocation26 + $0xf8] sm:$0xff] }
 0xef8   :  { %v3793_v54 = vpack.c.bf16 %v2093_v18, %v2091_v17  ;;  %v2384_v18 = vld [vmem:[#allocation28 + $0xc0] sm:$0xff] }
 0xef9   :  { %v4033_v25 = vpop.eup %4032 }
 0xefa   :  { %v1959_v31 = vmul.f32 %v4033_v25, %v1943_v56  ;;  %v3781_v56 = vpack.c.bf16 %v2081_v39, %v2079_v53  ;;  %v2361_v25 = vld [vmem:[#allocation28 + $0x8] sm:$0xff]  ;;  %v2372_v39 = vld [vmem:[#allocation28 + $0x60] sm:$0xff] }
 0xefc   :  { %3519 = vmatmul.mubr.msk.f32.vlgmr.msra.gmra.mrb[18].mxu0 %vm898_vm14, %v1959_v31  ;;  %v3795_v31 = vpack.c.bf16 %v2092_v24, %v2090_v23  ;;  %v2391_v23 = vld [vmem:[#allocation28 + $0xf8] sm:$0xff] }
 0xefd   :  { %v4035_v41 = vpop.eup %4034  ;;  %3768 = vmatpush1.bf16.msra.mxu0 %v3767_v30  ;;  %2043 = vmatprep.mubr.f32.mxu0 %v4608_v37  ;;  %v2363_v30 = vld [vmem:[#allocation28 + $0x18] sm:$0xff] }
 0xefe   :  { %3770 = vmatprep.subr.bf16.mxu0 %v3769_v32  ;;  %v1961_v43 = vmul.f32 %v4035_v41, %v1944_v58  ;;  %v2083_v58 = vld [vmem:[#allocation26 + $0xa8] sm:$0xff]  ;;  %v1548_v32 = vmax.f32 %v5082_v60, 0.0  ;;  %v3821_v33 = vpack.c.bf16 %v2363_v30, %v2361_v25  ;;  %v2367_v41 = vld [vmem:[#allocation28 + $0x38] sm:$0xff]  ;;  %v3827_v60 = vpack.c.bf16 %v2366_v46, %v2364_v45  ;;  %v2388_v30 = vld [vmem:[#allocation28 + $0xe0] sm:$0xff] }
 0xeff   :  { %v1679_v46 = vmax.f32 %v5005_v38, 0.0 }
 0xf00   :  { %3520 = vmatmul.mubr.msk.f32.gmra.mrb[20].mxu0 %vm898_vm14, %v1961_v43  ;;  %v5134_v43 = vmax.f32 %v1548_v32, 0.0  ;;  %v2794_v32 = vld [vmem:[#allocation29 + $0x8] sm:$0xff] }
 0xf01   :  { %v4037_v47 = vpop.eup %4036  ;;  %3772 = vmatpush1.bf16.msra.mxu0 %v3771_v42  ;;  %2049 = vmatprep.mubr.f32.mxu0 %v4608_v37  ;;  %v3823_v42 = vpack.c.bf16 %v2362_v35, %v2360_v34 }
 0xf02   :  { %3774 = vmatprep.subr.bf16.mxu0 %v3773_v44  ;;  %v1963_v36 = vmul.f32 %v4037_v47, %v1945_v62  ;;  %v3785_v62 = vpack.c.bf16 %v2085_v59, %v2083_v58  ;;  %v3825_v44 = vpack.c.bf16 %v2367_v41, %v2365_v40  ;;  %v3829_v47 = vpack.c.bf16 %v2371_v11, %v2369_v52  ;;  %v2376_v59 = vld [vmem:[#allocation28 + $0x80] sm:$0xff]  ;;  %v2795_v41 = vld [vmem:[#allocation29 + $0x10] sm:$0xff] }
 0xf03   :  { %v2793_v40 = vld [vmem:[#allocation29] sm:$0xff] }
 0xf04   :  { %3521 = vmatmul.mubr.msk.f32.gmra.mrb[22].mxu0 %vm898_vm14, %v1963_v36  ;;  %v2370_v36 = vld [vmem:[#allocation28 + $0x50] sm:$0xff]  ;;  %v3859_v45 = vpack.c.bf16 %v2795_v41, %v2793_v40  ;;  %v2797_v11 = vld [vmem:[#allocation29 + $0x20] sm:$0xff] }
 0xf05   :  { %3776 = vmatpush1.bf16.msra.mxu0 %v3775_v48  ;;  %2159 = vmatprep.mubr.f32.mxu0 %v4608_v37  ;;  %v2368_v48 = vld [vmem:[#allocation28 + $0x40] sm:$0xff] }
 0xf06   :  { %3778 = vmatprep.subr.bf16.mxu0 %v3777_v49  ;;  %v2373_v49 = vld [vmem:[#allocation28 + $0x68] sm:$0xff]  ;;  %v3831_v21 = vpack.c.bf16 %v2370_v36, %v2368_v48  ;;  %v2804_v48 = vld [vmem:[#allocation29 + $0x58] sm:$0xff] }
 0xf07   :  { %v3833_v53 = vpack.c.bf16 %v2375_v50, %v2373_v49  ;;  %v1680_v49 = vmax.f32 %v5003_v51, 0.0 }
 0xf09   :  { %3780 = vmatpush1.bf16.msra.mxu0 %v3779_v55  ;;  %v2374_v55 = vld [vmem:[#allocation28 + $0x70] sm:$0xff] }
 0xf0a   :  { %3782 = vmatprep.subr.bf16.mxu0 %v3781_v56  ;;  %v2377_v56 = vld [vmem:[#allocation28 + $0x88] sm:$0xff]  ;;  %v3835_v26 = vpack.c.bf16 %v2374_v55, %v2372_v39  ;;  %v2808_v55 = vld [vmem:[#allocation29 + $0x78] sm:$0xff] }
 0xf0b   :  { %v3837_v58 = vpack.c.bf16 %v2379_v15, %v2377_v56  ;;  %v2806_v39 = vld [vmem:[#allocation29 + $0x68] sm:$0xff]  ;;  %v2805_v15 = vld [vmem:[#allocation29 + $0x60] sm:$0xff] }
 0xf0c   :  { %v3869_v56 = vpack.c.bf16 %v2808_v55, %v2806_v39 }
 0xf0d   :  { %3784 = vmatpush1.bf16.msra.mxu0 %v3783_v61  ;;  %v2378_v61 = vld [vmem:[#allocation28 + $0x90] sm:$0xff] }
 0xf0e   :  { %3786 = vmatprep.subr.bf16.mxu0 %v3785_v62  ;;  %v2381_v62 = vld [vmem:[#allocation28 + $0xa8] sm:$0xff]  ;;  %v3839_v0 = vpack.c.bf16 %v2378_v61, %v2376_v59  ;;  %v2812_v59 = vld [vmem:[#allocation29 + $0x98] sm:$0xff] }
 0xf0f   :  { %v3841_v3 = vpack.c.bf16 %v2383_v63, %v2381_v62  ;;  %v2809_v62 = vld [vmem:[#allocation29 + $0x80] sm:$0xff]  ;;  %v2811_v63 = vld [vmem:[#allocation29 + $0x90] sm:$0xff] }
 0xf11   :  { %3788 = vmatpush1.bf16.msra.mxu0 %v3787_v8  ;;  %v2382_v8 = vld [vmem:[#allocation28 + $0xb0] sm:$0xff] }
 0xf12   :  { %3790 = vmatprep.subr.bf16.mxu0 %v3789_v9  ;;  %v2385_v9 = vld [vmem:[#allocation28 + $0xc8] sm:$0xff]  ;;  %v3843_v16 = vpack.c.bf16 %v2382_v8, %v2380_v7  ;;  %v3875_v7 = vpack.c.bf16 %v2811_v63, %v2809_v62 }
 0xf13   :  { %v3845_v17 = vpack.c.bf16 %v2387_v12, %v2385_v9  ;;  %v2813_v9 = vld [vmem:[#allocation29 + $0xa0] sm:$0xff]  ;;  %v2815_v12 = vld [vmem:[#allocation29 + $0xb0] sm:$0xff] }
 0xf15   :  { %3792 = vmatpush1.bf16.msra.mxu0 %v3791_v1  ;;  %v2386_v1 = vld [vmem:[#allocation28 + $0xd0] sm:$0xff] }
 0xf16   :  { %3794 = vmatprep.subr.bf16.mxu0 %v3793_v54  ;;  %v2389_v54 = vld [vmem:[#allocation28 + $0xe8] sm:$0xff]  ;;  %v3847_v24 = vpack.c.bf16 %v2386_v1, %v2384_v18  ;;  %v3879_v18 = vpack.c.bf16 %v2815_v12, %v2813_v9 }
 0xf17   :  { %v3849_v25 = vpack.c.bf16 %v2391_v23, %v2389_v54  ;;  %v2817_v54 = vld [vmem:[#allocation29 + $0xc0] sm:$0xff]  ;;  %v2819_v23 = vld [vmem:[#allocation29 + $0xd0] sm:$0xff]  ;;  %v2857_v12 = vld [vmem:[%s4761_s4] sm:$0x3]  ;;  %s5388_s4 = sld [smem:[#allocation56_spill]] }
 0xf19   :  { %3796 = vmatpush1.bf16.msra.mxu0 %v3795_v31  ;;  %v2390_v31 = vld [vmem:[#allocation28 + $0xf0] sm:$0xff] }
 0xf1a   :  { %3822 = vmatprep.subr.bf16.mxu0 %v3821_v33  ;;  %v2796_v33 = vld [vmem:[#allocation29 + $0x18] sm:$0xff]  ;;  %v3851_v34 = vpack.c.bf16 %v2390_v31, %v2388_v30  ;;  %v3883_v30 = vpack.c.bf16 %v2819_v23, %v2817_v54 }
 0xf1b   :  { %v3857_v35 = vpack.c.bf16 %v2796_v33, %v2794_v32  ;;  %v2821_v32 = vld [vmem:[#allocation29 + $0xe0] sm:$0xff]  ;;  %v2823_v33 = vld [vmem:[#allocation29 + $0xf0] sm:$0xff] }
 0xf1c   :  { %2160 = vmatmul.mubr.f32.vlgmr.msra.gmra.mrb[24].mxu0 %v5134_v43 }
 0xf1d   :  { %3824 = vmatpush1.bf16.msra.mxu0 %v3823_v42  ;;  %2538 = vmatprep.mubr.f32.mxu0 %v4608_v37  ;;  %v2798_v42 = vld [vmem:[#allocation29 + $0x28] sm:$0xff] }
 0xf1e   :  { %3826 = vmatprep.subr.bf16.mxu0 %v3825_v44  ;;  %v2800_v44 = vld [vmem:[#allocation29 + $0x38] sm:$0xff] }
 0xf1f   :  { %v3861_v52 = vpack.c.bf16 %v2800_v44, %v2798_v42 }
 0xf21   :  { %3828 = vmatpush1.bf16.msra.mxu0 %v3827_v60  ;;  %v2799_v60 = vld [vmem:[#allocation29 + $0x30] sm:$0xff] }
 0xf22   :  { %3830 = vmatprep.subr.bf16.mxu0 %v3829_v47  ;;  %v2802_v47 = vld [vmem:[#allocation29 + $0x48] sm:$0xff]  ;;  %v3863_v36 = vpack.c.bf16 %v2799_v60, %v2797_v11 }
 0xf23   :  { %v3865_v50 = vpack.c.bf16 %v2804_v48, %v2802_v47 }
 0xf25   :  { %3832 = vmatpush1.bf16.msra.mxu0 %v3831_v21  ;;  %v2801_v21 = vld [vmem:[#allocation29 + $0x40] sm:$0xff] }
 0xf26   :  { %3834 = vmatprep.subr.bf16.mxu0 %v3833_v53  ;;  %v2803_v53 = vld [vmem:[#allocation29 + $0x50] sm:$0xff] }
 0xf27   :  { %v3867_v38 = vpack.c.bf16 %v2803_v53, %v2801_v21 }
 0xf29   :  { %3836 = vmatpush1.bf16.msra.mxu0 %v3835_v26  ;;  %v2807_v26 = vld [vmem:[#allocation29 + $0x70] sm:$0xff] }
 0xf2a   :  { %3838 = vmatprep.subr.bf16.mxu0 %v3837_v58  ;;  %v2810_v58 = vld [vmem:[#allocation29 + $0x88] sm:$0xff]  ;;  %v3871_v61 = vpack.c.bf16 %v2807_v26, %v2805_v15 }
 0xf2b   :  { %v3873_v51 = vpack.c.bf16 %v2812_v59, %v2810_v58 }
 0xf2d   :  { %3840 = vmatpush1.bf16.msra.mxu0 %v3839_v0  ;;  %v2814_v0 = vld [vmem:[#allocation29 + $0xa8] sm:$0xff] }
 0xf2e   :  { %3842 = vmatprep.subr.bf16.mxu0 %v3841_v3  ;;  %v2816_v3 = vld [vmem:[#allocation29 + $0xb8] sm:$0xff] }
 0xf2f   :  { %v3877_v8 = vpack.c.bf16 %v2816_v3, %v2814_v0 }
 0xf31   :  { %3844 = vmatpush1.bf16.msra.mxu0 %v3843_v16  ;;  %v2818_v16 = vld [vmem:[#allocation29 + $0xc8] sm:$0xff] }
 0xf32   :  { %3846 = vmatprep.subr.bf16.mxu0 %v3845_v17  ;;  %v2820_v17 = vld [vmem:[#allocation29 + $0xd8] sm:$0xff] }
 0xf33   :  { %v3881_v1 = vpack.c.bf16 %v2820_v17, %v2818_v16  ;;  %v3017_v16 = vrot.slane %v2857_v12, %v4891_v5  ;;  %v3021_v17 = vrot.slane %v2857_v12, %v4894_v6 }
 0xf35   :  { %3848 = vmatpush1.bf16.msra.mxu0 %v3847_v24  ;;  %v2822_v24 = vld [vmem:[#allocation29 + $0xe8] sm:$0xff] }
 0xf36   :  { %3850 = vmatprep.subr.bf16.mxu0 %v3849_v25  ;;  %v2824_v25 = vld [vmem:[#allocation29 + $0xf8] sm:$0xff] }
 0xf37   :  { %v3885_v31 = vpack.c.bf16 %v2824_v25, %v2822_v24 }
 0xf39   :  { %3852 = vmatpush1.bf16.msra.mxu0 %v3851_v34  ;;  %v3887_v34 = vpack.c.bf16 %v2823_v33, %v2821_v32  ;;  %v375_v33 = vld [vmem:[#allocation5] sm:$0xff] }
 0xf3a   :  { %3858 = vmatprep.subr.bf16.mxu0 %v3857_v35  ;;  %vm2253_vm12 = vcmp.ne.f32.partialorder %v375_v33, 0.0 }
 0xf3c   :  { %2539 = vmatmul.mubr.f32.vlgmr.msra.gmra.mrb[26].mxu0 %v1679_v46  ;;  %v2094_v46 = vld [vmem:[%s5386_s5] sm:$0xf] }
 0xf3d   :  { %3860 = vmatpush1.bf16.msra.mxu0 %v3859_v45  ;;  %2544 = vmatprep.mubr.f32.mxu0 %v4608_v37  ;;  %v2170_v11 = vrot.slane %v2094_v46, %v4891_v5  ;;  %v2174_v60 = vrot.slane %v2094_v46, %v1811_v57  ;;  %v2393_v57 = vld [vmem:[%s5387_s6] sm:$0x3] }
 0xf3e   :  { %3862 = vmatprep.subr.bf16.mxu0 %v3861_v52  ;;  %v2193_v52 = vrot.slane %v2094_v46, %v4894_v6  ;;  %v2574_v15 = vrot.slane %v2393_v57, %v4894_v6 }
 0xf3f   :  { %v2180_v48 = vrot.slane %v2170_v11, %v4891_v5 }
 0xf40   :  { %2545 = vmatmul.mubr.f32.gmra.mrb[28].mxu0 %v1680_v49  ;;  %v2203_v47 = vrot.slane %v2193_v52, %v4894_v6  ;;  %v2184_v49 = vrot.slane %v2174_v60, %v4891_v5 }
 0xf41   :  { %3864 = vmatpush1.bf16.msra.mxu0 %v3863_v36  ;;  %2923 = vmatprep.mubr.f32.mxu0 %v4608_v37 }
 0xf42   :  { %3866 = vmatprep.subr.bf16.mxu0 %v3865_v50 }
 0xf45   :  { %3868 = vmatpush1.bf16.msra.mxu0 %v3867_v38 }
 0xf46   :  { %3870 = vmatprep.subr.bf16.mxu0 %v3869_v56  ;;  %v2570_v56 = vrot.slane %v2393_v57, %v4891_v5  ;;  %v2346_v57 = vld [vmem:[%s5388_s4 + $0x10] sm:$0xff] }
 0xf49   :  { %3872 = vmatpush1.bf16.msra.mxu0 %v3871_v61 }
 0xf4a   :  { %3874 = vmatprep.subr.bf16.mxu0 %v3873_v51 }
 0xf4d   :  { %3876 = vmatpush1.bf16.msra.mxu0 %v3875_v7 }
 0xf4e   :  { %3878 = vmatprep.subr.bf16.mxu0 %v3877_v8 }
 0xf51   :  { %3880 = vmatpush1.bf16.msra.mxu0 %v3879_v18 }
 0xf52   :  { %3882 = vmatprep.subr.bf16.mxu0 %v3881_v1 }
 0xf55   :  { %3884 = vmatpush1.bf16.msra.mxu0 %v3883_v30 }
 0xf56   :  { %3886 = vmatprep.subr.bf16.mxu0 %v3885_v31 }
 0xf59   :  { %3888 = vmatpush1.bf16.msra.mxu0 %v3887_v34 }
 0xf5c   :  { %2924 = vmatmul.mubr.f32.vlgmr.msra.gmra.mrb[30].mxu0 %v5134_v43  ;;  %v2197_v43 = vrot.slane %v2094_v46, %v1844_v29 }
 0xf5d   :  { %3244 = vmatprep.mubr.f32.mxu0 %v4608_v37 }
 0xf5e   :  { %v2207_v36 = vrot.slane %v2197_v43, %v4894_v6 }
 0xfcf   :  { %v5144_v35 = vpop.f32.mrb[18].mxu0 }
 0xfd0   :  { %v5146_v40 = vpop.f32.mrb[19].mxu0 }
 0xfd3   :  { %v5148_v41 = vpop.f32.mrb[20].mxu0 }
 0xfd4   :  { %v5150_v42 = vpop.f32.mrb[21].mxu0 }
 0xfd7   :  { %v5152_v44 = vpop.f32.mrb[22].mxu0 }
 0xfd8   :  { %v5154_v45 = vpop.f32.mrb[23].mxu0 }
 0xfef   :  { %v2161_v50 = vpop.f32.mrb[24].mxu0 }
 0xff0   :  { %v2163_v21 = vpop.f32.mrb[25].mxu0  ;;  %v2208_v53 = vmul.f32 %v2203_v47, %v2161_v50  ;;  %v2185_v39 = vmul.f32 %v2180_v48, %v2161_v50 }
 0xff1   :  { %2271 = vmatprep.subr.mxu1 %v2163_v21  ;;  %v2209_v55 = vmul.f32 %v2207_v36, %v2163_v21  ;;  %v2186_v38 = vmul.f32 %v2184_v49, %v2163_v21 }
 0xff2   :  { %2272 = vmatpush1.msra.mxu1 %v2161_v50 }
 0xff3   :  { %v2210_v29 = vadd.f32 %v2209_v55, %v2208_v53  ;;  %v2187_v4 = vadd.f32 %v2186_v38, %v2185_v39  ;;  %3797 = vmatprep.subr.bf16.mxu1 %v4610_v13  ;;  %v2344_v39 = vld [vmem:[%s5388_s4] sm:$0xff]  ;;  %v2345_v55 = vld [vmem:[%s5388_s4 + $0x8] sm:$0xff] }
 0xff5   :  { %2211 = vadd.xlane.f32.xlu0 %v2210_v29  ;;  %v3798_v29 = vpack.c.bf16 %v2345_v55, %v2344_v39 }
 0xff9   :  { %2188 = vadd.xlane.f32.xlu0 %v2187_v4 }
0x100f   :  { %v5171_v26 = vpop.f32.mrb[26].mxu0 }
0x1010   :  { %v2577_v58 = vmul.f32 %v2570_v56, %v5171_v26  ;;  %v5174_v59 = vpop.f32.mrb[27].mxu0 }
0x1011   :  { %v2578_v61 = vmul.f32 %v2574_v15, %v5174_v59 }
0x1013   :  { %v5177_v51 = vpop.f32.mrb[28].mxu0  ;;  %v5179_v62 = vadd.f32 %v2578_v61, %v2577_v58  ;;  %v2348_v58 = vld [vmem:[%s5388_s4 + $0x20] sm:$0xff]  ;;  %v2349_v61 = vld [vmem:[%s5388_s4 + $0x28] sm:$0xff] }
0x1014   :  { %v2579_v63 = vmul.f32 %v2570_v56, %v5177_v51  ;;  %v3855_v0 = vpack.c.bf16 %v5177_v51, %v5171_v26  ;;  %v5184_v3 = vpop.f32.mrb[29].mxu0  ;;  %v2347_v56 = vld [vmem:[%s5388_s4 + $0x18] sm:$0xff] }
0x1015   :  { %v2580_v7 = vmul.f32 %v2574_v15, %v5184_v3  ;;  %v3853_v8 = vpack.c.bf16 %v5184_v3, %v5174_v59  ;;  %v3801_v15 = vpack.c.bf16 %v2347_v56, %v2346_v57  ;;  %v3523_v3 = vld [vmem:[%s5389_s7] ss:$0 sm:$0xff] }
0x1017   :  { %v2584_v9 = vadd.f32 %v2580_v7, %v2579_v63  ;;  %v3804_v63 = vpack.c.bf16 %v2349_v61, %v2348_v58  ;;  %v2350_v7 = vld [vmem:[%s5388_s4 + $0x30] sm:$0xff] }
0x102f   :  { %v5192_v18 = vpop.f32.mrb[30].mxu0 }
0x1030   :  { %v3024_v1 = vmul.f32 %v3017_v16, %v5192_v18  ;;  %v5195_v54 = vpop.f32.mrb[31].mxu0  ;;  %v2352_v16 = vld [vmem:[%s5388_s4 + $0x40] sm:$0xff] }
0x1031   :  { %v3025_v23 = vmul.f32 %v3021_v17, %v5195_v54  ;;  %v2353_v17 = vld [vmem:[%s5388_s4 + $0x48] sm:$0xff] }
0x1033   :  { %v5198_v24 = vadd.f32 %v3025_v23, %v3024_v1  ;;  %v3810_v1 = vpack.c.bf16 %v2353_v17, %v2352_v16  ;;  %v2354_v23 = vld [vmem:[%s5388_s4 + $0x50] sm:$0xff] }
0x1082   :  { %v2212_v25 = vpop.xlane.xlu0 %2211 }
0x1083   :  { %2213 = vxpose.xlu0.b32.start.end [1/1] (short) (narrow) %v2212_v25, 8  ;;  %v2355_v25 = vld [vmem:[%s5388_s4 + $0x58] sm:$0xff] }
0x1086   :  { %v2189_v30 = vpop.xlane.xlu0 %2188 }
0x10b0   :  { %2585 = vadd.xlane.f32.xlu0 %v2584_v9  ;;  %v2351_v9 = vld [vmem:[%s5388_s4 + $0x38] sm:$0xff] }
0x10b1   :  { %v3807_v12 = vpack.c.bf16 %v2351_v9, %v2350_v7 }
0x1103   :  { %v2229_v31 = vpop.trf.xlu0 }
0x1104   :  { %v2248_v32 = vrot.slane %v2229_v31, %v4891_v5  ;;  %v2356_v31 = vld [vmem:[%s5388_s4 + $0x60] sm:$0xff] }
0x1106   :  { %v2249_v34 = vadd.f32 %v2248_v32, %v2189_v30  ;;  %v3813_v30 = vpack.c.bf16 %v2355_v25, %v2354_v23  ;;  %v2357_v32 = vld [vmem:[%s5388_s4 + $0x68] sm:$0xff] }
0x1107   :  { %v3816_v33 = vpack.c.bf16 %v2357_v32, %v2356_v31 }
0x1108   :  { %vm2250_vm7 = vcmp.ge.f32.partialorder %v2249_v34, 0.0  ;;  %v2251_v46 = vmul.f32 0.2, %v2249_v34 }
0x110a   :  { %v2252_v52 = vsel %vm2250_vm7, %v2249_v34, %v2251_v46  ;;  %v2358_v34 = vld [vmem:[%s5388_s4 + $0x70] sm:$0xff]  ;;  %v2359_v46 = vld [vmem:[%s5388_s4 + $0x78] sm:$0xff] }
0x110b   :  { %v2254_v11 = vsel %vm2253_vm12, %v2252_v52, -1e+30  ;;  %v3819_v52 = vpack.c.bf16 %v2359_v46, %v2358_v34 }
0x110c   :  { %v2255_v43 = vsel %vm1403_vm6, %v2254_v11, -inf }
0x110d   :  { %2256 = vmax.xlane.f32.xlu1 %v2255_v43 }
0x119a   :  { %v2257_v60 = vpop.xlane.xlu1 %2256 }
0x119b   :  { %v2258_v47 = vsub.f32 %v2254_v11, %v2257_v60 }
0x119d   :  { %v2259_v48 = vmul.f32 1.442695, %v2258_v47 }
0x119f   :  { %4038 = vpow2.f32 %v2259_v48 }
0x11a9   :  { %v4039_v36 = vpop.eup %4038 }
0x11aa   :  { %v2261_v49 = vsel %vm2253_vm12, %v4039_v36, 0.0 }
0x11ab   :  { %v2262_v50 = vsel %vm1403_vm6, %v2261_v49, 0.0 }
0x11ac   :  { %2263 = vadd.xlane.f32.xlu1 %v2262_v50 }
0x1239   :  { %v2264_v21 = vpop.xlane.xlu1 %2263 }
0x123a   :  { %v2265_v53 = vmax.f32 %v2264_v21, 1e-30  ;;  %v2826_v21 = vld [vmem:[#allocation31 + $0x8] sm:$0xff] }
0x123c   :  { %4040 = vrcp.f32 %v2265_v53  ;;  %v2828_v53 = vld [vmem:[#allocation31 + $0x18] sm:$0xff] }
0x123d   :  { %v3889_v39 = vpack.c.bf16 %v2828_v53, %v2826_v21  ;;  %v2827_v53 = vld [vmem:[#allocation31 + $0x10] sm:$0xff] }
0x1246   :  { %v4041_v38 = vpop.eup %4040 }
0x1247   :  { %v2267_v4 = vmul.f32 %v4041_v38, %v2261_v49 }
0x1249   :  { %3522 = vmatmul.mubr.msk.f32.vlgmr.msra.gmra.mrb[24].mxu1 %vm1403_vm6, %v2267_v4  ;;  %v2586_v4 = vpop.xlane.xlu0 %2585 }
0x124a   :  { %3799 = vmatpush3.bf16.msra.mxu1 %v3798_v29  ;;  %3706 = vmatprep.mubr.msk.f32.mxu1 %vm4609_vm8, %v4608_v37 }
0x124b   :  { %3800 = vmatprep.subr.bf16.mxu1 %v4610_v13 }
0x124e   :  { %3802 = vmatpush3.bf16.msra.mxu1 %v3801_v15 }
0x124f   :  { %3803 = vmatprep.subr.bf16.mxu1 %v4610_v13 }
0x1252   :  { %3805 = vmatpush3.bf16.msra.mxu1 %v3804_v63 }
0x1253   :  { %3806 = vmatprep.subr.bf16.mxu1 %v4610_v13 }
0x1256   :  { %3808 = vmatpush3.bf16.msra.mxu1 %v3807_v12 }
0x1257   :  { %3809 = vmatprep.subr.bf16.mxu1 %v4610_v13 }
0x125a   :  { %3811 = vmatpush3.bf16.msra.mxu1 %v3810_v1 }
0x125b   :  { %3812 = vmatprep.subr.bf16.mxu1 %v4610_v13 }
0x125e   :  { %3814 = vmatpush3.bf16.msra.mxu1 %v3813_v30 }
0x125f   :  { %3815 = vmatprep.subr.bf16.mxu1 %v4610_v13 }
0x1262   :  { %3817 = vmatpush3.bf16.msra.mxu1 %v3816_v33 }
0x1263   :  { %3818 = vmatprep.subr.bf16.mxu1 %v4610_v13 }
0x1266   :  { %3820 = vmatpush3.bf16.msra.mxu1 %v3819_v52 }
0x1267   :  { %3854 = vmatprep.subr.bf16.mxu1 %v3853_v8 }
0x1269   :  { %3707 = vmatmul.mubr.f32.vlgmr.msra.gmra.mrb[26].mxu1 %v5086_v10 }
0x126a   :  { %3856 = vmatpush1.bf16.msra.mxu1 %v3855_v0  ;;  %3709 = vmatprep.mubr.msk.f32.mxu1 %vm4609_vm8, %v4608_v37 }
0x126b   :  { %3890 = vmatprep.subr.bf16.mxu1 %v3889_v39  ;;  %v2830_v39 = vld [vmem:[#allocation31 + $0x28] sm:$0xff] }
0x126d   :  { %3710 = vmatmul.mubr.f32.gmra.mrb[28].mxu1 %v5091_v2 }
0x126e   :  { %3712 = vmatprep.mubr.msk.f32.mxu1 %vm4609_vm8, %v4608_v37 }
0x1271   :  { %3713 = vmatmul.mubr.f32.gmra.mrb[30].mxu1 %v5095_v14 }
0x1272   :  { %2768 = vmatprep.mubr.f32.mxu1 %v4608_v37 }
0x131c   :  { %v5243_v13 = vpop.f32.mrb[24].mxu1 }
0x131d   :  { %v5245_v59 = vpop.f32.mrb[25].mxu1 }
0x133c   :  { %v2460_v8 = vpop.f32.mrb[26].mxu1 }
0x133d   :  { %v2557_v26 = vmul.f32 %v3523_v3, %v2460_v8  ;;  %v3708_v51 = vpop.f32.mrb[27].mxu1 }
0x133f   :  { %2560 = vadd.xlane.f32.xlu1 %v2557_v26 }
0x1340   :  { %v2465_v0 = vpop.f32.mrb[28].mxu1 }
0x1341   :  { %v2558_v11 = vmul.f32 %v3523_v3, %v2465_v0  ;;  %v3711_v43 = vpop.f32.mrb[29].mxu1 }
0x1343   :  { %2562 = vadd.xlane.f32.xlu1 %v2558_v11 }
0x1344   :  { %v2470_v60 = vpop.f32.mrb[30].mxu1 }
0x1345   :  { %v2559_v47 = vmul.f32 %v3523_v3, %v2470_v60  ;;  %v3714_v48 = vpop.f32.mrb[31].mxu1 }
0x1347   :  { %2564 = vadd.xlane.f32.xlu1 %v2559_v47 }
0x134b   :  { %2582 = vadd.xlane.f32.xlu1 %v5179_v62 }
0x13cc   :  { %v2561_v36 = vpop.xlane.xlu1 %2560 }
0x13cd   :  { %2587 = vxpose.xlu1.b32.start [1/3] (short) (narrow) %v2561_v36, 8 }
0x13d0   :  { %v2563_v49 = vpop.xlane.xlu1 %2562 }
0x13d1   :  { %2588 = vxpose.xlu1.b32.cont [2/3] (short) (narrow) %v2563_v49, 8 }
0x13d4   :  { %v2565_v50 = vpop.xlane.xlu1 %2564 }
0x13d5   :  { %2589 = vxpose.xlu1.b32.end [3/3] (short) (narrow) %v2565_v50, 8 }
0x13d8   :  { %v2583_v55 = vpop.xlane.xlu1 %2582 }
0x13fc   :  { %3027 = vadd.xlane.f32.xlu1 %v5198_v24 }
0x144d   :  { %v2603_v38 = vpop.trf.xlu1 }
0x144e   :  { %v2622_v29 = vrot.slane %v2603_v38, %v4891_v5  ;;  %v3891_v38 = vpack.c.bf16 %v2827_v53, %v2825_v28  ;;  %v2853_v28 = vld [vmem:[#allocation31 + $0xe0] sm:$0xff]  ;;  %v2855_v53 = vld [vmem:[#allocation31 + $0xf0] sm:$0xff] }
0x1450   :  { %v2623_v57 = vadd.f32 %v2622_v29, %v2583_v55  ;;  %v2624_v56 = vadd.f32 %v2622_v29, %v2586_v4  ;;  %v2832_v55 = vld [vmem:[#allocation31 + $0x38] sm:$0xff]  ;;  %v2829_v4 = vld [vmem:[#allocation31 + $0x20] sm:$0xff] }
0x1451   :  { %v3893_v29 = vpack.c.bf16 %v2832_v55, %v2830_v39  ;;  %v3919_v39 = vpack.c.bf16 %v2855_v53, %v2853_v28 }
0x1452   :  { %vm2625_vm8 = vcmp.ge.f32.partialorder %v2623_v57, 0.0  ;;  %vm2626_vm13 = vcmp.ge.f32.partialorder %v2624_v56, 0.0  ;;  %v2627_v62 = vmul.f32 0.2, %v2623_v57  ;;  %v2628_v15 = vmul.f32 0.2, %v2624_v56 }
0x1454   :  { %v2629_v58 = vsel %vm2625_vm8, %v2623_v57, %v2627_v62  ;;  %v2630_v61 = vsel %vm2626_vm13, %v2624_v56, %v2628_v15  ;;  %v2831_v57 = vld [vmem:[#allocation31 + $0x30] sm:$0xff]  ;;  %v2834_v62 = vld [vmem:[#allocation31 + $0x48] sm:$0xff]  ;;  %v2836_v15 = vld [vmem:[#allocation31 + $0x58] sm:$0xff] }
0x1455   :  { %v2631_v24 = vsel %vm894_vm10, %v2629_v58, -1e+30  ;;  %v2632_v63 = vsel %vm895_vm11, %v2630_v61, -1e+30  ;;  %v3895_v58 = vpack.c.bf16 %v2831_v57, %v2829_v4  ;;  %v3897_v61 = vpack.c.bf16 %v2836_v15, %v2834_v62 }
0x1456   :  { %v2633_v7 = vsel %vm898_vm14, %v2631_v24, -inf  ;;  %v2634_v9 = vsel %vm898_vm14, %v2632_v63, -inf  ;;  %v2057_v57 = vmax.f32 %v5146_v40, 0.0  ;;  %v2060_v40 = vmax.f32 %v5152_v44, 0.0 }
0x1457   :  { %v2635_v12 = vmax.f32 %v2633_v7, %v2634_v9  ;;  %v2838_v9 = vld [vmem:[#allocation31 + $0x68] sm:$0xff] }
0x1459   :  { %v2636_v16 = vrot.slane %v2635_v12, 4 }
0x145b   :  { %v2637_v17 = vmax.f32 %v2635_v12, %v2636_v16  ;;  %v2840_v12 = vld [vmem:[#allocation31 + $0x78] sm:$0xff] }
0x145d   :  { %v2638_v1 = vrot.slane %v2637_v17, 2 }
0x145f   :  { %v2639_v23 = vmax.f32 %v2637_v17, %v2638_v1  ;;  %v3901_v17 = vpack.c.bf16 %v2840_v12, %v2838_v9  ;;  %v2837_v1 = vld [vmem:[#allocation31 + $0x60] sm:$0xff] }
0x1461   :  { %v2640_v25 = vrot.slane %v2639_v23, 1 }
0x1463   :  { %v2641_v30 = vmax.f32 %v2639_v23, %v2640_v25  ;;  %v2839_v23 = vld [vmem:[#allocation31 + $0x70] sm:$0xff] }
0x1465   :  { %v2642_v31 = vsub.f32 %v2631_v24, %v2641_v30  ;;  %v2643_v32 = vsub.f32 %v2632_v63, %v2641_v30  ;;  %v2833_v24 = vld [vmem:[#allocation31 + $0x40] sm:$0xff]  ;;  %v2835_v63 = vld [vmem:[#allocation31 + $0x50] sm:$0xff]  ;;  %v2842_v30 = vld [vmem:[#allocation31 + $0x88] sm:$0xff] }
0x1466   :  { %v3899_v16 = vpack.c.bf16 %v2835_v63, %v2833_v24 }
0x1467   :  { %v2644_v33 = vmul.f32 1.442695, %v2642_v31  ;;  %v2646_v34 = vmul.f32 1.442695, %v2643_v32  ;;  %v2844_v31 = vld [vmem:[#allocation31 + $0x98] sm:$0xff]  ;;  %v3903_v32 = vpack.c.bf16 %v2839_v23, %v2837_v1 }
0x1468   :  { %v2858_v23 = vld [vmem:[%s4766_s9] sm:$0x3]  ;;  %s4611_s9 = smov [#allocation33]  }
0x1469   :  { %4042 = vpow2.f32 %v2644_v33  ;;  %v3905_v33 = vpack.c.bf16 %v2844_v31, %v2842_v30  ;;  %s3435_s10 = sshll.u32 %s4611_s9, 4  ;;  %s3436_s10 = int_to_ptr.vmem [resolvable:$true] %s3435_s10 }
0x146a   :  { %4044 = vpow2.f32 %v2646_v34  ;;  %v2841_v34 = vld [vmem:[#allocation31 + $0x80] sm:$0xff]  ;;  %s4486_s11 = scalar_lea.vmem %s3436_s10, 256  ;;  %p4491_p13 = scmp.lt.s32.totalorder %s3436_s10, %s3436_s10 }
0x146b   :  { %p4487_p12 = scmp.ne.s32.totalorder %s3436_s10, %s4486_s11  ;;  %p4492_p0 = scmp.lt.s32.totalorder %s4486_s11, %s4486_s11 }
0x146d   :  { %p4493_p1 = por %p4492_p0, %p4491_p13 }
0x146f   :  { %p4494_p2 = pnand %p4493_p1, %p4487_p12 }
0x1473   :  { %v4043_v46 = vpop.eup %4042 }
0x1474   :  { %v4045_v52 = vpop.eup %4044  ;;  %v2648_v3 = vsel %vm894_vm10, %v4043_v46, 0.0  ;;  %v2843_v46 = vld [vmem:[#allocation31 + $0x90] sm:$0xff] }
0x1475   :  { %v2649_v8 = vsel %vm895_vm11, %v4045_v52, 0.0  ;;  %v2650_v26 = vsel %vm898_vm14, %v2648_v3, 0.0  ;;  %v2846_v52 = vld [vmem:[#allocation31 + $0xa8] sm:$0xff] }
0x1476   :  { %v2651_v51 = vsel %vm898_vm14, %v2649_v8, 0.0 }
0x1477   :  { %v2652_v0 = vadd.f32 %v2651_v51, %v2650_v26  ;;  %v2845_v51 = vld [vmem:[#allocation31 + $0xa0] sm:$0xff] }
0x1479   :  { %v2653_v11 = vrot.slane %v2652_v0, 4 }
0x147b   :  { %v2654_v43 = vadd.f32 %v2653_v11, %v2652_v0  ;;  %v2847_v0 = vld [vmem:[#allocation31 + $0xb0] sm:$0xff]  ;;  %v2850_v11 = vld [vmem:[#allocation31 + $0xc8] sm:$0xff] }
0x147d   :  { %v2655_v60 = vrot.slane %v2654_v43, 2 }
0x147f   :  { %v2656_v47 = vadd.f32 %v2655_v60, %v2654_v43  ;;  %v2852_v43 = vld [vmem:[#allocation31 + $0xd8] sm:$0xff]  ;;  %v3911_v60 = vpack.c.bf16 %v2847_v0, %v2845_v51 }
0x1481   :  { %v2657_v48 = vrot.slane %v2656_v47, 1 }
0x1483   :  { %v2658_v36 = vadd.f32 %v2657_v48, %v2656_v47  ;;  %v3913_v47 = vpack.c.bf16 %v2852_v43, %v2850_v11  ;;  %v2849_v48 = vld [vmem:[#allocation31 + $0xc0] sm:$0xff] }
0x1485   :  { %v2659_v49 = vmax.f32 %v2658_v36, 1e-30  ;;  %v2851_v36 = vld [vmem:[#allocation31 + $0xd0] sm:$0xff] }
0x1487   :  { %4046 = vrcp.f32 %v2659_v49  ;;  %v2854_v49 = vld [vmem:[#allocation31 + $0xe8] sm:$0xff] }
0x1491   :  { %v4047_v50 = vpop.eup %4046 }
0x1492   :  { %v2661_v21 = vmul.f32 %v4047_v50, %v2648_v3  ;;  %v2662_v27 = vmul.f32 %v4047_v50, %v2649_v8  ;;  %v2848_v3 = vld [vmem:[#allocation31 + $0xb8] sm:$0xff]  ;;  %v3907_v8 = vpack.c.bf16 %v2843_v46, %v2841_v34 }
0x1493   :  { %v3909_v26 = vpack.c.bf16 %v2848_v3, %v2846_v52  ;;  %v2856_v50 = vld [vmem:[#allocation31 + $0xf8] sm:$0xff] }
0x1494   :  { %2663 = vxpose.xlu0.b32.start [1/2] (short) (narrow) %v2661_v21, 24  ;;  %v3915_v21 = vpack.c.bf16 %v2851_v36, %v2849_v48 }
0x1498   :  { %2664 = vxpose.xlu0.b32.end [2/2] (short) (narrow) %v2662_v27, 24  ;;  %v3917_v27 = vpack.c.bf16 %v2856_v50, %v2854_v49 }
0x1514   :  { %v2679_v56 = vpop.trf.xlu0 }
0x1515   :  { %3524 = vmatmul.mubr.msk.f32.vlgmr.msra.gmra.mrb[32].mxu1 %vm537_vm5, %v2679_v56 }
0x1516   :  { %3892 = vmatpush1.bf16.msra.mxu1 %v3891_v38  ;;  %2774 = vmatprep.mubr.f32.mxu1 %v4608_v37  ;;  %v2056_v38 = vmax.f32 %v5144_v35, 0.0 }
0x1517   :  { %3894 = vmatprep.subr.bf16.mxu1 %v3893_v29 }
0x1518   :  { %v2680_v7 = vpop.trf.xlu0 }
0x1519   :  { %3525 = vmatmul.mubr.msk.f32.gmra.mrb[34].mxu1 %vm537_vm5, %v2680_v7 }
0x151a   :  { %3896 = vmatpush1.bf16.msra.mxu1 %v3895_v58  ;;  %2780 = vmatprep.mubr.f32.mxu1 %v4608_v37 }
0x151b   :  { %3898 = vmatprep.subr.bf16.mxu1 %v3897_v61 }
0x151c   :  { %v2681_v25 = vpop.trf.xlu0 }
0x151d   :  { %3526 = vmatmul.mubr.msk.f32.gmra.mrb[36].mxu1 %vm537_vm5, %v2681_v25  ;;  %v3037_v25 = vrot.slane %v2858_v23, %v4894_v6 }
0x151e   :  { %3900 = vmatpush1.bf16.msra.mxu1 %v3899_v16  ;;  %2994 = vmatprep.mubr.f32.mxu1 %v4608_v37  ;;  %v2061_v16 = vmax.f32 %v5154_v45, 0.0 }
0x151f   :  { %3902 = vmatprep.subr.bf16.mxu1 %v3901_v17 }
0x1522   :  { %3904 = vmatpush1.bf16.msra.mxu1 %v3903_v32 }
0x1523   :  { %3906 = vmatprep.subr.bf16.mxu1 %v3905_v33 }
0x1526   :  { %3908 = vmatpush1.bf16.msra.mxu1 %v3907_v8 }
0x1527   :  { %3910 = vmatprep.subr.bf16.mxu1 %v3909_v26 }
0x152a   :  { %3912 = vmatpush1.bf16.msra.mxu1 %v3911_v60  ;;  %v3028_v60 = vpop.xlane.xlu1 %3027 }
0x152b   :  { %3914 = vmatprep.subr.bf16.mxu1 %v3913_v47 }
0x152e   :  { %3916 = vmatpush1.bf16.msra.mxu1 %v3915_v21 }
0x152f   :  { %3918 = vmatprep.subr.bf16.mxu1 %v3917_v27 }
0x1532   :  { %3920 = vmatpush1.bf16.msra.mxu1 %v3919_v39 }
0x1535   :  { %2995 = vmatmul.mubr.f32.vlgmr.msra.gmra.mrb[38].mxu1 %v5086_v10 }
0x1536   :  { %3000 = vmatprep.mubr.f32.mxu1 %v4608_v37 }
0x1539   :  { %3001 = vmatmul.mubr.f32.gmra.mrb[40].mxu1 %v5091_v2  ;;  %v2058_v2 = vmax.f32 %v5148_v41, 0.0 }
0x153a   :  { %3006 = vmatprep.mubr.f32.mxu1 %v4608_v37 }
0x153d   :  { %3007 = vmatmul.mubr.f32.gmra.mrb[42].mxu1 %v5095_v14  ;;  %v2059_v14 = vmax.f32 %v5150_v42, 0.0  ;;  %v3033_v42 = vrot.slane %v2858_v23, %v4891_v5 }
0x15e8   :  { %v2770_v55 = vpop.f32.mrb[32].mxu1 }
0x15e9   :  { %v2787_v29 = vmax.f32 %v2770_v55, 0.0  ;;  %v2772_v4 = vpop.f32.mrb[33].mxu1 }
0x15ea   :  { %v2788_v56 = vmax.f32 %v2772_v4, 0.0 }
0x15eb   :  { %v5276_v62 = vadd.f32 %v2787_v29, %v2056_v38 }
0x15ec   :  { %v5278_v15 = vadd.f32 %v2788_v56, %v2057_v57  ;;  %v2776_v10 = vpop.f32.mrb[34].mxu1 }
0x15ed   :  { %v2789_v58 = vmax.f32 %v2776_v10, 0.0  ;;  %v2778_v61 = vpop.f32.mrb[35].mxu1 }
0x15ee   :  { %v2790_v24 = vmax.f32 %v2778_v61, 0.0 }
0x15ef   :  { %v5282_v63 = vadd.f32 %v2789_v58, %v2058_v2 }
0x15f0   :  { %v5284_v35 = vadd.f32 %v2790_v24, %v2059_v14  ;;  %v2782_v7 = vpop.f32.mrb[36].mxu1 }
0x15f1   :  { %v2791_v9 = vmax.f32 %v2782_v7, 0.0  ;;  %v2784_v12 = vpop.f32.mrb[37].mxu1 }
0x15f2   :  { %v2792_v17 = vmax.f32 %v2784_v12, 0.0 }
0x15f3   :  { %v5288_v1 = vadd.f32 %v2791_v9, %v2060_v40 }
0x15f4   :  { %v5290_v41 = vadd.f32 %v2792_v17, %v2061_v16 }
0x1608   :  { %v2996_v30 = vpop.f32.mrb[38].mxu1 }
0x1609   :  { %v3040_v31 = vmul.f32 %v3033_v42, %v2996_v30  ;;  %v2998_v32 = vpop.f32.mrb[39].mxu1 }
0x160a   :  { %v3041_v33 = vmul.f32 %v3037_v25, %v2998_v32 }
0x160c   :  { %v3002_v34 = vpop.f32.mrb[40].mxu1  ;;  %v3046_v44 = vadd.f32 %v3041_v33, %v3040_v31 }
0x160d   :  { %v3042_v46 = vmul.f32 %v3033_v42, %v3002_v34  ;;  %v3923_v52 = vpack.c.bf16 %v3002_v34, %v2996_v30  ;;  %v3004_v3 = vpop.f32.mrb[41].mxu1 }
0x160e   :  { %v3043_v45 = vmul.f32 %v3037_v25, %v3004_v3  ;;  %v3921_v8 = vpack.c.bf16 %v3004_v3, %v2998_v32  ;;  %3047 = vadd.xlane.f32.xlu0 %v3046_v44 }
0x1610   :  { %v3008_v26 = vpop.f32.mrb[42].mxu1  ;;  %3922 = vmatprep.subr.bf16.mxu0 %v3921_v8  ;;  %v3049_v51 = vadd.f32 %v3043_v45, %v3042_v46 }
0x1611   :  { %v3044_v0 = vmul.f32 %v3033_v42, %v3008_v26  ;;  %v3010_v11 = vpop.f32.mrb[43].mxu1  ;;  %3924 = vmatpush1.bf16.msra.mxu0 %v3923_v52 }
0x1612   :  { %v3045_v43 = vmul.f32 %v3037_v25, %v3010_v11  ;;  %3050 = vadd.xlane.f32.xlu1 %v3049_v51  ;;  %3184 = vmatprep.subr.mxu0 %v3010_v11 }
0x1614   :  { %v3052_v6 = vadd.f32 %v3045_v43, %v3044_v0 }
0x1615   :  { %3185 = vmatpush1.msra.mxu0 %v3008_v26 }
0x1616   :  { %3298 = vmatprep.subr.mxu0 %v5195_v54  ;;  %3053 = vadd.xlane.f32.xlu1 %v3052_v6 }
0x1649   :  { %3055 = vxpose.xlu1.b32.start.end [1/1] (short) (narrow) %v3028_v60, 8 }
0x169b   :  { %v3048_v50 = vpop.xlane.xlu0 %3047 }
0x169f   :  { %v3051_v47 = vpop.xlane.xlu1 %3050 }
0x16a3   :  { %v3054_v48 = vpop.xlane.xlu1 %3053 }
0x16c9   :  { %v3071_v36 = vpop.trf.xlu1 }
0x16ca   :  { %v3090_v49 = vrot.slane %v3071_v36, %v4891_v5 }
0x16cc   :  { %v3091_v21 = vadd.f32 %v3090_v49, %v3048_v50  ;;  %v3092_v27 = vadd.f32 %v3090_v49, %v3051_v47  ;;  %v3093_v28 = vadd.f32 %v3090_v49, %v3054_v48 }
0x16ce   :  { %vm3094_vm5 = vcmp.ge.f32.partialorder %v3091_v21, 0.0  ;;  %v3097_v53 = vmul.f32 0.2, %v3091_v21  ;;  %vm3095_vm10 = vcmp.ge.f32.partialorder %v3092_v27, 0.0  ;;  %v3098_v39 = vmul.f32 0.2, %v3092_v27 }
0x16cf   :  { %vm3096_vm11 = vcmp.ge.f32.partialorder %v3093_v28, 0.0  ;;  %v3099_v55 = vmul.f32 0.2, %v3093_v28 }
0x16d0   :  { %v3100_v38 = vsel %vm3094_vm5, %v3091_v21, %v3097_v53  ;;  %v3101_v54 = vsel %vm3095_vm10, %v3092_v27, %v3098_v39 }
0x16d1   :  { %v3103_v29 = vsel %vm1397_vm2, %v3100_v38, -1e+30  ;;  %v3104_v4 = vsel %vm1398_vm9, %v3101_v54, -1e+30  ;;  %v3102_v57 = vsel %vm3096_vm11, %v3093_v28, %v3099_v55 }
0x16d2   :  { %v3106_v5 = vsel %vm1403_vm6, %v3103_v29, -inf  ;;  %v3107_v56 = vsel %vm1403_vm6, %v3104_v4, -inf  ;;  %v3105_v10 = vsel %vm1399_vm1, %v3102_v57, -1e+30 }
0x16d3   :  { %3253 = vmax.xlane.f32.xlu0 %v3106_v5  ;;  %v3109_v2 = vmax.f32 %v3106_v5, %v3107_v56  ;;  %v3108_v58 = vsel %vm1403_vm6, %v3105_v10, -inf }
0x16d5   :  { %v3110_v61 = vmax.f32 %v3109_v2, %v3108_v58 }
0x16d7   :  { %3255 = vmax.xlane.f32.xlu0 %v3107_v56  ;;  %v3111_v14 = vrot.slane %v3110_v61, 4 }
0x16d9   :  { %v3112_v24 = vmax.f32 %v3110_v61, %v3111_v14 }
0x16db   :  { %3257 = vmax.xlane.f32.xlu0 %v3108_v58  ;;  %v3113_v7 = vrot.slane %v3112_v24, 2 }
0x16dd   :  { %v3114_v40 = vmax.f32 %v3112_v24, %v3113_v7 }
0x16df   :  { %v3115_v9 = vrot.slane %v3114_v40, 1 }
0x16e1   :  { %v3116_v12 = vmax.f32 %v3114_v40, %v3115_v9 }
0x16e3   :  { %v3117_v16 = vsub.f32 %v3103_v29, %v3116_v12  ;;  %v3118_v17 = vsub.f32 %v3104_v4, %v3116_v12  ;;  %v3119_v25 = vsub.f32 %v3105_v10, %v3116_v12 }
0x16e5   :  { %v3120_v23 = vmul.f32 1.442695, %v3117_v16  ;;  %v3122_v42 = vmul.f32 1.442695, %v3118_v17  ;;  %v3124_v30 = vmul.f32 1.442695, %v3119_v25 }
0x16e7   :  { %4048 = vpow2.f32 %v3120_v23 }
0x16e8   :  { %4050 = vpow2.f32 %v3122_v42 }
0x16e9   :  { %4052 = vpow2.f32 %v3124_v30 }
0x16f1   :  { %v4049_v46 = vpop.eup %4048 }
0x16f2   :  { %v4051_v52 = vpop.eup %4050  ;;  %v3126_v26 = vsel %vm1397_vm2, %v4049_v46, 0.0 }
0x16f3   :  { %v3127_v51 = vsel %vm1398_vm9, %v4051_v52, 0.0  ;;  %v4053_v11 = vpop.eup %4052  ;;  %v3129_v43 = vsel %vm1403_vm6, %v3126_v26, 0.0 }
0x16f4   :  { %v3130_v6 = vsel %vm1403_vm6, %v3127_v51, 0.0  ;;  %v3128_v48 = vsel %vm1399_vm1, %v4053_v11, 0.0 }
0x16f5   :  { %v3131_v36 = vadd.f32 %v3130_v6, %v3129_v43  ;;  %v3132_v21 = vsel %vm1403_vm6, %v3128_v48, 0.0 }
0x16f7   :  { %v3133_v28 = vadd.f32 %v3132_v21, %v3131_v36 }
0x16f9   :  { %v3134_v55 = vrot.slane %v3133_v28, 4 }
0x16fb   :  { %v3135_v54 = vadd.f32 %v3134_v55, %v3133_v28 }
0x1760   :  { %v3254_v31 = vpop.xlane.xlu0 %3253 }
0x1761   :  { %v3259_v32 = vsub.f32 %v3103_v29, %v3254_v31  ;;  %v3136_v29 = vrot.slane %v3135_v54, 2 }
0x1763   :  { %v3262_v33 = vmul.f32 1.442695, %v3259_v32 }
0x1764   :  { %v3256_v34 = vpop.xlane.xlu0 %3255 }
0x1765   :  { %4054 = vpow2.f32 %v3262_v33  ;;  %v3260_v44 = vsub.f32 %v3104_v4, %v3256_v34  ;;  %v3137_v4 = vadd.f32 %v3136_v29, %v3135_v54  ;;  %v2343_v33 = vmax.f32 %v5245_v59, 0.0 }
0x1767   :  { %v3264_v3 = vmul.f32 1.442695, %v3260_v44  ;;  %v3138_v57 = vrot.slane %v3137_v4, 1 }
0x1768   :  { %v3258_v45 = vpop.xlane.xlu0 %3257 }
0x1769   :  { %4056 = vpow2.f32 %v3264_v3  ;;  %v3261_v8 = vsub.f32 %v3105_v10, %v3258_v45  ;;  %v3139_v5 = vadd.f32 %v3138_v57, %v3137_v4 }
0x176b   :  { %v3266_v0 = vmul.f32 1.442695, %v3261_v8  ;;  %v3140_v56 = vmax.f32 %v3139_v5, 1e-30 }
0x176d   :  { %4058 = vpow2.f32 %v3266_v0 }
0x176e   :  { %4060 = vrcp.f32 %v3140_v56 }
0x176f   :  { %v4055_v60 = vpop.eup %4054 }
0x1770   :  { %v3268_v47 = vsel %vm1397_vm2, %v4055_v60, 0.0 }
0x1771   :  { %v3271_v49 = vsel %vm1403_vm6, %v3268_v47, 0.0 }
0x1772   :  { %3272 = vadd.xlane.f32.xlu0 %v3271_v49 }
0x1773   :  { %v4057_v50 = vpop.eup %4056 }
0x1774   :  { %v3269_v27 = vsel %vm1398_vm9, %v4057_v50, 0.0 }
0x1775   :  { %v3274_v53 = vsel %vm1403_vm6, %v3269_v27, 0.0 }
0x1776   :  { %3275 = vadd.xlane.f32.xlu0 %v3274_v53 }
0x1777   :  { %v4059_v39 = vpop.eup %4058 }
0x1778   :  { %v3270_v20 = vsel %vm1399_vm1, %v4059_v39, 0.0  ;;  %v4061_v22 = vpop.eup %4060 }
0x1779   :  { %v3277_v38 = vsel %vm1403_vm6, %v3270_v20, 0.0  ;;  %v3142_v10 = vmul.f32 %v4061_v22, %v3126_v26  ;;  %v3143_v2 = vmul.f32 %v4061_v22, %v3127_v51  ;;  %v3144_v58 = vmul.f32 %v4061_v22, %v3128_v48 }
0x177a   :  { %3278 = vadd.xlane.f32.xlu1 %v3277_v38 }
0x17a3   :  { %3145 = vxpose.xlu0.b32.start [1/3] (short) (narrow) %v3142_v10, 8 }
0x17a7   :  { %3146 = vxpose.xlu0.b32.cont [2/3] (short) (narrow) %v3143_v2, 8 }
0x17ab   :  { %3147 = vxpose.xlu0.b32.end [3/3] (short) (narrow) %v3144_v58, 8 }
0x17ff   :  { %v3273_v19 = vpop.xlane.xlu0 %3272 }
0x1800   :  { %v3280_v61 = vmax.f32 %v3273_v19, 1e-30 }
0x1802   :  { %4062 = vrcp.f32 %v3280_v61 }
0x1803   :  { %v3276_v14 = vpop.xlane.xlu0 %3275 }
0x1804   :  { %v3281_v24 = vmax.f32 %v3276_v14, 1e-30 }
0x1806   :  { %4064 = vrcp.f32 %v3281_v24 }
0x1807   :  { %v3279_v7 = vpop.xlane.xlu1 %3278 }
0x1808   :  { %v3282_v40 = vmax.f32 %v3279_v7, 1e-30 }
0x180a   :  { %4066 = vrcp.f32 %v3282_v40 }
0x180c   :  { %v4063_v9 = vpop.eup %4062 }
0x180d   :  { %v3284_v16 = vmul.f32 %v4063_v9, %v3268_v47 }
0x1810   :  { %v4065_v17 = vpop.eup %4064 }
0x1811   :  { %v3286_v23 = vmul.f32 %v4065_v17, %v3269_v27 }
0x1814   :  { %v4067_v42 = vpop.eup %4066 }
0x1815   :  { %v3288_v25 = vmul.f32 %v4067_v42, %v3270_v20 }
0x1823   :  { %v3161_v12 = vpop.trf.xlu0 }
0x1824   :  { %3527 = vmatmul.mubr.msk.f32.vlgmr.msra.gmra.mrb[32].mxu0 %vm898_vm14, %v3161_v12 }
0x1825   :  { %3299 = vmatpush1.msra.mxu0 %v5192_v18  ;;  %3362 = vmatprep.mubr.f32.mxu0 %v4608_v37  ;;  %v2342_v18 = vmax.f32 %v5243_v13, 0.0 }
0x1828   :  { %3528 = vmatmul.mubr.msk.f32.vlgmr.msra.gmra.mrb[34].mxu0 %vm1403_vm6, %v3284_v16 }
0x1829   :  { %3368 = vmatprep.mubr.f32.mxu0 %v4608_v37 }
0x182c   :  { %3529 = vmatmul.mubr.msk.f32.gmra.mrb[36].mxu0 %vm1403_vm6, %v3286_v23 }
0x182d   :  { %3374 = vmatprep.mubr.f32.mxu0 %v4608_v37 }
0x1830   :  { %3530 = vmatmul.mubr.msk.f32.gmra.mrb[38].mxu0 %vm1403_vm6, %v3288_v25 }
0x18f7   :  { %v3246_v30 = vpop.f32.mrb[32].mxu0 }
0x18f8   :  { %v3251_v31 = vmax.f32 %v3246_v30, 0.0  ;;  %v3248_v32 = vpop.f32.mrb[33].mxu0 }
0x18f9   :  { %v3252_v34 = vmax.f32 %v3248_v32, 0.0 }
0x18fa   :  { %v3411_v44 = vadd.f32 %v3251_v31, %v2342_v18 }
0x18fb   :  { %v3412_v46 = vadd.f32 %v3252_v34, %v2343_v33  ;;  %v3364_v52 = vpop.f32.mrb[34].mxu0 }
0x18fc   :  { %v3413_v3 = vmax.f32 %v3411_v44, 0.0  ;;  %v3381_v45 = vmax.f32 %v3364_v52, 0.0  ;;  %v3366_v8 = vpop.f32.mrb[35].mxu0 }
0x18fd   :  { %v3414_v37 = vmax.f32 %v3412_v46, 0.0  ;;  %v3382_v26 = vmax.f32 %v3366_v8, 0.0 }
0x18fe   :  { %3415 = vst [vmem:[#allocation33] sm:$0xff] %v3413_v3  ;;  %v3393_v51 = vadd.f32 %v5276_v62, %v3381_v45 }
0x18ff   :  { %3416 = vst [vmem:[#allocation33 + $0x8] sm:$0xff] %v3414_v37  ;;  %v3394_v13 = vadd.f32 %v5278_v15, %v3382_v26  ;;  %v3370_v0 = vpop.f32.mrb[36].mxu0 }
0x1900   :  { %v3399_v59 = vmax.f32 %v3393_v51, 0.0  ;;  %v3383_v11 = vmax.f32 %v3370_v0, 0.0  ;;  %v3372_v43 = vpop.f32.mrb[37].mxu0 }
0x1901   :  { %4497 = shalt.err (!%p4494_p2)
}
0x1902   :  { %s4498_s12 = scalar_lea.hbm %s4776_s3, 256 }
0x1903   :  { %p4499_p3 = scmp.ne.s32.totalorder %s4776_s3, %s4498_s12  ;;  %p4502_p4 = scmp.lt.u32.totalorder %s4498_s12, %s4776_s3 }
0x1905   :  { %p4504_p5 = pnand %p4502_p4, %p4499_p3 }
0x1907   :  { %4507 = shalt.err (!%p4504_p5)
}
0x1908   :  { %3438 = dma.vmem_to_hbm [thread:$0]  %s3436_s10, 256, %s4776_s3, [#allocation34]   ;;  %v3400_v62 = vmax.f32 %v3394_v13, 0.0  ;;  %v3384_v15 = vmax.f32 %v3372_v43, 0.0  ;;  %3405 = vst [vmem:[#allocation32] sm:$0xff] %v3399_v59  ;;  %v3395_v6 = vadd.f32 %v5282_v63, %v3383_v11  ;;  %v3376_v47 = vpop.f32.mrb[38].mxu0 }
0x1909   :  { %v3385_v36 = vmax.f32 %v3376_v47, 0.0  ;;  %v3378_v49 = vpop.f32.mrb[39].mxu0  ;;  %s4612_s25 = smov [#allocation32]  }
0x190a   :  { %3406 = vst [vmem:[#allocation32 + $0x8] sm:$0xff] %v3400_v62  ;;  %v3396_v60 = vadd.f32 %v5284_v35, %v3384_v15  ;;  %v3401_v48 = vmax.f32 %v3395_v6, 0.0  ;;  %v3386_v21 = vmax.f32 %v3378_v49, 0.0  ;;  %s3422_s15 = sshll.u32 %s4612_s25, 4  ;;  %s3423_s15 = int_to_ptr.vmem [resolvable:$true] %s3422_s15 }
0x190b   :  { %v3397_v27 = vadd.f32 %v5288_v1, %v3385_v36  ;;  %s4508_s3 = scalar_lea.vmem %s3423_s15, 768  ;;  %p4513_p7 = scmp.lt.s32.totalorder %s3423_s15, %s3423_s15 }
0x190c   :  { %v3402_v50 = vmax.f32 %v3396_v60, 0.0  ;;  %3407 = vst [vmem:[#allocation32 + $0x10] sm:$0xff] %v3401_v48  ;;  %v3398_v28 = vadd.f32 %v5290_v41, %v3386_v21  ;;  %p4509_p6 = scmp.ne.s32.totalorder %s3423_s15, %s4508_s3  ;;  %p4514_p8 = scmp.lt.s32.totalorder %s4508_s3, %s4508_s3 }
0x190d   :  { %v3403_v53 = vmax.f32 %v3397_v27, 0.0 }
0x190e   :  { %3408 = vst [vmem:[#allocation32 + $0x18] sm:$0xff] %v3402_v50  ;;  %v3404_v39 = vmax.f32 %v3398_v28, 0.0  ;;  %p4515_p9 = por %p4514_p8, %p4513_p7 }
0x190f   :  { %3409 = vst [vmem:[#allocation32 + $0x20] sm:$0xff] %v3403_v53 }
0x1910   :  { %3410 = vst [vmem:[#allocation32 + $0x28] sm:$0xff] %v3404_v39  ;;  %p4516_p10 = pnand %p4515_p9, %p4509_p6 }
0x1912   :  { %4519 = shalt.err (!%p4516_p10)
}
0x1913   :  { %s4520_s17 = scalar_lea.hbm %s4771_s20, 768 }
0x1914   :  { %p4521_p11 = scmp.ne.s32.totalorder %s4771_s20, %s4520_s17  ;;  %p4524_p12 = scmp.lt.u32.totalorder %s4520_s17, %s4771_s20 }
0x1916   :  { %p4526_p13 = pnand %p4524_p12, %p4521_p11 }
0x1918   :  { %4529 = shalt.err (!%p4526_p13)
}
0x1919   :  { %3428 = dma.vmem_to_hbm [thread:$0]  %s3423_s15, 768, %s4771_s20, [#allocation4], %s4592_s16, %s4592_s16, %s4593_s27  }
0x191a   :  { %4550 = dma.done.wait [#allocation4], 768  }
0x191b   :  { %4551 = vsyncadd [#allocation4], 4294966528 }
0x191c   :  { %4552 = dma.done.wait [#allocation34], 256  }
0x191d   :  { %4553 = vsyncadd [#allocation34], 4294967040 }
0x191e   :  { %3445 = vsyncpa [#allocation3], 1 }
0x191f   :  { %3446 = vsyncpa [#allocation6], 1 }
0x1920   :  { %3447 = vsyncpa [#allocation9], 1 }
0x1921   :  { %3448 = vsyncpa [#allocation12], 1 }
0x1922   :  { %3449 = vsyncpa [#allocation15], 1 }
0x1923   :  { %3450 = vsyncpa [#allocation18], 1 }
0x1924   :  { %3451 = vsyncpa [#allocation21], 1 }
0x1925   :  { %3452 = vsyncpa [#allocation24], 1 }
0x1926   :  { %3453 = vsyncpa [#allocation27], 1 }
0x1927   :  { %3454 = vsyncpa [#allocation30], 1 }
0x1928   :  { %3455 = vsyncpa [#allocation4], 1 }
0x1929   :  { %3456 = vsyncpa [#allocation34], 1 }

</bundles_post_ra>
